<compile_context>
chip_gen: v5e
topology: v5e:2x2
jax: 0.10.0
libtpu: 0.0.40
codegen_flags: <defaults>
</compile_context>

<pallas_src>
import functools

import jax
import jax.numpy as jnp
import numpy as np
from jax.experimental import pallas as pl
from jax.experimental.pallas import tpu as pltpu

OOV_INDEX = -1  # params.OOV_INDEX: get_indexes() maps unknown words to -1


def _sigmoid(x):
    # sigmoid(x) = 0.5*tanh(0.5*x) + 0.5: one EUP tanh + cheap VPU ops,
    # avoids exp + f32 divide on the serial recurrence path.
    return 0.5 * jnp.tanh(0.5 * x) + 0.5


def birnn_kernel(idx_ref, len_ref, emb_ref, w_in_ref, b_ref, whh_ref,
                 out_ref, state_ref, xg_ref, rev_ref,
                 *, hidden, max_length, oov_index):
    H = hidden
    H2 = 2 * H
    M = max_length
    L = len_ref[0]                              # runtime sequence length (SMEM)

    # ---- Embedding gather + OOV / padding mask, fused into the kernel ------
    rows = []
    for k in range(M):
        idx = idx_ref[k]
        valid = jnp.logical_and(k < L, idx != oov_index)
        safe = jnp.where(valid, idx, 0)
        row = emb_ref[pl.ds(safe, 1), :]                       # (1, D)
        rows.append(row * valid.astype(jnp.float32))           # OOV/pad -> 0
    x = jnp.concatenate(rows, axis=0)                          # (M, D)

    # ---- Input projection for BOTH directions: one dense (M,D)@(D,8H) ------
    # Column layout (8H wide): gate-major [i f g o], each block [fwd H | rev H].
    xg = jnp.dot(x, w_in_ref[...], preferred_element_type=jnp.float32) + b_ref[...]
    xg_ref[...] = xg              # scratch: reverse-direction rows read dynamically

    # Lane mask selecting the fwd half of every gate block.
    lane = jax.lax.broadcasted_iota(jnp.int32, (1, 8 * H), 1)
    fwd_mask = (lane % H2) < H

    whh = whh_ref[...]                                         # (2H, 8H) block-diag

    h = jnp.zeros((1, H2), jnp.float32)                        # [h_fwd | h_rev]
    c = jnp.zeros((1, H2), jnp.float32)                        # [c_fwd | c_rev]
    hs = []
    for k in range(M):                     # compiled once at max_length (static)
        step_on = k < L
        xg_f = xg_ref[pl.ds(k, 1), :]                          # x[k]     -> fwd gates
        rrow = jnp.maximum(L - 1 - k, 0)
        xg_r = xg_ref[pl.ds(rrow, 1), :]                       # x[L-1-k] -> rev gates
        gx = jnp.where(fwd_mask, xg_f, xg_r)                   # (1, 8H)
        # One (1,2H)@(2H,8H) matmul per step covers both directions.
        gates = gx + jnp.dot(h, whh, preferred_element_type=jnp.float32)
        i_g = _sigmoid(gates[:, 0:H2])
        f_g = _sigmoid(gates[:, H2:2 * H2])
        g_g = jnp.tanh(gates[:, 2 * H2:3 * H2])
        o_g = _sigmoid(gates[:, 3 * H2:4 * H2])
        c_new = f_g * c + i_g * g_g
        h_new = o_g * jnp.tanh(c_new)
        h = jnp.where(step_on, h_new, h)                       # freeze past L
        c = jnp.where(step_on, c_new, c)
        hs.append(jnp.where(step_on, h_new, jnp.zeros_like(h_new)))

    # ---- Bulk output assembly (no per-step stores) --------------------------
    step_slab = jnp.concatenate(hs, axis=0)          # row j = h at step j (0 if j>=L)
    flip_slab = jnp.concatenate(hs[::-1], axis=0)    # row j = h at step M-1-j
    rev_ref[pl.ds(0, M), :] = flip_slab
    rev_ref[pl.ds(M, M), :] = jnp.zeros((M, H2), jnp.float32)
    # Row t = h at step L-1-t for t < L, else 0: one dynamic-offset bulk read.
    rev_slab = rev_ref[pl.ds(M - L, M), :]

    out_ref[...] = jnp.concatenate([step_slab[:, :H],   # fwd output at time t
                                    rev_slab[:, H:]],   # rev output at time t
                                   axis=1)
    # Final states packed 128-lane dense: [h_f h_r | c_f c_r].
    state_ref[...] = jnp.concatenate([h, c], axis=1)


def pack_kernel_weights(wih_f, whh_f, b_f, wih_r, whh_r, b_r):
    """Build fused kernel weights from PyTorch-layout LSTM weights.

    wih_*: (4H, D), whh_*: (4H, H), b_*: (4H,) with b = b_ih + b_hh.
    Column layout of the fused matrices (8H wide): gate-major [i f g o],
    each gate block split [fwd H | rev H].  w_in is dense (D, 8H) -- both
    directions project the SAME x row (no zero blocks, no reversed copy).
    """
    fourH, D = wih_f.shape
    H = fourH // 4
    w_in = jnp.zeros((D, 8 * H), jnp.float32)
    whh_bd = jnp.zeros((2 * H, 8 * H), jnp.float32)    # rows [0:H]=h_f, [H:2H]=h_r
    b = jnp.zeros((8 * H,), jnp.float32)
    for g in range(4):                                 # PyTorch gate order i,f,g,o
        col_f = slice(2 * g * H, (2 * g + 1) * H)
        col_r = slice((2 * g + 1) * H, (2 * g + 2) * H)
        row = slice(g * H, (g + 1) * H)
        w_in = w_in.at[:, col_f].set(wih_f[row, :].T)
        w_in = w_in.at[:, col_r].set(wih_r[row, :].T)
        whh_bd = whh_bd.at[0:H, col_f].set(whh_f[row, :].T)
        whh_bd = whh_bd.at[H:2 * H, col_r].set(whh_r[row, :].T)
        b = b.at[col_f].set(b_f[row])
        b = b.at[col_r].set(b_r[row])
    return w_in, whh_bd, b[None, :]


def make_forward(max_length, hidden_size):
    """Single compiled forward: (padded indices, runtime length, weights)."""
    H = hidden_size
    vmem = pl.BlockSpec(memory_space=pltpu.MemorySpace.VMEM)
    smem = pl.BlockSpec(memory_space=pltpu.MemorySpace.SMEM)
    kernel = functools.partial(birnn_kernel, hidden=H, max_length=max_length,
                               oov_index=OOV_INDEX)

    @jax.jit
    def forward(idx_padded, seq_len, weights):
        outputs, state = pl.pallas_call(
            kernel,
            out_shape=(jax.ShapeDtypeStruct((max_length, 2 * H), jnp.float32),
                       jax.ShapeDtypeStruct((1, 4 * H), jnp.float32)),
            in_specs=[smem, smem, vmem, vmem, vmem, vmem],
            out_specs=(vmem, vmem),
            scratch_shapes=[
                pltpu.VMEM((max_length, 8 * H), jnp.float32),      # xg (gate preacts)
                pltpu.VMEM((2 * max_length, 2 * H), jnp.float32),  # flipped h + zeros
            ],
        )(idx_padded, seq_len, weights["embedding"], weights["w_in"],
          weights["b_in"], weights["whh_bd"])
        hidden = state[:, :2 * H].reshape(1, 1, 2 * H)
        cell = state[:, 2 * H:].reshape(1, 1, 2 * H)
        return outputs, (hidden, cell), (hidden, cell)

    return forward


def pad_indices(indices, max_length):
    """Host-side padding so every call hits the same compiled executable."""
    arr = np.asarray(indices, dtype=np.int32)
    L = int(arr.shape[0])
    assert L <= max_length, "seq_len must be <= max_length"
    padded = np.zeros((max_length,), dtype=np.int32)
    padded[:L] = arr
    return jnp.asarray(padded), jnp.asarray([L], dtype=jnp.int32)


def init_params(key, vocab_size, input_size, hidden_size):
    """Deterministic synthetic parameters matching nn.Embedding + 2x nn.LSTM."""
    ks = jax.random.split(key, 9)
    s = 1.0 / (hidden_size ** 0.5)

    def u(k, shape):
        return jax.random.uniform(k, shape, jnp.float32, -s, s)

    emb = jax.random.normal(ks[0], (vocab_size, input_size), jnp.float32)

    wih_f = u(ks[1], (4 * hidden_size, input_size))
    whh_f = u(ks[2], (4 * hidden_size, hidden_size))
    b_f = u(ks[3], (4 * hidden_size,)) + u(ks[4], (4 * hidden_size,))   # bih+bhh

    wih_r = u(ks[5], (4 * hidden_size, input_size))
    whh_r = u(ks[6], (4 * hidden_size, hidden_size))
    b_r = u(ks[7], (4 * hidden_size,)) + u(ks[8], (4 * hidden_size,))

    w_in, whh_bd, b_in = pack_kernel_weights(wih_f, whh_f, b_f, wih_r, whh_r, b_r)

    return dict(
        embedding=emb,
        # fused kernel weights
        w_in=w_in, whh_bd=whh_bd, b_in=b_in,
        # raw transposed weights for the pure-JAX reference
        wih_f_T=wih_f.T, whh_f_T=whh_f.T, b_f=b_f[None, :],
        wih_r_T=wih_r.T, whh_r_T=whh_r.T, b_r=b_r[None, :],
    )


def _reference_forward(indices, weights, *, max_length, hidden_size):
    """Pure-JAX reference replicating the PyTorch step-by-step LSTM semantics."""
    H = hidden_size
    emb = weights["embedding"]
    mask = (indices != OOV_INDEX)
    safe_idx = jnp.where(mask, indices, 0)
    x = emb[safe_idx] * mask.astype(emb.dtype)[:, None]

    def run(x_seq, wih_T, whh_T, b):
        def cell(carry, x_t):
            h, c = carry
            gates = x_t @ wih_T + h @ whh_T + b[0]
            i = jax.nn.sigmoid(gates[0:H])
            f = jax.nn.sigmoid(gates[H:2 * H])
            g = jnp.tanh(gates[2 * H:3 * H])
            o = jax.nn.sigmoid(gates[3 * H:4 * H])
            c = f * c + i * g
            h = o * jnp.tanh(c)
            return (h, c), h
        init = (jnp.zeros((H,), jnp.float32), jnp.zeros((H,), jnp.float32))
        (h, c), outs = jax.lax.scan(cell, init, x_seq)
        return outs, h, c

    fwd_outs, hf, cf = run(x, weights["wih_f_T"], weights["whh_f_T"], weights["b_f"])
    rev_outs_r, hr, cr = run(x[::-1], weights["wih_r_T"], weights["whh_r_T"], weights["b_r"])
    rev_outs = rev_outs_r[::-1]

    seq_len = x.shape[0]
    fwd_full = jnp.zeros((max_length, H), jnp.float32).at[:seq_len].set(fwd_outs)
    rev_full = jnp.zeros((max_length, H), jnp.float32).at[:seq_len].set(rev_outs)
    outputs = jnp.concatenate([fwd_full, rev_full], axis=1)
    hidden = jnp.concatenate([hf, hr])[None, None, :]
    cell_s = jnp.concatenate([cf, cr])[None, None, :]
    return outputs, hidden, cell_s


if __name__ == "__main__":
    VOCAB_SIZE = 50
    INPUT_SIZE = 32
    HIDDEN_SIZE = 32
    MAX_LENGTH = 16

    key = jax.random.PRNGKey(0)
    pkey, ikey_a, ikey_b = jax.random.split(key, 3)
    weights = init_params(pkey, VOCAB_SIZE, INPUT_SIZE, HIDDEN_SIZE)
    forward = make_forward(MAX_LENGTH, HIDDEN_SIZE)

    def run_and_check(indices_np):
        idx_padded, seq_len = pad_indices(indices_np, MAX_LENGTH)
        outputs, (hidden, cell), projected = forward(idx_padded, seq_len, weights)
        jax.block_until_ready((outputs, hidden, cell))

        ref_out, ref_hid, ref_cell = _reference_forward(
            jnp.asarray(indices_np, dtype=jnp.int32), weights,
            max_length=MAX_LENGTH, hidden_size=HIDDEN_SIZE)

        assert outputs.shape == (MAX_LENGTH, 2 * HIDDEN_SIZE)
        assert hidden.shape == (1, 1, 2 * HIDDEN_SIZE)
        assert cell.shape == (1, 1, 2 * HIDDEN_SIZE)
        assert jnp.allclose(outputs, ref_out, atol=1e-4, rtol=1e-4)
        assert jnp.allclose(hidden, ref_hid, atol=1e-4, rtol=1e-4)
        assert jnp.allclose(cell, ref_cell, atol=1e-4, rtol=1e-4)

    # sentence A: length 8 with an OOV token (exercises the empty-vector path)
    idx_a = np.array(jax.random.randint(ikey_a, (8,), 0, VOCAB_SIZE, dtype=jnp.int32))
    idx_a[3] = OOV_INDEX
    run_and_check(idx_a)

    # sentence B: different runtime length (5) -> same compiled kernel, no retrace
    idx_b = np.array(jax.random.randint(ikey_b, (5,), 0, VOCAB_SIZE, dtype=jnp.int32))
    idx_b[0] = OOV_INDEX
    run_and_check(idx_b)

    print("KERNEL_OK")
</pallas_src>

<mosaic_0001>
module attributes {stable_mosaic.version = 11 : i64} {
  func.func @birnn_kernel(%arg0: memref<16xi32, #tpu.memory_space<smem>>, %arg1: memref<1xi32, #tpu.memory_space<smem>>, %arg2: memref<50x32xf32, #tpu.memory_space<vmem>>, %arg3: memref<32x256xf32, #tpu.memory_space<vmem>>, %arg4: memref<1x256xf32, #tpu.memory_space<vmem>>, %arg5: memref<64x256xf32, #tpu.memory_space<vmem>>, %arg6: memref<16x64xf32, #tpu.memory_space<vmem>>, %arg7: memref<1x128xf32, #tpu.memory_space<vmem>>, %arg8: memref<16x256xf32, #tpu.memory_space<vmem>>, %arg9: memref<32x64xf32, #tpu.memory_space<vmem>>) attributes {dimension_semantics = [], scalar_prefetch = 0 : i64, scratch_operands = 2 : i64, tpu.core_type = #tpu.core_type<tc>} {
    %c0 = arith.constant 0 : index
    %0 = memref.load %arg1[%c0] : memref<1xi32, #tpu.memory_space<smem>>
    %c0_0 = arith.constant 0 : index
    %1 = memref.load %arg0[%c0_0] : memref<16xi32, #tpu.memory_space<smem>>
    %c0_i32 = arith.constant 0 : i32
    %2 = arith.cmpi sgt, %0, %c0_i32 : i32
    %c-1_i32 = arith.constant -1 : i32
    %3 = arith.cmpi ne, %1, %c-1_i32 : i32
    %4 = arith.andi %2, %3 : i1
    %c0_i32_1 = arith.constant 0 : i32
    %5 = arith.select %4, %1, %c0_i32_1 : i32
    %6 = arith.index_cast %5 : i32 to index
    %c0_2 = arith.constant 0 : index
    %7 = vector.load %arg2[%6, %c0_2] : memref<50x32xf32, #tpu.memory_space<vmem>>, vector<1x32xf32>
    %8 = arith.extui %4 : i1 to i32
    %9 = arith.sitofp %8 : i32 to f32
    %10 = vector.broadcast %9 : f32 to vector<1x32xf32>
    %11 = arith.mulf %7, %10 : vector<1x32xf32>
    %c1 = arith.constant 1 : index
    %12 = memref.load %arg0[%c1] : memref<16xi32, #tpu.memory_space<smem>>
    %c1_i32 = arith.constant 1 : i32
    %13 = arith.cmpi sgt, %0, %c1_i32 : i32
    %c-1_i32_3 = arith.constant -1 : i32
    %14 = arith.cmpi ne, %12, %c-1_i32_3 : i32
    %15 = arith.andi %13, %14 : i1
    %c0_i32_4 = arith.constant 0 : i32
    %16 = arith.select %15, %12, %c0_i32_4 : i32
    %17 = arith.index_cast %16 : i32 to index
    %c0_5 = arith.constant 0 : index
    %18 = vector.load %arg2[%17, %c0_5] : memref<50x32xf32, #tpu.memory_space<vmem>>, vector<1x32xf32>
    %19 = arith.extui %15 : i1 to i32
    %20 = arith.sitofp %19 : i32 to f32
    %21 = vector.broadcast %20 : f32 to vector<1x32xf32>
    %22 = arith.mulf %18, %21 : vector<1x32xf32>
    %c2 = arith.constant 2 : index
    %23 = memref.load %arg0[%c2] : memref<16xi32, #tpu.memory_space<smem>>
    %c2_i32 = arith.constant 2 : i32
    %24 = arith.cmpi sgt, %0, %c2_i32 : i32
    %c-1_i32_6 = arith.constant -1 : i32
    %25 = arith.cmpi ne, %23, %c-1_i32_6 : i32
    %26 = arith.andi %24, %25 : i1
    %c0_i32_7 = arith.constant 0 : i32
    %27 = arith.select %26, %23, %c0_i32_7 : i32
    %28 = arith.index_cast %27 : i32 to index
    %c0_8 = arith.constant 0 : index
    %29 = vector.load %arg2[%28, %c0_8] : memref<50x32xf32, #tpu.memory_space<vmem>>, vector<1x32xf32>
    %30 = arith.extui %26 : i1 to i32
    %31 = arith.sitofp %30 : i32 to f32
    %32 = vector.broadcast %31 : f32 to vector<1x32xf32>
    %33 = arith.mulf %29, %32 : vector<1x32xf32>
    %c3 = arith.constant 3 : index
    %34 = memref.load %arg0[%c3] : memref<16xi32, #tpu.memory_space<smem>>
    %c3_i32 = arith.constant 3 : i32
    %35 = arith.cmpi sgt, %0, %c3_i32 : i32
    %c-1_i32_9 = arith.constant -1 : i32
    %36 = arith.cmpi ne, %34, %c-1_i32_9 : i32
    %37 = arith.andi %35, %36 : i1
    %c0_i32_10 = arith.constant 0 : i32
    %38 = arith.select %37, %34, %c0_i32_10 : i32
    %39 = arith.index_cast %38 : i32 to index
    %c0_11 = arith.constant 0 : index
    %40 = vector.load %arg2[%39, %c0_11] : memref<50x32xf32, #tpu.memory_space<vmem>>, vector<1x32xf32>
    %41 = arith.extui %37 : i1 to i32
    %42 = arith.sitofp %41 : i32 to f32
    %43 = vector.broadcast %42 : f32 to vector<1x32xf32>
    %44 = arith.mulf %40, %43 : vector<1x32xf32>
    %c4 = arith.constant 4 : index
    %45 = memref.load %arg0[%c4] : memref<16xi32, #tpu.memory_space<smem>>
    %c4_i32 = arith.constant 4 : i32
    %46 = arith.cmpi sgt, %0, %c4_i32 : i32
    %c-1_i32_12 = arith.constant -1 : i32
    %47 = arith.cmpi ne, %45, %c-1_i32_12 : i32
    %48 = arith.andi %46, %47 : i1
    %c0_i32_13 = arith.constant 0 : i32
    %49 = arith.select %48, %45, %c0_i32_13 : i32
    %50 = arith.index_cast %49 : i32 to index
    %c0_14 = arith.constant 0 : index
    %51 = vector.load %arg2[%50, %c0_14] : memref<50x32xf32, #tpu.memory_space<vmem>>, vector<1x32xf32>
    %52 = arith.extui %48 : i1 to i32
    %53 = arith.sitofp %52 : i32 to f32
    %54 = vector.broadcast %53 : f32 to vector<1x32xf32>
    %55 = arith.mulf %51, %54 : vector<1x32xf32>
    %c5 = arith.constant 5 : index
    %56 = memref.load %arg0[%c5] : memref<16xi32, #tpu.memory_space<smem>>
    %c5_i32 = arith.constant 5 : i32
    %57 = arith.cmpi sgt, %0, %c5_i32 : i32
    %c-1_i32_15 = arith.constant -1 : i32
    %58 = arith.cmpi ne, %56, %c-1_i32_15 : i32
    %59 = arith.andi %57, %58 : i1
    %c0_i32_16 = arith.constant 0 : i32
    %60 = arith.select %59, %56, %c0_i32_16 : i32
    %61 = arith.index_cast %60 : i32 to index
    %c0_17 = arith.constant 0 : index
    %62 = vector.load %arg2[%61, %c0_17] : memref<50x32xf32, #tpu.memory_space<vmem>>, vector<1x32xf32>
    %63 = arith.extui %59 : i1 to i32
    %64 = arith.sitofp %63 : i32 to f32
    %65 = vector.broadcast %64 : f32 to vector<1x32xf32>
    %66 = arith.mulf %62, %65 : vector<1x32xf32>
    %c6 = arith.constant 6 : index
    %67 = memref.load %arg0[%c6] : memref<16xi32, #tpu.memory_space<smem>>
    %c6_i32 = arith.constant 6 : i32
    %68 = arith.cmpi sgt, %0, %c6_i32 : i32
    %c-1_i32_18 = arith.constant -1 : i32
    %69 = arith.cmpi ne, %67, %c-1_i32_18 : i32
    %70 = arith.andi %68, %69 : i1
    %c0_i32_19 = arith.constant 0 : i32
    %71 = arith.select %70, %67, %c0_i32_19 : i32
    %72 = arith.index_cast %71 : i32 to index
    %c0_20 = arith.constant 0 : index
    %73 = vector.load %arg2[%72, %c0_20] : memref<50x32xf32, #tpu.memory_space<vmem>>, vector<1x32xf32>
    %74 = arith.extui %70 : i1 to i32
    %75 = arith.sitofp %74 : i32 to f32
    %76 = vector.broadcast %75 : f32 to vector<1x32xf32>
    %77 = arith.mulf %73, %76 : vector<1x32xf32>
    %c7 = arith.constant 7 : index
    %78 = memref.load %arg0[%c7] : memref<16xi32, #tpu.memory_space<smem>>
    %c7_i32 = arith.constant 7 : i32
    %79 = arith.cmpi sgt, %0, %c7_i32 : i32
    %c-1_i32_21 = arith.constant -1 : i32
    %80 = arith.cmpi ne, %78, %c-1_i32_21 : i32
    %81 = arith.andi %79, %80 : i1
    %c0_i32_22 = arith.constant 0 : i32
    %82 = arith.select %81, %78, %c0_i32_22 : i32
    %83 = arith.index_cast %82 : i32 to index
    %c0_23 = arith.constant 0 : index
    %84 = vector.load %arg2[%83, %c0_23] : memref<50x32xf32, #tpu.memory_space<vmem>>, vector<1x32xf32>
    %85 = arith.extui %81 : i1 to i32
    %86 = arith.sitofp %85 : i32 to f32
    %87 = vector.broadcast %86 : f32 to vector<1x32xf32>
    %88 = arith.mulf %84, %87 : vector<1x32xf32>
    %c8 = arith.constant 8 : index
    %89 = memref.load %arg0[%c8] : memref<16xi32, #tpu.memory_space<smem>>
    %c8_i32 = arith.constant 8 : i32
    %90 = arith.cmpi sgt, %0, %c8_i32 : i32
    %c-1_i32_24 = arith.constant -1 : i32
    %91 = arith.cmpi ne, %89, %c-1_i32_24 : i32
    %92 = arith.andi %90, %91 : i1
    %c0_i32_25 = arith.constant 0 : i32
    %93 = arith.select %92, %89, %c0_i32_25 : i32
    %94 = arith.index_cast %93 : i32 to index
    %c0_26 = arith.constant 0 : index
    %95 = vector.load %arg2[%94, %c0_26] : memref<50x32xf32, #tpu.memory_space<vmem>>, vector<1x32xf32>
    %96 = arith.extui %92 : i1 to i32
    %97 = arith.sitofp %96 : i32 to f32
    %98 = vector.broadcast %97 : f32 to vector<1x32xf32>
    %99 = arith.mulf %95, %98 : vector<1x32xf32>
    %c9 = arith.constant 9 : index
    %100 = memref.load %arg0[%c9] : memref<16xi32, #tpu.memory_space<smem>>
    %c9_i32 = arith.constant 9 : i32
    %101 = arith.cmpi sgt, %0, %c9_i32 : i32
    %c-1_i32_27 = arith.constant -1 : i32
    %102 = arith.cmpi ne, %100, %c-1_i32_27 : i32
    %103 = arith.andi %101, %102 : i1
    %c0_i32_28 = arith.constant 0 : i32
    %104 = arith.select %103, %100, %c0_i32_28 : i32
    %105 = arith.index_cast %104 : i32 to index
    %c0_29 = arith.constant 0 : index
    %106 = vector.load %arg2[%105, %c0_29] : memref<50x32xf32, #tpu.memory_space<vmem>>, vector<1x32xf32>
    %107 = arith.extui %103 : i1 to i32
    %108 = arith.sitofp %107 : i32 to f32
    %109 = vector.broadcast %108 : f32 to vector<1x32xf32>
    %110 = arith.mulf %106, %109 : vector<1x32xf32>
    %c10 = arith.constant 10 : index
    %111 = memref.load %arg0[%c10] : memref<16xi32, #tpu.memory_space<smem>>
    %c10_i32 = arith.constant 10 : i32
    %112 = arith.cmpi sgt, %0, %c10_i32 : i32
    %c-1_i32_30 = arith.constant -1 : i32
    %113 = arith.cmpi ne, %111, %c-1_i32_30 : i32
    %114 = arith.andi %112, %113 : i1
    %c0_i32_31 = arith.constant 0 : i32
    %115 = arith.select %114, %111, %c0_i32_31 : i32
    %116 = arith.index_cast %115 : i32 to index
    %c0_32 = arith.constant 0 : index
    %117 = vector.load %arg2[%116, %c0_32] : memref<50x32xf32, #tpu.memory_space<vmem>>, vector<1x32xf32>
    %118 = arith.extui %114 : i1 to i32
    %119 = arith.sitofp %118 : i32 to f32
    %120 = vector.broadcast %119 : f32 to vector<1x32xf32>
    %121 = arith.mulf %117, %120 : vector<1x32xf32>
    %c11 = arith.constant 11 : index
    %122 = memref.load %arg0[%c11] : memref<16xi32, #tpu.memory_space<smem>>
    %c11_i32 = arith.constant 11 : i32
    %123 = arith.cmpi sgt, %0, %c11_i32 : i32
    %c-1_i32_33 = arith.constant -1 : i32
    %124 = arith.cmpi ne, %122, %c-1_i32_33 : i32
    %125 = arith.andi %123, %124 : i1
    %c0_i32_34 = arith.constant 0 : i32
    %126 = arith.select %125, %122, %c0_i32_34 : i32
    %127 = arith.index_cast %126 : i32 to index
    %c0_35 = arith.constant 0 : index
    %128 = vector.load %arg2[%127, %c0_35] : memref<50x32xf32, #tpu.memory_space<vmem>>, vector<1x32xf32>
    %129 = arith.extui %125 : i1 to i32
    %130 = arith.sitofp %129 : i32 to f32
    %131 = vector.broadcast %130 : f32 to vector<1x32xf32>
    %132 = arith.mulf %128, %131 : vector<1x32xf32>
    %c12 = arith.constant 12 : index
    %133 = memref.load %arg0[%c12] : memref<16xi32, #tpu.memory_space<smem>>
    %c12_i32 = arith.constant 12 : i32
    %134 = arith.cmpi sgt, %0, %c12_i32 : i32
    %c-1_i32_36 = arith.constant -1 : i32
    %135 = arith.cmpi ne, %133, %c-1_i32_36 : i32
    %136 = arith.andi %134, %135 : i1
    %c0_i32_37 = arith.constant 0 : i32
    %137 = arith.select %136, %133, %c0_i32_37 : i32
    %138 = arith.index_cast %137 : i32 to index
    %c0_38 = arith.constant 0 : index
    %139 = vector.load %arg2[%138, %c0_38] : memref<50x32xf32, #tpu.memory_space<vmem>>, vector<1x32xf32>
    %140 = arith.extui %136 : i1 to i32
    %141 = arith.sitofp %140 : i32 to f32
    %142 = vector.broadcast %141 : f32 to vector<1x32xf32>
    %143 = arith.mulf %139, %142 : vector<1x32xf32>
    %c13 = arith.constant 13 : index
    %144 = memref.load %arg0[%c13] : memref<16xi32, #tpu.memory_space<smem>>
    %c13_i32 = arith.constant 13 : i32
    %145 = arith.cmpi sgt, %0, %c13_i32 : i32
    %c-1_i32_39 = arith.constant -1 : i32
    %146 = arith.cmpi ne, %144, %c-1_i32_39 : i32
    %147 = arith.andi %145, %146 : i1
    %c0_i32_40 = arith.constant 0 : i32
    %148 = arith.select %147, %144, %c0_i32_40 : i32
    %149 = arith.index_cast %148 : i32 to index
    %c0_41 = arith.constant 0 : index
    %150 = vector.load %arg2[%149, %c0_41] : memref<50x32xf32, #tpu.memory_space<vmem>>, vector<1x32xf32>
    %151 = arith.extui %147 : i1 to i32
    %152 = arith.sitofp %151 : i32 to f32
    %153 = vector.broadcast %152 : f32 to vector<1x32xf32>
    %154 = arith.mulf %150, %153 : vector<1x32xf32>
    %c14 = arith.constant 14 : index
    %155 = memref.load %arg0[%c14] : memref<16xi32, #tpu.memory_space<smem>>
    %c14_i32 = arith.constant 14 : i32
    %156 = arith.cmpi sgt, %0, %c14_i32 : i32
    %c-1_i32_42 = arith.constant -1 : i32
    %157 = arith.cmpi ne, %155, %c-1_i32_42 : i32
    %158 = arith.andi %156, %157 : i1
    %c0_i32_43 = arith.constant 0 : i32
    %159 = arith.select %158, %155, %c0_i32_43 : i32
    %160 = arith.index_cast %159 : i32 to index
    %c0_44 = arith.constant 0 : index
    %161 = vector.load %arg2[%160, %c0_44] : memref<50x32xf32, #tpu.memory_space<vmem>>, vector<1x32xf32>
    %162 = arith.extui %158 : i1 to i32
    %163 = arith.sitofp %162 : i32 to f32
    %164 = vector.broadcast %163 : f32 to vector<1x32xf32>
    %165 = arith.mulf %161, %164 : vector<1x32xf32>
    %c15 = arith.constant 15 : index
    %166 = memref.load %arg0[%c15] : memref<16xi32, #tpu.memory_space<smem>>
    %c15_i32 = arith.constant 15 : i32
    %167 = arith.cmpi sgt, %0, %c15_i32 : i32
    %c-1_i32_45 = arith.constant -1 : i32
    %168 = arith.cmpi ne, %166, %c-1_i32_45 : i32
    %169 = arith.andi %167, %168 : i1
    %c0_i32_46 = arith.constant 0 : i32
    %170 = arith.select %169, %166, %c0_i32_46 : i32
    %171 = arith.index_cast %170 : i32 to index
    %c0_47 = arith.constant 0 : index
    %172 = vector.load %arg2[%171, %c0_47] : memref<50x32xf32, #tpu.memory_space<vmem>>, vector<1x32xf32>
    %173 = arith.extui %169 : i1 to i32
    %174 = arith.sitofp %173 : i32 to f32
    %175 = vector.broadcast %174 : f32 to vector<1x32xf32>
    %176 = arith.mulf %172, %175 : vector<1x32xf32>
    %177 = tpu.concatenate %11, %22, %33, %44, %55, %66, %77, %88, %99, %110, %121, %132, %143, %154, %165, %176 in 0 : vector<1x32xf32>, vector<1x32xf32>, vector<1x32xf32>, vector<1x32xf32>, vector<1x32xf32>, vector<1x32xf32>, vector<1x32xf32>, vector<1x32xf32>, vector<1x32xf32>, vector<1x32xf32>, vector<1x32xf32>, vector<1x32xf32>, vector<1x32xf32>, vector<1x32xf32>, vector<1x32xf32>, vector<1x32xf32> -> vector<16x32xf32>
    %c0_48 = arith.constant 0 : index
    %c0_49 = arith.constant 0 : index
    %178 = vector.load %arg3[%c0_48, %c0_49] : memref<32x256xf32, #tpu.memory_space<vmem>>, vector<32x256xf32>
    %cst = arith.constant dense<0.000000e+00> : vector<16x256xf32>
    %179 = tpu.matmul %177, %178, %cst {dimension_numbers = #tpu.dot_dimension_numbers<[1], [0], [0], [1], [0, 0, 1, 1], [], []>} : vector<16x32xf32>, vector<32x256xf32>, vector<16x256xf32> -> vector<16x256xf32>
    %c0_50 = arith.constant 0 : index
    %c0_51 = arith.constant 0 : index
    %180 = vector.load %arg4[%c0_50, %c0_51] : memref<1x256xf32, #tpu.memory_space<vmem>>, vector<1x256xf32>
    %181 = vector.broadcast %180 : vector<1x256xf32> to vector<16x256xf32>
    %182 = arith.addf %179, %181 : vector<16x256xf32>
    %c0_52 = arith.constant 0 : index
    %c0_53 = arith.constant 0 : index
    %183 = vector.load %arg8[%c0_52, %c0_53] : memref<16x256xf32, #tpu.memory_space<vmem>>, vector<16x256xf32>
    tpu.vector_store %arg8[%c0_52, %c0_53], %182 {strides = array<i32>} : memref<16x256xf32, #tpu.memory_space<vmem>>, vector<16x256xf32>,
    %184 = tpu.iota {dimensions = array<i32: 1>} : vector<1x256xi32>
    %c64_i32 = arith.constant 64 : i32
    %c0_i32_54 = arith.constant 0 : i32
    %185 = arith.cmpi eq, %c64_i32, %c0_i32_54 : i32
    %c1_i32_55 = arith.constant 1 : i32
    %186 = arith.select %185, %c1_i32_55, %c64_i32 : i32
    %187 = vector.broadcast %186 : i32 to vector<1x256xi32>
    %188 = arith.remsi %184, %187 : vector<1x256xi32>
    %c0_i32_56 = arith.constant 0 : i32
    %189 = vector.broadcast %c0_i32_56 : i32 to vector<1x256xi32>
    %190 = arith.cmpi ne, %188, %189 : vector<1x256xi32>
    %c0_i32_57 = arith.constant 0 : i32
    %191 = vector.broadcast %c0_i32_57 : i32 to vector<1x256xi32>
    %192 = arith.cmpi slt, %188, %191 : vector<1x256xi32>
    %c0_i32_58 = arith.constant 0 : i32
    %193 = arith.cmpi slt, %186, %c0_i32_58 : i32
    %194 = vector.broadcast %193 : i1 to vector<1x256xi1>
    %195 = vector.broadcast %194 : vector<1x256xi1> to vector<1x256xi1>
    %196 = arith.xori %192, %195 : vector<1x256xi1>
    %197 = arith.andi %196, %190 : vector<1x256xi1>
    %198 = vector.broadcast %186 : i32 to vector<1x256xi32>
    %199 = arith.addi %188, %198 : vector<1x256xi32>
    %200 = arith.select %197, %199, %188 : vector<1x256xi1>, vector<1x256xi32>
    %c32_i32 = arith.constant 32 : i32
    %201 = vector.broadcast %c32_i32 : i32 to vector<1x256xi32>
    %202 = arith.cmpi slt, %200, %201 : vector<1x256xi32>
    %c0_59 = arith.constant 0 : index
    %c0_60 = arith.constant 0 : index
    %203 = vector.load %arg5[%c0_59, %c0_60] : memref<64x256xf32, #tpu.memory_space<vmem>>, vector<64x256xf32>
    %cst_61 = arith.constant 0.000000e+00 : f32
    %204 = vector.broadcast %cst_61 : f32 to vector<1x64xf32>
    %cst_62 = arith.constant 0.000000e+00 : f32
    %205 = vector.broadcast %cst_62 : f32 to vector<1x64xf32>
    %c0_i32_63 = arith.constant 0 : i32
    %206 = arith.cmpi sgt, %0, %c0_i32_63 : i32
    %c0_64 = arith.constant 0 : index
    %c0_65 = arith.constant 0 : index
    %207 = vector.load %arg8[%c0_64, %c0_65] : memref<16x256xf32, #tpu.memory_space<vmem>>, vector<1x256xf32>
    %c1_i32_66 = arith.constant 1 : i32
    %208 = arith.subi %0, %c1_i32_66 : i32
    %c0_i32_67 = arith.constant 0 : i32
    %209 = arith.subi %208, %c0_i32_67 : i32
    %c0_i32_68 = arith.constant 0 : i32
    %210 = arith.maxsi %209, %c0_i32_68 : i32
    %211 = arith.index_cast %210 : i32 to index
    %c0_69 = arith.constant 0 : index
    %212 = vector.load %arg8[%211, %c0_69] : memref<16x256xf32, #tpu.memory_space<vmem>>, vector<1x256xf32>
    %213 = arith.select %202, %207, %212 : vector<1x256xi1>, vector<1x256xf32>
    %cst_70 = arith.constant dense<0.000000e+00> : vector<1x256xf32>
    %214 = tpu.matmul %204, %203, %cst_70 {dimension_numbers = #tpu.dot_dimension_numbers<[1], [0], [0], [1], [0, 0, 1, 1], [], []>} : vector<1x64xf32>, vector<64x256xf32>, vector<1x256xf32> -> vector<1x256xf32>
    %215 = arith.addf %213, %214 : vector<1x256xf32>
    %216 = vector.extract_strided_slice %215 {offsets = [0, 0], sizes = [1, 64], strides = [1, 1]} : vector<1x256xf32> to vector<1x64xf32>
    %cst_71 = arith.constant 5.000000e-01 : f32
    %217 = vector.broadcast %cst_71 : f32 to vector<1x64xf32>
    %218 = arith.mulf %217, %216 : vector<1x64xf32>
    %219 = math.tanh %218 : vector<1x64xf32>
    %cst_72 = arith.constant 5.000000e-01 : f32
    %220 = vector.broadcast %cst_72 : f32 to vector<1x64xf32>
    %221 = arith.mulf %220, %219 : vector<1x64xf32>
    %cst_73 = arith.constant 5.000000e-01 : f32
    %222 = vector.broadcast %cst_73 : f32 to vector<1x64xf32>
    %223 = arith.addf %221, %222 : vector<1x64xf32>
    %224 = vector.extract_strided_slice %215 {offsets = [0, 64], sizes = [1, 64], strides = [1, 1]} : vector<1x256xf32> to vector<1x64xf32>
    %cst_74 = arith.constant 5.000000e-01 : f32
    %225 = vector.broadcast %cst_74 : f32 to vector<1x64xf32>
    %226 = arith.mulf %225, %224 : vector<1x64xf32>
    %227 = math.tanh %226 : vector<1x64xf32>
    %cst_75 = arith.constant 5.000000e-01 : f32
    %228 = vector.broadcast %cst_75 : f32 to vector<1x64xf32>
    %229 = arith.mulf %228, %227 : vector<1x64xf32>
    %cst_76 = arith.constant 5.000000e-01 : f32
    %230 = vector.broadcast %cst_76 : f32 to vector<1x64xf32>
    %231 = arith.addf %229, %230 : vector<1x64xf32>
    %232 = vector.extract_strided_slice %215 {offsets = [0, 128], sizes = [1, 64], strides = [1, 1]} : vector<1x256xf32> to vector<1x64xf32>
    %233 = math.tanh %232 : vector<1x64xf32>
    %234 = vector.extract_strided_slice %215 {offsets = [0, 192], sizes = [1, 64], strides = [1, 1]} : vector<1x256xf32> to vector<1x64xf32>
    %cst_77 = arith.constant 5.000000e-01 : f32
    %235 = vector.broadcast %cst_77 : f32 to vector<1x64xf32>
    %236 = arith.mulf %235, %234 : vector<1x64xf32>
    %237 = math.tanh %236 : vector<1x64xf32>
    %cst_78 = arith.constant 5.000000e-01 : f32
    %238 = vector.broadcast %cst_78 : f32 to vector<1x64xf32>
    %239 = arith.mulf %238, %237 : vector<1x64xf32>
    %cst_79 = arith.constant 5.000000e-01 : f32
    %240 = vector.broadcast %cst_79 : f32 to vector<1x64xf32>
    %241 = arith.addf %239, %240 : vector<1x64xf32>
    %242 = arith.mulf %231, %205 : vector<1x64xf32>
    %243 = arith.mulf %223, %233 : vector<1x64xf32>
    %244 = arith.addf %242, %243 : vector<1x64xf32>
    %245 = math.tanh %244 : vector<1x64xf32>
    %246 = arith.mulf %241, %245 : vector<1x64xf32>
    %247 = arith.select %206, %246, %204 : vector<1x64xf32>
    %248 = arith.select %206, %244, %205 : vector<1x64xf32>
    %cst_80 = arith.constant 0.000000e+00 : f32
    %249 = vector.broadcast %cst_80 : f32 to vector<1x64xf32>
    %250 = arith.select %206, %246, %249 : vector<1x64xf32>
    %c1_i32_81 = arith.constant 1 : i32
    %251 = arith.cmpi sgt, %0, %c1_i32_81 : i32
    %c1_82 = arith.constant 1 : index
    %c0_83 = arith.constant 0 : index
    %252 = vector.load %arg8[%c1_82, %c0_83] : memref<16x256xf32, #tpu.memory_space<vmem>>, vector<1x256xf32>
    %c1_i32_84 = arith.constant 1 : i32
    %253 = arith.subi %0, %c1_i32_84 : i32
    %c1_i32_85 = arith.constant 1 : i32
    %254 = arith.subi %253, %c1_i32_85 : i32
    %c0_i32_86 = arith.constant 0 : i32
    %255 = arith.maxsi %254, %c0_i32_86 : i32
    %256 = arith.index_cast %255 : i32 to index
    %c0_87 = arith.constant 0 : index
    %257 = vector.load %arg8[%256, %c0_87] : memref<16x256xf32, #tpu.memory_space<vmem>>, vector<1x256xf32>
    %258 = arith.select %202, %252, %257 : vector<1x256xi1>, vector<1x256xf32>
    %cst_88 = arith.constant dense<0.000000e+00> : vector<1x256xf32>
    %259 = tpu.matmul %247, %203, %cst_88 {dimension_numbers = #tpu.dot_dimension_numbers<[1], [0], [0], [1], [0, 0, 1, 1], [], []>} : vector<1x64xf32>, vector<64x256xf32>, vector<1x256xf32> -> vector<1x256xf32>
    %260 = arith.addf %258, %259 : vector<1x256xf32>
    %261 = vector.extract_strided_slice %260 {offsets = [0, 0], sizes = [1, 64], strides = [1, 1]} : vector<1x256xf32> to vector<1x64xf32>
    %cst_89 = arith.constant 5.000000e-01 : f32
    %262 = vector.broadcast %cst_89 : f32 to vector<1x64xf32>
    %263 = arith.mulf %262, %261 : vector<1x64xf32>
    %264 = math.tanh %263 : vector<1x64xf32>
    %cst_90 = arith.constant 5.000000e-01 : f32
    %265 = vector.broadcast %cst_90 : f32 to vector<1x64xf32>
    %266 = arith.mulf %265, %264 : vector<1x64xf32>
    %cst_91 = arith.constant 5.000000e-01 : f32
    %267 = vector.broadcast %cst_91 : f32 to vector<1x64xf32>
    %268 = arith.addf %266, %267 : vector<1x64xf32>
    %269 = vector.extract_strided_slice %260 {offsets = [0, 64], sizes = [1, 64], strides = [1, 1]} : vector<1x256xf32> to vector<1x64xf32>
    %cst_92 = arith.constant 5.000000e-01 : f32
    %270 = vector.broadcast %cst_92 : f32 to vector<1x64xf32>
    %271 = arith.mulf %270, %269 : vector<1x64xf32>
    %272 = math.tanh %271 : vector<1x64xf32>
    %cst_93 = arith.constant 5.000000e-01 : f32
    %273 = vector.broadcast %cst_93 : f32 to vector<1x64xf32>
    %274 = arith.mulf %273, %272 : vector<1x64xf32>
    %cst_94 = arith.constant 5.000000e-01 : f32
    %275 = vector.broadcast %cst_94 : f32 to vector<1x64xf32>
    %276 = arith.addf %274, %275 : vector<1x64xf32>
    %277 = vector.extract_strided_slice %260 {offsets = [0, 128], sizes = [1, 64], strides = [1, 1]} : vector<1x256xf32> to vector<1x64xf32>
    %278 = math.tanh %277 : vector<1x64xf32>
    %279 = vector.extract_strided_slice %260 {offsets = [0, 192], sizes = [1, 64], strides = [1, 1]} : vector<1x256xf32> to vector<1x64xf32>
    %cst_95 = arith.constant 5.000000e-01 : f32
    %280 = vector.broadcast %cst_95 : f32 to vector<1x64xf32>
    %281 = arith.mulf %280, %279 : vector<1x64xf32>
    %282 = math.tanh %281 : vector<1x64xf32>
    %cst_96 = arith.constant 5.000000e-01 : f32
    %283 = vector.broadcast %cst_96 : f32 to vector<1x64xf32>
    %284 = arith.mulf %283, %282 : vector<1x64xf32>
    %cst_97 = arith.constant 5.000000e-01 : f32
    %285 = vector.broadcast %cst_97 : f32 to vector<1x64xf32>
    %286 = arith.addf %284, %285 : vector<1x64xf32>
    %287 = arith.mulf %276, %248 : vector<1x64xf32>
    %288 = arith.mulf %268, %278 : vector<1x64xf32>
    %289 = arith.addf %287, %288 : vector<1x64xf32>
    %290 = math.tanh %289 : vector<1x64xf32>
    %291 = arith.mulf %286, %290 : vector<1x64xf32>
    %292 = arith.select %251, %291, %247 : vector<1x64xf32>
    %293 = arith.select %251, %289, %248 : vector<1x64xf32>
    %cst_98 = arith.constant 0.000000e+00 : f32
    %294 = vector.broadcast %cst_98 : f32 to vector<1x64xf32>
    %295 = arith.select %251, %291, %294 : vector<1x64xf32>
    %c2_i32_99 = arith.constant 2 : i32
    %296 = arith.cmpi sgt, %0, %c2_i32_99 : i32
    %c2_100 = arith.constant 2 : index
    %c0_101 = arith.constant 0 : index
    %297 = vector.load %arg8[%c2_100, %c0_101] : memref<16x256xf32, #tpu.memory_space<vmem>>, vector<1x256xf32>
    %c1_i32_102 = arith.constant 1 : i32
    %298 = arith.subi %0, %c1_i32_102 : i32
    %c2_i32_103 = arith.constant 2 : i32
    %299 = arith.subi %298, %c2_i32_103 : i32
    %c0_i32_104 = arith.constant 0 : i32
    %300 = arith.maxsi %299, %c0_i32_104 : i32
    %301 = arith.index_cast %300 : i32 to index
    %c0_105 = arith.constant 0 : index
    %302 = vector.load %arg8[%301, %c0_105] : memref<16x256xf32, #tpu.memory_space<vmem>>, vector<1x256xf32>
    %303 = arith.select %202, %297, %302 : vector<1x256xi1>, vector<1x256xf32>
    %cst_106 = arith.constant dense<0.000000e+00> : vector<1x256xf32>
    %304 = tpu.matmul %292, %203, %cst_106 {dimension_numbers = #tpu.dot_dimension_numbers<[1], [0], [0], [1], [0, 0, 1, 1], [], []>} : vector<1x64xf32>, vector<64x256xf32>, vector<1x256xf32> -> vector<1x256xf32>
    %305 = arith.addf %303, %304 : vector<1x256xf32>
    %306 = vector.extract_strided_slice %305 {offsets = [0, 0], sizes = [1, 64], strides = [1, 1]} : vector<1x256xf32> to vector<1x64xf32>
    %cst_107 = arith.constant 5.000000e-01 : f32
    %307 = vector.broadcast %cst_107 : f32 to vector<1x64xf32>
    %308 = arith.mulf %307, %306 : vector<1x64xf32>
    %309 = math.tanh %308 : vector<1x64xf32>
    %cst_108 = arith.constant 5.000000e-01 : f32
    %310 = vector.broadcast %cst_108 : f32 to vector<1x64xf32>
    %311 = arith.mulf %310, %309 : vector<1x64xf32>
    %cst_109 = arith.constant 5.000000e-01 : f32
    %312 = vector.broadcast %cst_109 : f32 to vector<1x64xf32>
    %313 = arith.addf %311, %312 : vector<1x64xf32>
    %314 = vector.extract_strided_slice %305 {offsets = [0, 64], sizes = [1, 64], strides = [1, 1]} : vector<1x256xf32> to vector<1x64xf32>
    %cst_110 = arith.constant 5.000000e-01 : f32
    %315 = vector.broadcast %cst_110 : f32 to vector<1x64xf32>
    %316 = arith.mulf %315, %314 : vector<1x64xf32>
    %317 = math.tanh %316 : vector<1x64xf32>
    %cst_111 = arith.constant 5.000000e-01 : f32
    %318 = vector.broadcast %cst_111 : f32 to vector<1x64xf32>
    %319 = arith.mulf %318, %317 : vector<1x64xf32>
    %cst_112 = arith.constant 5.000000e-01 : f32
    %320 = vector.broadcast %cst_112 : f32 to vector<1x64xf32>
    %321 = arith.addf %319, %320 : vector<1x64xf32>
    %322 = vector.extract_strided_slice %305 {offsets = [0, 128], sizes = [1, 64], strides = [1, 1]} : vector<1x256xf32> to vector<1x64xf32>
    %323 = math.tanh %322 : vector<1x64xf32>
    %324 = vector.extract_strided_slice %305 {offsets = [0, 192], sizes = [1, 64], strides = [1, 1]} : vector<1x256xf32> to vector<1x64xf32>
    %cst_113 = arith.constant 5.000000e-01 : f32
    %325 = vector.broadcast %cst_113 : f32 to vector<1x64xf32>
    %326 = arith.mulf %325, %324 : vector<1x64xf32>
    %327 = math.tanh %326 : vector<1x64xf32>
    %cst_114 = arith.constant 5.000000e-01 : f32
    %328 = vector.broadcast %cst_114 : f32 to vector<1x64xf32>
    %329 = arith.mulf %328, %327 : vector<1x64xf32>
    %cst_115 = arith.constant 5.000000e-01 : f32
    %330 = vector.broadcast %cst_115 : f32 to vector<1x64xf32>
    %331 = arith.addf %329, %330 : vector<1x64xf32>
    %332 = arith.mulf %321, %293 : vector<1x64xf32>
    %333 = arith.mulf %313, %323 : vector<1x64xf32>
    %334 = arith.addf %332, %333 : vector<1x64xf32>
    %335 = math.tanh %334 : vector<1x64xf32>
    %336 = arith.mulf %331, %335 : vector<1x64xf32>
    %337 = arith.select %296, %336, %292 : vector<1x64xf32>
    %338 = arith.select %296, %334, %293 : vector<1x64xf32>
    %cst_116 = arith.constant 0.000000e+00 : f32
    %339 = vector.broadcast %cst_116 : f32 to vector<1x64xf32>
    %340 = arith.select %296, %336, %339 : vector<1x64xf32>
    %c3_i32_117 = arith.constant 3 : i32
    %341 = arith.cmpi sgt, %0, %c3_i32_117 : i32
    %c3_118 = arith.constant 3 : index
    %c0_119 = arith.constant 0 : index
    %342 = vector.load %arg8[%c3_118, %c0_119] : memref<16x256xf32, #tpu.memory_space<vmem>>, vector<1x256xf32>
    %c1_i32_120 = arith.constant 1 : i32
    %343 = arith.subi %0, %c1_i32_120 : i32
    %c3_i32_121 = arith.constant 3 : i32
    %344 = arith.subi %343, %c3_i32_121 : i32
    %c0_i32_122 = arith.constant 0 : i32
    %345 = arith.maxsi %344, %c0_i32_122 : i32
    %346 = arith.index_cast %345 : i32 to index
    %c0_123 = arith.constant 0 : index
    %347 = vector.load %arg8[%346, %c0_123] : memref<16x256xf32, #tpu.memory_space<vmem>>, vector<1x256xf32>
    %348 = arith.select %202, %342, %347 : vector<1x256xi1>, vector<1x256xf32>
    %cst_124 = arith.constant dense<0.000000e+00> : vector<1x256xf32>
    %349 = tpu.matmul %337, %203, %cst_124 {dimension_numbers = #tpu.dot_dimension_numbers<[1], [0], [0], [1], [0, 0, 1, 1], [], []>} : vector<1x64xf32>, vector<64x256xf32>, vector<1x256xf32> -> vector<1x256xf32>
    %350 = arith.addf %348, %349 : vector<1x256xf32>
    %351 = vector.extract_strided_slice %350 {offsets = [0, 0], sizes = [1, 64], strides = [1, 1]} : vector<1x256xf32> to vector<1x64xf32>
    %cst_125 = arith.constant 5.000000e-01 : f32
    %352 = vector.broadcast %cst_125 : f32 to vector<1x64xf32>
    %353 = arith.mulf %352, %351 : vector<1x64xf32>
    %354 = math.tanh %353 : vector<1x64xf32>
    %cst_126 = arith.constant 5.000000e-01 : f32
    %355 = vector.broadcast %cst_126 : f32 to vector<1x64xf32>
    %356 = arith.mulf %355, %354 : vector<1x64xf32>
    %cst_127 = arith.constant 5.000000e-01 : f32
    %357 = vector.broadcast %cst_127 : f32 to vector<1x64xf32>
    %358 = arith.addf %356, %357 : vector<1x64xf32>
    %359 = vector.extract_strided_slice %350 {offsets = [0, 64], sizes = [1, 64], strides = [1, 1]} : vector<1x256xf32> to vector<1x64xf32>
    %cst_128 = arith.constant 5.000000e-01 : f32
    %360 = vector.broadcast %cst_128 : f32 to vector<1x64xf32>
    %361 = arith.mulf %360, %359 : vector<1x64xf32>
    %362 = math.tanh %361 : vector<1x64xf32>
    %cst_129 = arith.constant 5.000000e-01 : f32
    %363 = vector.broadcast %cst_129 : f32 to vector<1x64xf32>
    %364 = arith.mulf %363, %362 : vector<1x64xf32>
    %cst_130 = arith.constant 5.000000e-01 : f32
    %365 = vector.broadcast %cst_130 : f32 to vector<1x64xf32>
    %366 = arith.addf %364, %365 : vector<1x64xf32>
    %367 = vector.extract_strided_slice %350 {offsets = [0, 128], sizes = [1, 64], strides = [1, 1]} : vector<1x256xf32> to vector<1x64xf32>
    %368 = math.tanh %367 : vector<1x64xf32>
    %369 = vector.extract_strided_slice %350 {offsets = [0, 192], sizes = [1, 64], strides = [1, 1]} : vector<1x256xf32> to vector<1x64xf32>
    %cst_131 = arith.constant 5.000000e-01 : f32
    %370 = vector.broadcast %cst_131 : f32 to vector<1x64xf32>
    %371 = arith.mulf %370, %369 : vector<1x64xf32>
    %372 = math.tanh %371 : vector<1x64xf32>
    %cst_132 = arith.constant 5.000000e-01 : f32
    %373 = vector.broadcast %cst_132 : f32 to vector<1x64xf32>
    %374 = arith.mulf %373, %372 : vector<1x64xf32>
    %cst_133 = arith.constant 5.000000e-01 : f32
    %375 = vector.broadcast %cst_133 : f32 to vector<1x64xf32>
    %376 = arith.addf %374, %375 : vector<1x64xf32>
    %377 = arith.mulf %366, %338 : vector<1x64xf32>
    %378 = arith.mulf %358, %368 : vector<1x64xf32>
    %379 = arith.addf %377, %378 : vector<1x64xf32>
    %380 = math.tanh %379 : vector<1x64xf32>
    %381 = arith.mulf %376, %380 : vector<1x64xf32>
    %382 = arith.select %341, %381, %337 : vector<1x64xf32>
    %383 = arith.select %341, %379, %338 : vector<1x64xf32>
    %cst_134 = arith.constant 0.000000e+00 : f32
    %384 = vector.broadcast %cst_134 : f32 to vector<1x64xf32>
    %385 = arith.select %341, %381, %384 : vector<1x64xf32>
    %c4_i32_135 = arith.constant 4 : i32
    %386 = arith.cmpi sgt, %0, %c4_i32_135 : i32
    %c4_136 = arith.constant 4 : index
    %c0_137 = arith.constant 0 : index
    %387 = vector.load %arg8[%c4_136, %c0_137] : memref<16x256xf32, #tpu.memory_space<vmem>>, vector<1x256xf32>
    %c1_i32_138 = arith.constant 1 : i32
    %388 = arith.subi %0, %c1_i32_138 : i32
    %c4_i32_139 = arith.constant 4 : i32
    %389 = arith.subi %388, %c4_i32_139 : i32
    %c0_i32_140 = arith.constant 0 : i32
    %390 = arith.maxsi %389, %c0_i32_140 : i32
    %391 = arith.index_cast %390 : i32 to index
    %c0_141 = arith.constant 0 : index
    %392 = vector.load %arg8[%391, %c0_141] : memref<16x256xf32, #tpu.memory_space<vmem>>, vector<1x256xf32>
    %393 = arith.select %202, %387, %392 : vector<1x256xi1>, vector<1x256xf32>
    %cst_142 = arith.constant dense<0.000000e+00> : vector<1x256xf32>
    %394 = tpu.matmul %382, %203, %cst_142 {dimension_numbers = #tpu.dot_dimension_numbers<[1], [0], [0], [1], [0, 0, 1, 1], [], []>} : vector<1x64xf32>, vector<64x256xf32>, vector<1x256xf32> -> vector<1x256xf32>
    %395 = arith.addf %393, %394 : vector<1x256xf32>
    %396 = vector.extract_strided_slice %395 {offsets = [0, 0], sizes = [1, 64], strides = [1, 1]} : vector<1x256xf32> to vector<1x64xf32>
    %cst_143 = arith.constant 5.000000e-01 : f32
    %397 = vector.broadcast %cst_143 : f32 to vector<1x64xf32>
    %398 = arith.mulf %397, %396 : vector<1x64xf32>
    %399 = math.tanh %398 : vector<1x64xf32>
    %cst_144 = arith.constant 5.000000e-01 : f32
    %400 = vector.broadcast %cst_144 : f32 to vector<1x64xf32>
    %401 = arith.mulf %400, %399 : vector<1x64xf32>
    %cst_145 = arith.constant 5.000000e-01 : f32
    %402 = vector.broadcast %cst_145 : f32 to vector<1x64xf32>
    %403 = arith.addf %401, %402 : vector<1x64xf32>
    %404 = vector.extract_strided_slice %395 {offsets = [0, 64], sizes = [1, 64], strides = [1, 1]} : vector<1x256xf32> to vector<1x64xf32>
    %cst_146 = arith.constant 5.000000e-01 : f32
    %405 = vector.broadcast %cst_146 : f32 to vector<1x64xf32>
    %406 = arith.mulf %405, %404 : vector<1x64xf32>
    %407 = math.tanh %406 : vector<1x64xf32>
    %cst_147 = arith.constant 5.000000e-01 : f32
    %408 = vector.broadcast %cst_147 : f32 to vector<1x64xf32>
    %409 = arith.mulf %408, %407 : vector<1x64xf32>
    %cst_148 = arith.constant 5.000000e-01 : f32
    %410 = vector.broadcast %cst_148 : f32 to vector<1x64xf32>
    %411 = arith.addf %409, %410 : vector<1x64xf32>
    %412 = vector.extract_strided_slice %395 {offsets = [0, 128], sizes = [1, 64], strides = [1, 1]} : vector<1x256xf32> to vector<1x64xf32>
    %413 = math.tanh %412 : vector<1x64xf32>
    %414 = vector.extract_strided_slice %395 {offsets = [0, 192], sizes = [1, 64], strides = [1, 1]} : vector<1x256xf32> to vector<1x64xf32>
    %cst_149 = arith.constant 5.000000e-01 : f32
    %415 = vector.broadcast %cst_149 : f32 to vector<1x64xf32>
    %416 = arith.mulf %415, %414 : vector<1x64xf32>
    %417 = math.tanh %416 : vector<1x64xf32>
    %cst_150 = arith.constant 5.000000e-01 : f32
    %418 = vector.broadcast %cst_150 : f32 to vector<1x64xf32>
    %419 = arith.mulf %418, %417 : vector<1x64xf32>
    %cst_151 = arith.constant 5.000000e-01 : f32
    %420 = vector.broadcast %cst_151 : f32 to vector<1x64xf32>
    %421 = arith.addf %419, %420 : vector<1x64xf32>
    %422 = arith.mulf %411, %383 : vector<1x64xf32>
    %423 = arith.mulf %403, %413 : vector<1x64xf32>
    %424 = arith.addf %422, %423 : vector<1x64xf32>
    %425 = math.tanh %424 : vector<1x64xf32>
    %426 = arith.mulf %421, %425 : vector<1x64xf32>
    %427 = arith.select %386, %426, %382 : vector<1x64xf32>
    %428 = arith.select %386, %424, %383 : vector<1x64xf32>
    %cst_152 = arith.constant 0.000000e+00 : f32
    %429 = vector.broadcast %cst_152 : f32 to vector<1x64xf32>
    %430 = arith.select %386, %426, %429 : vector<1x64xf32>
    %c5_i32_153 = arith.constant 5 : i32
    %431 = arith.cmpi sgt, %0, %c5_i32_153 : i32
    %c5_154 = arith.constant 5 : index
    %c0_155 = arith.constant 0 : index
    %432 = vector.load %arg8[%c5_154, %c0_155] : memref<16x256xf32, #tpu.memory_space<vmem>>, vector<1x256xf32>
    %c1_i32_156 = arith.constant 1 : i32
    %433 = arith.subi %0, %c1_i32_156 : i32
    %c5_i32_157 = arith.constant 5 : i32
    %434 = arith.subi %433, %c5_i32_157 : i32
    %c0_i32_158 = arith.constant 0 : i32
    %435 = arith.maxsi %434, %c0_i32_158 : i32
    %436 = arith.index_cast %435 : i32 to index
    %c0_159 = arith.constant 0 : index
    %437 = vector.load %arg8[%436, %c0_159] : memref<16x256xf32, #tpu.memory_space<vmem>>, vector<1x256xf32>
    %438 = arith.select %202, %432, %437 : vector<1x256xi1>, vector<1x256xf32>
    %cst_160 = arith.constant dense<0.000000e+00> : vector<1x256xf32>
    %439 = tpu.matmul %427, %203, %cst_160 {dimension_numbers = #tpu.dot_dimension_numbers<[1], [0], [0], [1], [0, 0, 1, 1], [], []>} : vector<1x64xf32>, vector<64x256xf32>, vector<1x256xf32> -> vector<1x256xf32>
    %440 = arith.addf %438, %439 : vector<1x256xf32>
    %441 = vector.extract_strided_slice %440 {offsets = [0, 0], sizes = [1, 64], strides = [1, 1]} : vector<1x256xf32> to vector<1x64xf32>
    %cst_161 = arith.constant 5.000000e-01 : f32
    %442 = vector.broadcast %cst_161 : f32 to vector<1x64xf32>
    %443 = arith.mulf %442, %441 : vector<1x64xf32>
    %444 = math.tanh %443 : vector<1x64xf32>
    %cst_162 = arith.constant 5.000000e-01 : f32
    %445 = vector.broadcast %cst_162 : f32 to vector<1x64xf32>
    %446 = arith.mulf %445, %444 : vector<1x64xf32>
    %cst_163 = arith.constant 5.000000e-01 : f32
    %447 = vector.broadcast %cst_163 : f32 to vector<1x64xf32>
    %448 = arith.addf %446, %447 : vector<1x64xf32>
    %449 = vector.extract_strided_slice %440 {offsets = [0, 64], sizes = [1, 64], strides = [1, 1]} : vector<1x256xf32> to vector<1x64xf32>
    %cst_164 = arith.constant 5.000000e-01 : f32
    %450 = vector.broadcast %cst_164 : f32 to vector<1x64xf32>
    %451 = arith.mulf %450, %449 : vector<1x64xf32>
    %452 = math.tanh %451 : vector<1x64xf32>
    %cst_165 = arith.constant 5.000000e-01 : f32
    %453 = vector.broadcast %cst_165 : f32 to vector<1x64xf32>
    %454 = arith.mulf %453, %452 : vector<1x64xf32>
    %cst_166 = arith.constant 5.000000e-01 : f32
    %455 = vector.broadcast %cst_166 : f32 to vector<1x64xf32>
    %456 = arith.addf %454, %455 : vector<1x64xf32>
    %457 = vector.extract_strided_slice %440 {offsets = [0, 128], sizes = [1, 64], strides = [1, 1]} : vector<1x256xf32> to vector<1x64xf32>
    %458 = math.tanh %457 : vector<1x64xf32>
    %459 = vector.extract_strided_slice %440 {offsets = [0, 192], sizes = [1, 64], strides = [1, 1]} : vector<1x256xf32> to vector<1x64xf32>
    %cst_167 = arith.constant 5.000000e-01 : f32
    %460 = vector.broadcast %cst_167 : f32 to vector<1x64xf32>
    %461 = arith.mulf %460, %459 : vector<1x64xf32>
    %462 = math.tanh %461 : vector<1x64xf32>
    %cst_168 = arith.constant 5.000000e-01 : f32
    %463 = vector.broadcast %cst_168 : f32 to vector<1x64xf32>
    %464 = arith.mulf %463, %462 : vector<1x64xf32>
    %cst_169 = arith.constant 5.000000e-01 : f32
    %465 = vector.broadcast %cst_169 : f32 to vector<1x64xf32>
    %466 = arith.addf %464, %465 : vector<1x64xf32>
    %467 = arith.mulf %456, %428 : vector<1x64xf32>
    %468 = arith.mulf %448, %458 : vector<1x64xf32>
    %469 = arith.addf %467, %468 : vector<1x64xf32>
    %470 = math.tanh %469 : vector<1x64xf32>
    %471 = arith.mulf %466, %470 : vector<1x64xf32>
    %472 = arith.select %431, %471, %427 : vector<1x64xf32>
    %473 = arith.select %431, %469, %428 : vector<1x64xf32>
    %cst_170 = arith.constant 0.000000e+00 : f32
    %474 = vector.broadcast %cst_170 : f32 to vector<1x64xf32>
    %475 = arith.select %431, %471, %474 : vector<1x64xf32>
    %c6_i32_171 = arith.constant 6 : i32
    %476 = arith.cmpi sgt, %0, %c6_i32_171 : i32
    %c6_172 = arith.constant 6 : index
    %c0_173 = arith.constant 0 : index
    %477 = vector.load %arg8[%c6_172, %c0_173] : memref<16x256xf32, #tpu.memory_space<vmem>>, vector<1x256xf32>
    %c1_i32_174 = arith.constant 1 : i32
    %478 = arith.subi %0, %c1_i32_174 : i32
    %c6_i32_175 = arith.constant 6 : i32
    %479 = arith.subi %478, %c6_i32_175 : i32
    %c0_i32_176 = arith.constant 0 : i32
    %480 = arith.maxsi %479, %c0_i32_176 : i32
    %481 = arith.index_cast %480 : i32 to index
    %c0_177 = arith.constant 0 : index
    %482 = vector.load %arg8[%481, %c0_177] : memref<16x256xf32, #tpu.memory_space<vmem>>, vector<1x256xf32>
    %483 = arith.select %202, %477, %482 : vector<1x256xi1>, vector<1x256xf32>
    %cst_178 = arith.constant dense<0.000000e+00> : vector<1x256xf32>
    %484 = tpu.matmul %472, %203, %cst_178 {dimension_numbers = #tpu.dot_dimension_numbers<[1], [0], [0], [1], [0, 0, 1, 1], [], []>} : vector<1x64xf32>, vector<64x256xf32>, vector<1x256xf32> -> vector<1x256xf32>
    %485 = arith.addf %483, %484 : vector<1x256xf32>
    %486 = vector.extract_strided_slice %485 {offsets = [0, 0], sizes = [1, 64], strides = [1, 1]} : vector<1x256xf32> to vector<1x64xf32>
    %cst_179 = arith.constant 5.000000e-01 : f32
    %487 = vector.broadcast %cst_179 : f32 to vector<1x64xf32>
    %488 = arith.mulf %487, %486 : vector<1x64xf32>
    %489 = math.tanh %488 : vector<1x64xf32>
    %cst_180 = arith.constant 5.000000e-01 : f32
    %490 = vector.broadcast %cst_180 : f32 to vector<1x64xf32>
    %491 = arith.mulf %490, %489 : vector<1x64xf32>
    %cst_181 = arith.constant 5.000000e-01 : f32
    %492 = vector.broadcast %cst_181 : f32 to vector<1x64xf32>
    %493 = arith.addf %491, %492 : vector<1x64xf32>
    %494 = vector.extract_strided_slice %485 {offsets = [0, 64], sizes = [1, 64], strides = [1, 1]} : vector<1x256xf32> to vector<1x64xf32>
    %cst_182 = arith.constant 5.000000e-01 : f32
    %495 = vector.broadcast %cst_182 : f32 to vector<1x64xf32>
    %496 = arith.mulf %495, %494 : vector<1x64xf32>
    %497 = math.tanh %496 : vector<1x64xf32>
    %cst_183 = arith.constant 5.000000e-01 : f32
    %498 = vector.broadcast %cst_183 : f32 to vector<1x64xf32>
    %499 = arith.mulf %498, %497 : vector<1x64xf32>
    %cst_184 = arith.constant 5.000000e-01 : f32
    %500 = vector.broadcast %cst_184 : f32 to vector<1x64xf32>
    %501 = arith.addf %499, %500 : vector<1x64xf32>
    %502 = vector.extract_strided_slice %485 {offsets = [0, 128], sizes = [1, 64], strides = [1, 1]} : vector<1x256xf32> to vector<1x64xf32>
    %503 = math.tanh %502 : vector<1x64xf32>
    %504 = vector.extract_strided_slice %485 {offsets = [0, 192], sizes = [1, 64], strides = [1, 1]} : vector<1x256xf32> to vector<1x64xf32>
    %cst_185 = arith.constant 5.000000e-01 : f32
    %505 = vector.broadcast %cst_185 : f32 to vector<1x64xf32>
    %506 = arith.mulf %505, %504 : vector<1x64xf32>
    %507 = math.tanh %506 : vector<1x64xf32>
    %cst_186 = arith.constant 5.000000e-01 : f32
    %508 = vector.broadcast %cst_186 : f32 to vector<1x64xf32>
    %509 = arith.mulf %508, %507 : vector<1x64xf32>
    %cst_187 = arith.constant 5.000000e-01 : f32
    %510 = vector.broadcast %cst_187 : f32 to vector<1x64xf32>
    %511 = arith.addf %509, %510 : vector<1x64xf32>
    %512 = arith.mulf %501, %473 : vector<1x64xf32>
    %513 = arith.mulf %493, %503 : vector<1x64xf32>
    %514 = arith.addf %512, %513 : vector<1x64xf32>
    %515 = math.tanh %514 : vector<1x64xf32>
    %516 = arith.mulf %511, %515 : vector<1x64xf32>
    %517 = arith.select %476, %516, %472 : vector<1x64xf32>
    %518 = arith.select %476, %514, %473 : vector<1x64xf32>
    %cst_188 = arith.constant 0.000000e+00 : f32
    %519 = vector.broadcast %cst_188 : f32 to vector<1x64xf32>
    %520 = arith.select %476, %516, %519 : vector<1x64xf32>
    %c7_i32_189 = arith.constant 7 : i32
    %521 = arith.cmpi sgt, %0, %c7_i32_189 : i32
    %c7_190 = arith.constant 7 : index
    %c0_191 = arith.constant 0 : index
    %522 = vector.load %arg8[%c7_190, %c0_191] : memref<16x256xf32, #tpu.memory_space<vmem>>, vector<1x256xf32>
    %c1_i32_192 = arith.constant 1 : i32
    %523 = arith.subi %0, %c1_i32_192 : i32
    %c7_i32_193 = arith.constant 7 : i32
    %524 = arith.subi %523, %c7_i32_193 : i32
    %c0_i32_194 = arith.constant 0 : i32
    %525 = arith.maxsi %524, %c0_i32_194 : i32
    %526 = arith.index_cast %525 : i32 to index
    %c0_195 = arith.constant 0 : index
    %527 = vector.load %arg8[%526, %c0_195] : memref<16x256xf32, #tpu.memory_space<vmem>>, vector<1x256xf32>
    %528 = arith.select %202, %522, %527 : vector<1x256xi1>, vector<1x256xf32>
    %cst_196 = arith.constant dense<0.000000e+00> : vector<1x256xf32>
    %529 = tpu.matmul %517, %203, %cst_196 {dimension_numbers = #tpu.dot_dimension_numbers<[1], [0], [0], [1], [0, 0, 1, 1], [], []>} : vector<1x64xf32>, vector<64x256xf32>, vector<1x256xf32> -> vector<1x256xf32>
    %530 = arith.addf %528, %529 : vector<1x256xf32>
    %531 = vector.extract_strided_slice %530 {offsets = [0, 0], sizes = [1, 64], strides = [1, 1]} : vector<1x256xf32> to vector<1x64xf32>
    %cst_197 = arith.constant 5.000000e-01 : f32
    %532 = vector.broadcast %cst_197 : f32 to vector<1x64xf32>
    %533 = arith.mulf %532, %531 : vector<1x64xf32>
    %534 = math.tanh %533 : vector<1x64xf32>
    %cst_198 = arith.constant 5.000000e-01 : f32
    %535 = vector.broadcast %cst_198 : f32 to vector<1x64xf32>
    %536 = arith.mulf %535, %534 : vector<1x64xf32>
    %cst_199 = arith.constant 5.000000e-01 : f32
    %537 = vector.broadcast %cst_199 : f32 to vector<1x64xf32>
    %538 = arith.addf %536, %537 : vector<1x64xf32>
    %539 = vector.extract_strided_slice %530 {offsets = [0, 64], sizes = [1, 64], strides = [1, 1]} : vector<1x256xf32> to vector<1x64xf32>
    %cst_200 = arith.constant 5.000000e-01 : f32
    %540 = vector.broadcast %cst_200 : f32 to vector<1x64xf32>
    %541 = arith.mulf %540, %539 : vector<1x64xf32>
    %542 = math.tanh %541 : vector<1x64xf32>
    %cst_201 = arith.constant 5.000000e-01 : f32
    %543 = vector.broadcast %cst_201 : f32 to vector<1x64xf32>
    %544 = arith.mulf %543, %542 : vector<1x64xf32>
    %cst_202 = arith.constant 5.000000e-01 : f32
    %545 = vector.broadcast %cst_202 : f32 to vector<1x64xf32>
    %546 = arith.addf %544, %545 : vector<1x64xf32>
    %547 = vector.extract_strided_slice %530 {offsets = [0, 128], sizes = [1, 64], strides = [1, 1]} : vector<1x256xf32> to vector<1x64xf32>
    %548 = math.tanh %547 : vector<1x64xf32>
    %549 = vector.extract_strided_slice %530 {offsets = [0, 192], sizes = [1, 64], strides = [1, 1]} : vector<1x256xf32> to vector<1x64xf32>
    %cst_203 = arith.constant 5.000000e-01 : f32
    %550 = vector.broadcast %cst_203 : f32 to vector<1x64xf32>
    %551 = arith.mulf %550, %549 : vector<1x64xf32>
    %552 = math.tanh %551 : vector<1x64xf32>
    %cst_204 = arith.constant 5.000000e-01 : f32
    %553 = vector.broadcast %cst_204 : f32 to vector<1x64xf32>
    %554 = arith.mulf %553, %552 : vector<1x64xf32>
    %cst_205 = arith.constant 5.000000e-01 : f32
    %555 = vector.broadcast %cst_205 : f32 to vector<1x64xf32>
    %556 = arith.addf %554, %555 : vector<1x64xf32>
    %557 = arith.mulf %546, %518 : vector<1x64xf32>
    %558 = arith.mulf %538, %548 : vector<1x64xf32>
    %559 = arith.addf %557, %558 : vector<1x64xf32>
    %560 = math.tanh %559 : vector<1x64xf32>
    %561 = arith.mulf %556, %560 : vector<1x64xf32>
    %562 = arith.select %521, %561, %517 : vector<1x64xf32>
    %563 = arith.select %521, %559, %518 : vector<1x64xf32>
    %cst_206 = arith.constant 0.000000e+00 : f32
    %564 = vector.broadcast %cst_206 : f32 to vector<1x64xf32>
    %565 = arith.select %521, %561, %564 : vector<1x64xf32>
    %c8_i32_207 = arith.constant 8 : i32
    %566 = arith.cmpi sgt, %0, %c8_i32_207 : i32
    %c8_208 = arith.constant 8 : index
    %c0_209 = arith.constant 0 : index
    %567 = vector.load %arg8[%c8_208, %c0_209] : memref<16x256xf32, #tpu.memory_space<vmem>>, vector<1x256xf32>
    %c1_i32_210 = arith.constant 1 : i32
    %568 = arith.subi %0, %c1_i32_210 : i32
    %c8_i32_211 = arith.constant 8 : i32
    %569 = arith.subi %568, %c8_i32_211 : i32
    %c0_i32_212 = arith.constant 0 : i32
    %570 = arith.maxsi %569, %c0_i32_212 : i32
    %571 = arith.index_cast %570 : i32 to index
    %c0_213 = arith.constant 0 : index
    %572 = vector.load %arg8[%571, %c0_213] : memref<16x256xf32, #tpu.memory_space<vmem>>, vector<1x256xf32>
    %573 = arith.select %202, %567, %572 : vector<1x256xi1>, vector<1x256xf32>
    %cst_214 = arith.constant dense<0.000000e+00> : vector<1x256xf32>
    %574 = tpu.matmul %562, %203, %cst_214 {dimension_numbers = #tpu.dot_dimension_numbers<[1], [0], [0], [1], [0, 0, 1, 1], [], []>} : vector<1x64xf32>, vector<64x256xf32>, vector<1x256xf32> -> vector<1x256xf32>
    %575 = arith.addf %573, %574 : vector<1x256xf32>
    %576 = vector.extract_strided_slice %575 {offsets = [0, 0], sizes = [1, 64], strides = [1, 1]} : vector<1x256xf32> to vector<1x64xf32>
    %cst_215 = arith.constant 5.000000e-01 : f32
    %577 = vector.broadcast %cst_215 : f32 to vector<1x64xf32>
    %578 = arith.mulf %577, %576 : vector<1x64xf32>
    %579 = math.tanh %578 : vector<1x64xf32>
    %cst_216 = arith.constant 5.000000e-01 : f32
    %580 = vector.broadcast %cst_216 : f32 to vector<1x64xf32>
    %581 = arith.mulf %580, %579 : vector<1x64xf32>
    %cst_217 = arith.constant 5.000000e-01 : f32
    %582 = vector.broadcast %cst_217 : f32 to vector<1x64xf32>
    %583 = arith.addf %581, %582 : vector<1x64xf32>
    %584 = vector.extract_strided_slice %575 {offsets = [0, 64], sizes = [1, 64], strides = [1, 1]} : vector<1x256xf32> to vector<1x64xf32>
    %cst_218 = arith.constant 5.000000e-01 : f32
    %585 = vector.broadcast %cst_218 : f32 to vector<1x64xf32>
    %586 = arith.mulf %585, %584 : vector<1x64xf32>
    %587 = math.tanh %586 : vector<1x64xf32>
    %cst_219 = arith.constant 5.000000e-01 : f32
    %588 = vector.broadcast %cst_219 : f32 to vector<1x64xf32>
    %589 = arith.mulf %588, %587 : vector<1x64xf32>
    %cst_220 = arith.constant 5.000000e-01 : f32
    %590 = vector.broadcast %cst_220 : f32 to vector<1x64xf32>
    %591 = arith.addf %589, %590 : vector<1x64xf32>
    %592 = vector.extract_strided_slice %575 {offsets = [0, 128], sizes = [1, 64], strides = [1, 1]} : vector<1x256xf32> to vector<1x64xf32>
    %593 = math.tanh %592 : vector<1x64xf32>
    %594 = vector.extract_strided_slice %575 {offsets = [0, 192], sizes = [1, 64], strides = [1, 1]} : vector<1x256xf32> to vector<1x64xf32>
    %cst_221 = arith.constant 5.000000e-01 : f32
    %595 = vector.broadcast %cst_221 : f32 to vector<1x64xf32>
    %596 = arith.mulf %595, %594 : vector<1x64xf32>
    %597 = math.tanh %596 : vector<1x64xf32>
    %cst_222 = arith.constant 5.000000e-01 : f32
    %598 = vector.broadcast %cst_222 : f32 to vector<1x64xf32>
    %599 = arith.mulf %598, %597 : vector<1x64xf32>
    %cst_223 = arith.constant 5.000000e-01 : f32
    %600 = vector.broadcast %cst_223 : f32 to vector<1x64xf32>
    %601 = arith.addf %599, %600 : vector<1x64xf32>
    %602 = arith.mulf %591, %563 : vector<1x64xf32>
    %603 = arith.mulf %583, %593 : vector<1x64xf32>
    %604 = arith.addf %602, %603 : vector<1x64xf32>
    %605 = math.tanh %604 : vector<1x64xf32>
    %606 = arith.mulf %601, %605 : vector<1x64xf32>
    %607 = arith.select %566, %606, %562 : vector<1x64xf32>
    %608 = arith.select %566, %604, %563 : vector<1x64xf32>
    %cst_224 = arith.constant 0.000000e+00 : f32
    %609 = vector.broadcast %cst_224 : f32 to vector<1x64xf32>
    %610 = arith.select %566, %606, %609 : vector<1x64xf32>
    %c9_i32_225 = arith.constant 9 : i32
    %611 = arith.cmpi sgt, %0, %c9_i32_225 : i32
    %c9_226 = arith.constant 9 : index
    %c0_227 = arith.constant 0 : index
    %612 = vector.load %arg8[%c9_226, %c0_227] : memref<16x256xf32, #tpu.memory_space<vmem>>, vector<1x256xf32>
    %c1_i32_228 = arith.constant 1 : i32
    %613 = arith.subi %0, %c1_i32_228 : i32
    %c9_i32_229 = arith.constant 9 : i32
    %614 = arith.subi %613, %c9_i32_229 : i32
    %c0_i32_230 = arith.constant 0 : i32
    %615 = arith.maxsi %614, %c0_i32_230 : i32
    %616 = arith.index_cast %615 : i32 to index
    %c0_231 = arith.constant 0 : index
    %617 = vector.load %arg8[%616, %c0_231] : memref<16x256xf32, #tpu.memory_space<vmem>>, vector<1x256xf32>
    %618 = arith.select %202, %612, %617 : vector<1x256xi1>, vector<1x256xf32>
    %cst_232 = arith.constant dense<0.000000e+00> : vector<1x256xf32>
    %619 = tpu.matmul %607, %203, %cst_232 {dimension_numbers = #tpu.dot_dimension_numbers<[1], [0], [0], [1], [0, 0, 1, 1], [], []>} : vector<1x64xf32>, vector<64x256xf32>, vector<1x256xf32> -> vector<1x256xf32>
    %620 = arith.addf %618, %619 : vector<1x256xf32>
    %621 = vector.extract_strided_slice %620 {offsets = [0, 0], sizes = [1, 64], strides = [1, 1]} : vector<1x256xf32> to vector<1x64xf32>
    %cst_233 = arith.constant 5.000000e-01 : f32
    %622 = vector.broadcast %cst_233 : f32 to vector<1x64xf32>
    %623 = arith.mulf %622, %621 : vector<1x64xf32>
    %624 = math.tanh %623 : vector<1x64xf32>
    %cst_234 = arith.constant 5.000000e-01 : f32
    %625 = vector.broadcast %cst_234 : f32 to vector<1x64xf32>
    %626 = arith.mulf %625, %624 : vector<1x64xf32>
    %cst_235 = arith.constant 5.000000e-01 : f32
    %627 = vector.broadcast %cst_235 : f32 to vector<1x64xf32>
    %628 = arith.addf %626, %627 : vector<1x64xf32>
    %629 = vector.extract_strided_slice %620 {offsets = [0, 64], sizes = [1, 64], strides = [1, 1]} : vector<1x256xf32> to vector<1x64xf32>
    %cst_236 = arith.constant 5.000000e-01 : f32
    %630 = vector.broadcast %cst_236 : f32 to vector<1x64xf32>
    %631 = arith.mulf %630, %629 : vector<1x64xf32>
    %632 = math.tanh %631 : vector<1x64xf32>
    %cst_237 = arith.constant 5.000000e-01 : f32
    %633 = vector.broadcast %cst_237 : f32 to vector<1x64xf32>
    %634 = arith.mulf %633, %632 : vector<1x64xf32>
    %cst_238 = arith.constant 5.000000e-01 : f32
    %635 = vector.broadcast %cst_238 : f32 to vector<1x64xf32>
    %636 = arith.addf %634, %635 : vector<1x64xf32>
    %637 = vector.extract_strided_slice %620 {offsets = [0, 128], sizes = [1, 64], strides = [1, 1]} : vector<1x256xf32> to vector<1x64xf32>
    %638 = math.tanh %637 : vector<1x64xf32>
    %639 = vector.extract_strided_slice %620 {offsets = [0, 192], sizes = [1, 64], strides = [1, 1]} : vector<1x256xf32> to vector<1x64xf32>
    %cst_239 = arith.constant 5.000000e-01 : f32
    %640 = vector.broadcast %cst_239 : f32 to vector<1x64xf32>
    %641 = arith.mulf %640, %639 : vector<1x64xf32>
    %642 = math.tanh %641 : vector<1x64xf32>
    %cst_240 = arith.constant 5.000000e-01 : f32
    %643 = vector.broadcast %cst_240 : f32 to vector<1x64xf32>
    %644 = arith.mulf %643, %642 : vector<1x64xf32>
    %cst_241 = arith.constant 5.000000e-01 : f32
    %645 = vector.broadcast %cst_241 : f32 to vector<1x64xf32>
    %646 = arith.addf %644, %645 : vector<1x64xf32>
    %647 = arith.mulf %636, %608 : vector<1x64xf32>
    %648 = arith.mulf %628, %638 : vector<1x64xf32>
    %649 = arith.addf %647, %648 : vector<1x64xf32>
    %650 = math.tanh %649 : vector<1x64xf32>
    %651 = arith.mulf %646, %650 : vector<1x64xf32>
    %652 = arith.select %611, %651, %607 : vector<1x64xf32>
    %653 = arith.select %611, %649, %608 : vector<1x64xf32>
    %cst_242 = arith.constant 0.000000e+00 : f32
    %654 = vector.broadcast %cst_242 : f32 to vector<1x64xf32>
    %655 = arith.select %611, %651, %654 : vector<1x64xf32>
    %c10_i32_243 = arith.constant 10 : i32
    %656 = arith.cmpi sgt, %0, %c10_i32_243 : i32
    %c10_244 = arith.constant 10 : index
    %c0_245 = arith.constant 0 : index
    %657 = vector.load %arg8[%c10_244, %c0_245] : memref<16x256xf32, #tpu.memory_space<vmem>>, vector<1x256xf32>
    %c1_i32_246 = arith.constant 1 : i32
    %658 = arith.subi %0, %c1_i32_246 : i32
    %c10_i32_247 = arith.constant 10 : i32
    %659 = arith.subi %658, %c10_i32_247 : i32
    %c0_i32_248 = arith.constant 0 : i32
    %660 = arith.maxsi %659, %c0_i32_248 : i32
    %661 = arith.index_cast %660 : i32 to index
    %c0_249 = arith.constant 0 : index
    %662 = vector.load %arg8[%661, %c0_249] : memref<16x256xf32, #tpu.memory_space<vmem>>, vector<1x256xf32>
    %663 = arith.select %202, %657, %662 : vector<1x256xi1>, vector<1x256xf32>
    %cst_250 = arith.constant dense<0.000000e+00> : vector<1x256xf32>
    %664 = tpu.matmul %652, %203, %cst_250 {dimension_numbers = #tpu.dot_dimension_numbers<[1], [0], [0], [1], [0, 0, 1, 1], [], []>} : vector<1x64xf32>, vector<64x256xf32>, vector<1x256xf32> -> vector<1x256xf32>
    %665 = arith.addf %663, %664 : vector<1x256xf32>
    %666 = vector.extract_strided_slice %665 {offsets = [0, 0], sizes = [1, 64], strides = [1, 1]} : vector<1x256xf32> to vector<1x64xf32>
    %cst_251 = arith.constant 5.000000e-01 : f32
    %667 = vector.broadcast %cst_251 : f32 to vector<1x64xf32>
    %668 = arith.mulf %667, %666 : vector<1x64xf32>
    %669 = math.tanh %668 : vector<1x64xf32>
    %cst_252 = arith.constant 5.000000e-01 : f32
    %670 = vector.broadcast %cst_252 : f32 to vector<1x64xf32>
    %671 = arith.mulf %670, %669 : vector<1x64xf32>
    %cst_253 = arith.constant 5.000000e-01 : f32
    %672 = vector.broadcast %cst_253 : f32 to vector<1x64xf32>
    %673 = arith.addf %671, %672 : vector<1x64xf32>
    %674 = vector.extract_strided_slice %665 {offsets = [0, 64], sizes = [1, 64], strides = [1, 1]} : vector<1x256xf32> to vector<1x64xf32>
    %cst_254 = arith.constant 5.000000e-01 : f32
    %675 = vector.broadcast %cst_254 : f32 to vector<1x64xf32>
    %676 = arith.mulf %675, %674 : vector<1x64xf32>
    %677 = math.tanh %676 : vector<1x64xf32>
    %cst_255 = arith.constant 5.000000e-01 : f32
    %678 = vector.broadcast %cst_255 : f32 to vector<1x64xf32>
    %679 = arith.mulf %678, %677 : vector<1x64xf32>
    %cst_256 = arith.constant 5.000000e-01 : f32
    %680 = vector.broadcast %cst_256 : f32 to vector<1x64xf32>
    %681 = arith.addf %679, %680 : vector<1x64xf32>
    %682 = vector.extract_strided_slice %665 {offsets = [0, 128], sizes = [1, 64], strides = [1, 1]} : vector<1x256xf32> to vector<1x64xf32>
    %683 = math.tanh %682 : vector<1x64xf32>
    %684 = vector.extract_strided_slice %665 {offsets = [0, 192], sizes = [1, 64], strides = [1, 1]} : vector<1x256xf32> to vector<1x64xf32>
    %cst_257 = arith.constant 5.000000e-01 : f32
    %685 = vector.broadcast %cst_257 : f32 to vector<1x64xf32>
    %686 = arith.mulf %685, %684 : vector<1x64xf32>
    %687 = math.tanh %686 : vector<1x64xf32>
    %cst_258 = arith.constant 5.000000e-01 : f32
    %688 = vector.broadcast %cst_258 : f32 to vector<1x64xf32>
    %689 = arith.mulf %688, %687 : vector<1x64xf32>
    %cst_259 = arith.constant 5.000000e-01 : f32
    %690 = vector.broadcast %cst_259 : f32 to vector<1x64xf32>
    %691 = arith.addf %689, %690 : vector<1x64xf32>
    %692 = arith.mulf %681, %653 : vector<1x64xf32>
    %693 = arith.mulf %673, %683 : vector<1x64xf32>
    %694 = arith.addf %692, %693 : vector<1x64xf32>
    %695 = math.tanh %694 : vector<1x64xf32>
    %696 = arith.mulf %691, %695 : vector<1x64xf32>
    %697 = arith.select %656, %696, %652 : vector<1x64xf32>
    %698 = arith.select %656, %694, %653 : vector<1x64xf32>
    %cst_260 = arith.constant 0.000000e+00 : f32
    %699 = vector.broadcast %cst_260 : f32 to vector<1x64xf32>
    %700 = arith.select %656, %696, %699 : vector<1x64xf32>
    %c11_i32_261 = arith.constant 11 : i32
    %701 = arith.cmpi sgt, %0, %c11_i32_261 : i32
    %c11_262 = arith.constant 11 : index
    %c0_263 = arith.constant 0 : index
    %702 = vector.load %arg8[%c11_262, %c0_263] : memref<16x256xf32, #tpu.memory_space<vmem>>, vector<1x256xf32>
    %c1_i32_264 = arith.constant 1 : i32
    %703 = arith.subi %0, %c1_i32_264 : i32
    %c11_i32_265 = arith.constant 11 : i32
    %704 = arith.subi %703, %c11_i32_265 : i32
    %c0_i32_266 = arith.constant 0 : i32
    %705 = arith.maxsi %704, %c0_i32_266 : i32
    %706 = arith.index_cast %705 : i32 to index
    %c0_267 = arith.constant 0 : index
    %707 = vector.load %arg8[%706, %c0_267] : memref<16x256xf32, #tpu.memory_space<vmem>>, vector<1x256xf32>
    %708 = arith.select %202, %702, %707 : vector<1x256xi1>, vector<1x256xf32>
    %cst_268 = arith.constant dense<0.000000e+00> : vector<1x256xf32>
    %709 = tpu.matmul %697, %203, %cst_268 {dimension_numbers = #tpu.dot_dimension_numbers<[1], [0], [0], [1], [0, 0, 1, 1], [], []>} : vector<1x64xf32>, vector<64x256xf32>, vector<1x256xf32> -> vector<1x256xf32>
    %710 = arith.addf %708, %709 : vector<1x256xf32>
    %711 = vector.extract_strided_slice %710 {offsets = [0, 0], sizes = [1, 64], strides = [1, 1]} : vector<1x256xf32> to vector<1x64xf32>
    %cst_269 = arith.constant 5.000000e-01 : f32
    %712 = vector.broadcast %cst_269 : f32 to vector<1x64xf32>
    %713 = arith.mulf %712, %711 : vector<1x64xf32>
    %714 = math.tanh %713 : vector<1x64xf32>
    %cst_270 = arith.constant 5.000000e-01 : f32
    %715 = vector.broadcast %cst_270 : f32 to vector<1x64xf32>
    %716 = arith.mulf %715, %714 : vector<1x64xf32>
    %cst_271 = arith.constant 5.000000e-01 : f32
    %717 = vector.broadcast %cst_271 : f32 to vector<1x64xf32>
    %718 = arith.addf %716, %717 : vector<1x64xf32>
    %719 = vector.extract_strided_slice %710 {offsets = [0, 64], sizes = [1, 64], strides = [1, 1]} : vector<1x256xf32> to vector<1x64xf32>
    %cst_272 = arith.constant 5.000000e-01 : f32
    %720 = vector.broadcast %cst_272 : f32 to vector<1x64xf32>
    %721 = arith.mulf %720, %719 : vector<1x64xf32>
    %722 = math.tanh %721 : vector<1x64xf32>
    %cst_273 = arith.constant 5.000000e-01 : f32
    %723 = vector.broadcast %cst_273 : f32 to vector<1x64xf32>
    %724 = arith.mulf %723, %722 : vector<1x64xf32>
    %cst_274 = arith.constant 5.000000e-01 : f32
    %725 = vector.broadcast %cst_274 : f32 to vector<1x64xf32>
    %726 = arith.addf %724, %725 : vector<1x64xf32>
    %727 = vector.extract_strided_slice %710 {offsets = [0, 128], sizes = [1, 64], strides = [1, 1]} : vector<1x256xf32> to vector<1x64xf32>
    %728 = math.tanh %727 : vector<1x64xf32>
    %729 = vector.extract_strided_slice %710 {offsets = [0, 192], sizes = [1, 64], strides = [1, 1]} : vector<1x256xf32> to vector<1x64xf32>
    %cst_275 = arith.constant 5.000000e-01 : f32
    %730 = vector.broadcast %cst_275 : f32 to vector<1x64xf32>
    %731 = arith.mulf %730, %729 : vector<1x64xf32>
    %732 = math.tanh %731 : vector<1x64xf32>
    %cst_276 = arith.constant 5.000000e-01 : f32
    %733 = vector.broadcast %cst_276 : f32 to vector<1x64xf32>
    %734 = arith.mulf %733, %732 : vector<1x64xf32>
    %cst_277 = arith.constant 5.000000e-01 : f32
    %735 = vector.broadcast %cst_277 : f32 to vector<1x64xf32>
    %736 = arith.addf %734, %735 : vector<1x64xf32>
    %737 = arith.mulf %726, %698 : vector<1x64xf32>
    %738 = arith.mulf %718, %728 : vector<1x64xf32>
    %739 = arith.addf %737, %738 : vector<1x64xf32>
    %740 = math.tanh %739 : vector<1x64xf32>
    %741 = arith.mulf %736, %740 : vector<1x64xf32>
    %742 = arith.select %701, %741, %697 : vector<1x64xf32>
    %743 = arith.select %701, %739, %698 : vector<1x64xf32>
    %cst_278 = arith.constant 0.000000e+00 : f32
    %744 = vector.broadcast %cst_278 : f32 to vector<1x64xf32>
    %745 = arith.select %701, %741, %744 : vector<1x64xf32>
    %c12_i32_279 = arith.constant 12 : i32
    %746 = arith.cmpi sgt, %0, %c12_i32_279 : i32
    %c12_280 = arith.constant 12 : index
    %c0_281 = arith.constant 0 : index
    %747 = vector.load %arg8[%c12_280, %c0_281] : memref<16x256xf32, #tpu.memory_space<vmem>>, vector<1x256xf32>
    %c1_i32_282 = arith.constant 1 : i32
    %748 = arith.subi %0, %c1_i32_282 : i32
    %c12_i32_283 = arith.constant 12 : i32
    %749 = arith.subi %748, %c12_i32_283 : i32
    %c0_i32_284 = arith.constant 0 : i32
    %750 = arith.maxsi %749, %c0_i32_284 : i32
    %751 = arith.index_cast %750 : i32 to index
    %c0_285 = arith.constant 0 : index
    %752 = vector.load %arg8[%751, %c0_285] : memref<16x256xf32, #tpu.memory_space<vmem>>, vector<1x256xf32>
    %753 = arith.select %202, %747, %752 : vector<1x256xi1>, vector<1x256xf32>
    %cst_286 = arith.constant dense<0.000000e+00> : vector<1x256xf32>
    %754 = tpu.matmul %742, %203, %cst_286 {dimension_numbers = #tpu.dot_dimension_numbers<[1], [0], [0], [1], [0, 0, 1, 1], [], []>} : vector<1x64xf32>, vector<64x256xf32>, vector<1x256xf32> -> vector<1x256xf32>
    %755 = arith.addf %753, %754 : vector<1x256xf32>
    %756 = vector.extract_strided_slice %755 {offsets = [0, 0], sizes = [1, 64], strides = [1, 1]} : vector<1x256xf32> to vector<1x64xf32>
    %cst_287 = arith.constant 5.000000e-01 : f32
    %757 = vector.broadcast %cst_287 : f32 to vector<1x64xf32>
    %758 = arith.mulf %757, %756 : vector<1x64xf32>
    %759 = math.tanh %758 : vector<1x64xf32>
    %cst_288 = arith.constant 5.000000e-01 : f32
    %760 = vector.broadcast %cst_288 : f32 to vector<1x64xf32>
    %761 = arith.mulf %760, %759 : vector<1x64xf32>
    %cst_289 = arith.constant 5.000000e-01 : f32
    %762 = vector.broadcast %cst_289 : f32 to vector<1x64xf32>
    %763 = arith.addf %761, %762 : vector<1x64xf32>
    %764 = vector.extract_strided_slice %755 {offsets = [0, 64], sizes = [1, 64], strides = [1, 1]} : vector<1x256xf32> to vector<1x64xf32>
    %cst_290 = arith.constant 5.000000e-01 : f32
    %765 = vector.broadcast %cst_290 : f32 to vector<1x64xf32>
    %766 = arith.mulf %765, %764 : vector<1x64xf32>
    %767 = math.tanh %766 : vector<1x64xf32>
    %cst_291 = arith.constant 5.000000e-01 : f32
    %768 = vector.broadcast %cst_291 : f32 to vector<1x64xf32>
    %769 = arith.mulf %768, %767 : vector<1x64xf32>
    %cst_292 = arith.constant 5.000000e-01 : f32
    %770 = vector.broadcast %cst_292 : f32 to vector<1x64xf32>
    %771 = arith.addf %769, %770 : vector<1x64xf32>
    %772 = vector.extract_strided_slice %755 {offsets = [0, 128], sizes = [1, 64], strides = [1, 1]} : vector<1x256xf32> to vector<1x64xf32>
    %773 = math.tanh %772 : vector<1x64xf32>
    %774 = vector.extract_strided_slice %755 {offsets = [0, 192], sizes = [1, 64], strides = [1, 1]} : vector<1x256xf32> to vector<1x64xf32>
    %cst_293 = arith.constant 5.000000e-01 : f32
    %775 = vector.broadcast %cst_293 : f32 to vector<1x64xf32>
    %776 = arith.mulf %775, %774 : vector<1x64xf32>
    %777 = math.tanh %776 : vector<1x64xf32>
    %cst_294 = arith.constant 5.000000e-01 : f32
    %778 = vector.broadcast %cst_294 : f32 to vector<1x64xf32>
    %779 = arith.mulf %778, %777 : vector<1x64xf32>
    %cst_295 = arith.constant 5.000000e-01 : f32
    %780 = vector.broadcast %cst_295 : f32 to vector<1x64xf32>
    %781 = arith.addf %779, %780 : vector<1x64xf32>
    %782 = arith.mulf %771, %743 : vector<1x64xf32>
    %783 = arith.mulf %763, %773 : vector<1x64xf32>
    %784 = arith.addf %782, %783 : vector<1x64xf32>
    %785 = math.tanh %784 : vector<1x64xf32>
    %786 = arith.mulf %781, %785 : vector<1x64xf32>
    %787 = arith.select %746, %786, %742 : vector<1x64xf32>
    %788 = arith.select %746, %784, %743 : vector<1x64xf32>
    %cst_296 = arith.constant 0.000000e+00 : f32
    %789 = vector.broadcast %cst_296 : f32 to vector<1x64xf32>
    %790 = arith.select %746, %786, %789 : vector<1x64xf32>
    %c13_i32_297 = arith.constant 13 : i32
    %791 = arith.cmpi sgt, %0, %c13_i32_297 : i32
    %c13_298 = arith.constant 13 : index
    %c0_299 = arith.constant 0 : index
    %792 = vector.load %arg8[%c13_298, %c0_299] : memref<16x256xf32, #tpu.memory_space<vmem>>, vector<1x256xf32>
    %c1_i32_300 = arith.constant 1 : i32
    %793 = arith.subi %0, %c1_i32_300 : i32
    %c13_i32_301 = arith.constant 13 : i32
    %794 = arith.subi %793, %c13_i32_301 : i32
    %c0_i32_302 = arith.constant 0 : i32
    %795 = arith.maxsi %794, %c0_i32_302 : i32
    %796 = arith.index_cast %795 : i32 to index
    %c0_303 = arith.constant 0 : index
    %797 = vector.load %arg8[%796, %c0_303] : memref<16x256xf32, #tpu.memory_space<vmem>>, vector<1x256xf32>
    %798 = arith.select %202, %792, %797 : vector<1x256xi1>, vector<1x256xf32>
    %cst_304 = arith.constant dense<0.000000e+00> : vector<1x256xf32>
    %799 = tpu.matmul %787, %203, %cst_304 {dimension_numbers = #tpu.dot_dimension_numbers<[1], [0], [0], [1], [0, 0, 1, 1], [], []>} : vector<1x64xf32>, vector<64x256xf32>, vector<1x256xf32> -> vector<1x256xf32>
    %800 = arith.addf %798, %799 : vector<1x256xf32>
    %801 = vector.extract_strided_slice %800 {offsets = [0, 0], sizes = [1, 64], strides = [1, 1]} : vector<1x256xf32> to vector<1x64xf32>
    %cst_305 = arith.constant 5.000000e-01 : f32
    %802 = vector.broadcast %cst_305 : f32 to vector<1x64xf32>
    %803 = arith.mulf %802, %801 : vector<1x64xf32>
    %804 = math.tanh %803 : vector<1x64xf32>
    %cst_306 = arith.constant 5.000000e-01 : f32
    %805 = vector.broadcast %cst_306 : f32 to vector<1x64xf32>
    %806 = arith.mulf %805, %804 : vector<1x64xf32>
    %cst_307 = arith.constant 5.000000e-01 : f32
    %807 = vector.broadcast %cst_307 : f32 to vector<1x64xf32>
    %808 = arith.addf %806, %807 : vector<1x64xf32>
    %809 = vector.extract_strided_slice %800 {offsets = [0, 64], sizes = [1, 64], strides = [1, 1]} : vector<1x256xf32> to vector<1x64xf32>
    %cst_308 = arith.constant 5.000000e-01 : f32
    %810 = vector.broadcast %cst_308 : f32 to vector<1x64xf32>
    %811 = arith.mulf %810, %809 : vector<1x64xf32>
    %812 = math.tanh %811 : vector<1x64xf32>
    %cst_309 = arith.constant 5.000000e-01 : f32
    %813 = vector.broadcast %cst_309 : f32 to vector<1x64xf32>
    %814 = arith.mulf %813, %812 : vector<1x64xf32>
    %cst_310 = arith.constant 5.000000e-01 : f32
    %815 = vector.broadcast %cst_310 : f32 to vector<1x64xf32>
    %816 = arith.addf %814, %815 : vector<1x64xf32>
    %817 = vector.extract_strided_slice %800 {offsets = [0, 128], sizes = [1, 64], strides = [1, 1]} : vector<1x256xf32> to vector<1x64xf32>
    %818 = math.tanh %817 : vector<1x64xf32>
    %819 = vector.extract_strided_slice %800 {offsets = [0, 192], sizes = [1, 64], strides = [1, 1]} : vector<1x256xf32> to vector<1x64xf32>
    %cst_311 = arith.constant 5.000000e-01 : f32
    %820 = vector.broadcast %cst_311 : f32 to vector<1x64xf32>
    %821 = arith.mulf %820, %819 : vector<1x64xf32>
    %822 = math.tanh %821 : vector<1x64xf32>
    %cst_312 = arith.constant 5.000000e-01 : f32
    %823 = vector.broadcast %cst_312 : f32 to vector<1x64xf32>
    %824 = arith.mulf %823, %822 : vector<1x64xf32>
    %cst_313 = arith.constant 5.000000e-01 : f32
    %825 = vector.broadcast %cst_313 : f32 to vector<1x64xf32>
    %826 = arith.addf %824, %825 : vector<1x64xf32>
    %827 = arith.mulf %816, %788 : vector<1x64xf32>
    %828 = arith.mulf %808, %818 : vector<1x64xf32>
    %829 = arith.addf %827, %828 : vector<1x64xf32>
    %830 = math.tanh %829 : vector<1x64xf32>
    %831 = arith.mulf %826, %830 : vector<1x64xf32>
    %832 = arith.select %791, %831, %787 : vector<1x64xf32>
    %833 = arith.select %791, %829, %788 : vector<1x64xf32>
    %cst_314 = arith.constant 0.000000e+00 : f32
    %834 = vector.broadcast %cst_314 : f32 to vector<1x64xf32>
    %835 = arith.select %791, %831, %834 : vector<1x64xf32>
    %c14_i32_315 = arith.constant 14 : i32
    %836 = arith.cmpi sgt, %0, %c14_i32_315 : i32
    %c14_316 = arith.constant 14 : index
    %c0_317 = arith.constant 0 : index
    %837 = vector.load %arg8[%c14_316, %c0_317] : memref<16x256xf32, #tpu.memory_space<vmem>>, vector<1x256xf32>
    %c1_i32_318 = arith.constant 1 : i32
    %838 = arith.subi %0, %c1_i32_318 : i32
    %c14_i32_319 = arith.constant 14 : i32
    %839 = arith.subi %838, %c14_i32_319 : i32
    %c0_i32_320 = arith.constant 0 : i32
    %840 = arith.maxsi %839, %c0_i32_320 : i32
    %841 = arith.index_cast %840 : i32 to index
    %c0_321 = arith.constant 0 : index
    %842 = vector.load %arg8[%841, %c0_321] : memref<16x256xf32, #tpu.memory_space<vmem>>, vector<1x256xf32>
    %843 = arith.select %202, %837, %842 : vector<1x256xi1>, vector<1x256xf32>
    %cst_322 = arith.constant dense<0.000000e+00> : vector<1x256xf32>
    %844 = tpu.matmul %832, %203, %cst_322 {dimension_numbers = #tpu.dot_dimension_numbers<[1], [0], [0], [1], [0, 0, 1, 1], [], []>} : vector<1x64xf32>, vector<64x256xf32>, vector<1x256xf32> -> vector<1x256xf32>
    %845 = arith.addf %843, %844 : vector<1x256xf32>
    %846 = vector.extract_strided_slice %845 {offsets = [0, 0], sizes = [1, 64], strides = [1, 1]} : vector<1x256xf32> to vector<1x64xf32>
    %cst_323 = arith.constant 5.000000e-01 : f32
    %847 = vector.broadcast %cst_323 : f32 to vector<1x64xf32>
    %848 = arith.mulf %847, %846 : vector<1x64xf32>
    %849 = math.tanh %848 : vector<1x64xf32>
    %cst_324 = arith.constant 5.000000e-01 : f32
    %850 = vector.broadcast %cst_324 : f32 to vector<1x64xf32>
    %851 = arith.mulf %850, %849 : vector<1x64xf32>
    %cst_325 = arith.constant 5.000000e-01 : f32
    %852 = vector.broadcast %cst_325 : f32 to vector<1x64xf32>
    %853 = arith.addf %851, %852 : vector<1x64xf32>
    %854 = vector.extract_strided_slice %845 {offsets = [0, 64], sizes = [1, 64], strides = [1, 1]} : vector<1x256xf32> to vector<1x64xf32>
    %cst_326 = arith.constant 5.000000e-01 : f32
    %855 = vector.broadcast %cst_326 : f32 to vector<1x64xf32>
    %856 = arith.mulf %855, %854 : vector<1x64xf32>
    %857 = math.tanh %856 : vector<1x64xf32>
    %cst_327 = arith.constant 5.000000e-01 : f32
    %858 = vector.broadcast %cst_327 : f32 to vector<1x64xf32>
    %859 = arith.mulf %858, %857 : vector<1x64xf32>
    %cst_328 = arith.constant 5.000000e-01 : f32
    %860 = vector.broadcast %cst_328 : f32 to vector<1x64xf32>
    %861 = arith.addf %859, %860 : vector<1x64xf32>
    %862 = vector.extract_strided_slice %845 {offsets = [0, 128], sizes = [1, 64], strides = [1, 1]} : vector<1x256xf32> to vector<1x64xf32>
    %863 = math.tanh %862 : vector<1x64xf32>
    %864 = vector.extract_strided_slice %845 {offsets = [0, 192], sizes = [1, 64], strides = [1, 1]} : vector<1x256xf32> to vector<1x64xf32>
    %cst_329 = arith.constant 5.000000e-01 : f32
    %865 = vector.broadcast %cst_329 : f32 to vector<1x64xf32>
    %866 = arith.mulf %865, %864 : vector<1x64xf32>
    %867 = math.tanh %866 : vector<1x64xf32>
    %cst_330 = arith.constant 5.000000e-01 : f32
    %868 = vector.broadcast %cst_330 : f32 to vector<1x64xf32>
    %869 = arith.mulf %868, %867 : vector<1x64xf32>
    %cst_331 = arith.constant 5.000000e-01 : f32
    %870 = vector.broadcast %cst_331 : f32 to vector<1x64xf32>
    %871 = arith.addf %869, %870 : vector<1x64xf32>
    %872 = arith.mulf %861, %833 : vector<1x64xf32>
    %873 = arith.mulf %853, %863 : vector<1x64xf32>
    %874 = arith.addf %872, %873 : vector<1x64xf32>
    %875 = math.tanh %874 : vector<1x64xf32>
    %876 = arith.mulf %871, %875 : vector<1x64xf32>
    %877 = arith.select %836, %876, %832 : vector<1x64xf32>
    %878 = arith.select %836, %874, %833 : vector<1x64xf32>
    %cst_332 = arith.constant 0.000000e+00 : f32
    %879 = vector.broadcast %cst_332 : f32 to vector<1x64xf32>
    %880 = arith.select %836, %876, %879 : vector<1x64xf32>
    %c15_i32_333 = arith.constant 15 : i32
    %881 = arith.cmpi sgt, %0, %c15_i32_333 : i32
    %c15_334 = arith.constant 15 : index
    %c0_335 = arith.constant 0 : index
    %882 = vector.load %arg8[%c15_334, %c0_335] : memref<16x256xf32, #tpu.memory_space<vmem>>, vector<1x256xf32>
    %c1_i32_336 = arith.constant 1 : i32
    %883 = arith.subi %0, %c1_i32_336 : i32
    %c15_i32_337 = arith.constant 15 : i32
    %884 = arith.subi %883, %c15_i32_337 : i32
    %c0_i32_338 = arith.constant 0 : i32
    %885 = arith.maxsi %884, %c0_i32_338 : i32
    %886 = arith.index_cast %885 : i32 to index
    %c0_339 = arith.constant 0 : index
    %887 = vector.load %arg8[%886, %c0_339] : memref<16x256xf32, #tpu.memory_space<vmem>>, vector<1x256xf32>
    %888 = arith.select %202, %882, %887 : vector<1x256xi1>, vector<1x256xf32>
    %cst_340 = arith.constant dense<0.000000e+00> : vector<1x256xf32>
    %889 = tpu.matmul %877, %203, %cst_340 {dimension_numbers = #tpu.dot_dimension_numbers<[1], [0], [0], [1], [0, 0, 1, 1], [], []>} : vector<1x64xf32>, vector<64x256xf32>, vector<1x256xf32> -> vector<1x256xf32>
    %890 = arith.addf %888, %889 : vector<1x256xf32>
    %891 = vector.extract_strided_slice %890 {offsets = [0, 0], sizes = [1, 64], strides = [1, 1]} : vector<1x256xf32> to vector<1x64xf32>
    %cst_341 = arith.constant 5.000000e-01 : f32
    %892 = vector.broadcast %cst_341 : f32 to vector<1x64xf32>
    %893 = arith.mulf %892, %891 : vector<1x64xf32>
    %894 = math.tanh %893 : vector<1x64xf32>
    %cst_342 = arith.constant 5.000000e-01 : f32
    %895 = vector.broadcast %cst_342 : f32 to vector<1x64xf32>
    %896 = arith.mulf %895, %894 : vector<1x64xf32>
    %cst_343 = arith.constant 5.000000e-01 : f32
    %897 = vector.broadcast %cst_343 : f32 to vector<1x64xf32>
    %898 = arith.addf %896, %897 : vector<1x64xf32>
    %899 = vector.extract_strided_slice %890 {offsets = [0, 64], sizes = [1, 64], strides = [1, 1]} : vector<1x256xf32> to vector<1x64xf32>
    %cst_344 = arith.constant 5.000000e-01 : f32
    %900 = vector.broadcast %cst_344 : f32 to vector<1x64xf32>
    %901 = arith.mulf %900, %899 : vector<1x64xf32>
    %902 = math.tanh %901 : vector<1x64xf32>
    %cst_345 = arith.constant 5.000000e-01 : f32
    %903 = vector.broadcast %cst_345 : f32 to vector<1x64xf32>
    %904 = arith.mulf %903, %902 : vector<1x64xf32>
    %cst_346 = arith.constant 5.000000e-01 : f32
    %905 = vector.broadcast %cst_346 : f32 to vector<1x64xf32>
    %906 = arith.addf %904, %905 : vector<1x64xf32>
    %907 = vector.extract_strided_slice %890 {offsets = [0, 128], sizes = [1, 64], strides = [1, 1]} : vector<1x256xf32> to vector<1x64xf32>
    %908 = math.tanh %907 : vector<1x64xf32>
    %909 = vector.extract_strided_slice %890 {offsets = [0, 192], sizes = [1, 64], strides = [1, 1]} : vector<1x256xf32> to vector<1x64xf32>
    %cst_347 = arith.constant 5.000000e-01 : f32
    %910 = vector.broadcast %cst_347 : f32 to vector<1x64xf32>
    %911 = arith.mulf %910, %909 : vector<1x64xf32>
    %912 = math.tanh %911 : vector<1x64xf32>
    %cst_348 = arith.constant 5.000000e-01 : f32
    %913 = vector.broadcast %cst_348 : f32 to vector<1x64xf32>
    %914 = arith.mulf %913, %912 : vector<1x64xf32>
    %cst_349 = arith.constant 5.000000e-01 : f32
    %915 = vector.broadcast %cst_349 : f32 to vector<1x64xf32>
    %916 = arith.addf %914, %915 : vector<1x64xf32>
    %917 = arith.mulf %906, %878 : vector<1x64xf32>
    %918 = arith.mulf %898, %908 : vector<1x64xf32>
    %919 = arith.addf %917, %918 : vector<1x64xf32>
    %920 = math.tanh %919 : vector<1x64xf32>
    %921 = arith.mulf %916, %920 : vector<1x64xf32>
    %922 = arith.select %881, %921, %877 : vector<1x64xf32>
    %923 = arith.select %881, %919, %878 : vector<1x64xf32>
    %cst_350 = arith.constant 0.000000e+00 : f32
    %924 = vector.broadcast %cst_350 : f32 to vector<1x64xf32>
    %925 = arith.select %881, %921, %924 : vector<1x64xf32>
    %926 = tpu.concatenate %250, %295, %340, %385, %430, %475, %520, %565, %610, %655, %700, %745, %790, %835, %880, %925 in 0 : vector<1x64xf32>, vector<1x64xf32>, vector<1x64xf32>, vector<1x64xf32>, vector<1x64xf32>, vector<1x64xf32>, vector<1x64xf32>, vector<1x64xf32>, vector<1x64xf32>, vector<1x64xf32>, vector<1x64xf32>, vector<1x64xf32>, vector<1x64xf32>, vector<1x64xf32>, vector<1x64xf32>, vector<1x64xf32> -> vector<16x64xf32>
    %927 = tpu.concatenate %925, %880, %835, %790, %745, %700, %655, %610, %565, %520, %475, %430, %385, %340, %295, %250 in 0 : vector<1x64xf32>, vector<1x64xf32>, vector<1x64xf32>, vector<1x64xf32>, vector<1x64xf32>, vector<1x64xf32>, vector<1x64xf32>, vector<1x64xf32>, vector<1x64xf32>, vector<1x64xf32>, vector<1x64xf32>, vector<1x64xf32>, vector<1x64xf32>, vector<1x64xf32>, vector<1x64xf32>, vector<1x64xf32> -> vector<16x64xf32>
    %c0_351 = arith.constant 0 : index
    %c0_352 = arith.constant 0 : index
    %928 = vector.load %arg9[%c0_351, %c0_352] : memref<32x64xf32, #tpu.memory_space<vmem>>, vector<16x64xf32>
    tpu.vector_store %arg9[%c0_351, %c0_352], %927 {strides = array<i32>} : memref<32x64xf32, #tpu.memory_space<vmem>>, vector<16x64xf32>,
    %cst_353 = arith.constant 0.000000e+00 : f32
    %929 = vector.broadcast %cst_353 : f32 to vector<16x64xf32>
    %c16 = arith.constant 16 : index
    %c0_354 = arith.constant 0 : index
    %930 = vector.load %arg9[%c16, %c0_354] : memref<32x64xf32, #tpu.memory_space<vmem>>, vector<16x64xf32>
    tpu.vector_store %arg9[%c16, %c0_354], %929 {strides = array<i32>} : memref<32x64xf32, #tpu.memory_space<vmem>>, vector<16x64xf32>,
    %c16_i32 = arith.constant 16 : i32
    %931 = arith.subi %c16_i32, %0 : i32
    %932 = arith.index_cast %931 : i32 to index
    %c0_355 = arith.constant 0 : index
    %933 = vector.load %arg9[%932, %c0_355] : memref<32x64xf32, #tpu.memory_space<vmem>>, vector<16x64xf32>
    %934 = vector.extract_strided_slice %926 {offsets = [0, 0], sizes = [16, 32], strides = [1, 1]} : vector<16x64xf32> to vector<16x32xf32>
    %935 = vector.extract_strided_slice %933 {offsets = [0, 32], sizes = [16, 32], strides = [1, 1]} : vector<16x64xf32> to vector<16x32xf32>
    %936 = tpu.concatenate %934, %935 in 1 : vector<16x32xf32>, vector<16x32xf32> -> vector<16x64xf32>
    %c0_356 = arith.constant 0 : index
    %c0_357 = arith.constant 0 : index
    %937 = vector.load %arg6[%c0_356, %c0_357] : memref<16x64xf32, #tpu.memory_space<vmem>>, vector<16x64xf32>
    tpu.vector_store %arg6[%c0_356, %c0_357], %936 {strides = array<i32>} : memref<16x64xf32, #tpu.memory_space<vmem>>, vector<16x64xf32>,
    %938 = tpu.concatenate %922, %923 in 1 : vector<1x64xf32>, vector<1x64xf32> -> vector<1x128xf32>
    %c0_358 = arith.constant 0 : index
    %c0_359 = arith.constant 0 : index
    %939 = vector.load %arg7[%c0_358, %c0_359] : memref<1x128xf32, #tpu.memory_space<vmem>>, vector<1x128xf32>
    tpu.vector_store %arg7[%c0_358, %c0_359], %938 {strides = array<i32>} : memref<1x128xf32, #tpu.memory_space<vmem>>, vector<1x128xf32>,
    return
  }
}

</mosaic_0001>

<bundles_post_ra>
// kernel: forward.1
= control target key start
LH: loop header
LB: loop body
LE: loop exit
PB: predicated region body
PF: predicated region fallthrough
CT: control target
= control target key end

     0   :  { %14 = vsyncpa [#allocation8], 0  ;;  %s3839_s0 = inlined_call_operand.vmem [shape: s32[16], index: 0, kind: input, shape index: {}]   ;;  %s3840_s1 = inlined_call_operand.<no memory space> [shape: s32[1], index: 1, kind: input, shape index: {}]   ;;  %s3841_s2 = inlined_call_operand.vmem [shape: f32[50,32], index: 2, kind: input, shape index: {}]   ;;  %s3842_s3 = inlined_call_operand.vmem [shape: f32[32,256], index: 3, kind: input, shape index: {}]   ;;  %s3843_s4 = inlined_call_operand.vmem [shape: f32[1,256], index: 4, kind: input, shape index: {}]   ;;  %s3844_s5 = inlined_call_operand.hbm [shape: f32[64,256], index: 5, kind: input, shape index: {}]   ;;  %s3845_s6 = inlined_call_operand.hbm [shape: f32[16,64], index: 6, kind: output, shape index: {0}]   ;;  %s3846_s7 = inlined_call_operand.vmem [shape: f32[1,128], index: 7, kind: output, shape index: {1}]  }
   0x1   :  { %15 = vsyncpa [#allocation6], 0 }
   0x2   :  { %16 = vsyncpa [#allocation7], 0  ;;  %s22_s26 = sshll.u32 %s3839_s0, 4  ;;  %s38_s29 = sshll.u32 %s3844_s5, 4  ;;  %s23_s26 = int_to_ptr.vmem [resolvable:$true] %s22_s26  ;;  %s39_s29 = int_to_ptr.hbm [resolvable:$true] %s38_s29 }
   0x3   :  { %s2563_s30 = smov [#allocation5]   ;;  %s2564_s8 = smov [#allocation9]  }
   0x4   :  { %25 = dma.vmem_to_smem %s23_s26, 16, %s2563_s30, [#allocation8]  }
   0x5   :  { %s40_s9 = sshll.u32 %s2564_s8, 4  ;;  %s2565_s10 = smov 256   ;;  %s41_s9 = int_to_ptr.vmem [resolvable:$true] %s40_s9 }
   0x6   :  { %s2566_s11 = smov 16  }
   0x7   :  { %46 = dma.hbm_to_vmem [thread:$0]  %s39_s29, 2048, %s41_s9, [#allocation6], %s2565_s10, %s2565_s10, %s2566_s11  }
   0x8   :  { %2557 = dma.done.wait [#allocation8], 16  }
   0x9   :  { %2558 = vsyncadd [#allocation8], 4294967280 }
   0xa   :  { %2559 = dma.done.wait [#allocation6], 2048  }
   0xb   :  { %2560 = vsyncadd [#allocation6], 4294965248 }
   0xc   :  { %55 = sfence }
   0xd   :  { %v318_v0 = vld [vmem:[%s3842_s3 + $0x30] sm:$0xff]  ;;  %v319_v1 = vld [vmem:[%s3842_s3 + $0x38] sm:$0xff]  ;;  %v316_v2 = vld [vmem:[%s3842_s3 + $0x20] sm:$0xff]  ;;  %s2627_s16 = sld [smem:[#allocation5]]  ;;  %p58_p0 = scmp.gt.s32.totalorder %s3840_s1, 0  ;;  %vm291_vm0 = vcmask 1040384  }
   0xe   :  { %345 = vmatpush.msra.mxu0 %v318_v0  ;;  %368 = vmatpush.msra.mxu1 %v319_v1  ;;  %v317_v3 = vld [vmem:[%s3842_s3 + $0x28] sm:$0xff]  ;;  %s2635_s21 = sld [smem:[#allocation5 + $0x1]]  ;;  %p70_p1 = scmp.gt.s32.totalorder %s3840_s1, 1  ;;  %v314_v4 = vld [vmem:[%s3842_s3 + $0x10] sm:$0xff]  ;;  %v315_v5 = vld [vmem:[%s3842_s3 + $0x18] sm:$0xff]  ;;  %vm293_vm1 = vcmask 1041408  }
   0xf   :  { %s2646_s28 = sld [smem:[#allocation5 + $0x2]]  ;;  %p82_p2 = scmp.gt.s32.totalorder %s3840_s1, 2  ;;  %v312_v6 = vld [vmem:[%s3842_s3] sm:$0xff]  ;;  %v313_v7 = vld [vmem:[%s3842_s3 + $0x8] sm:$0xff]  ;;  %v2726_v8 = vld [vmem:[#allocation9 + $0x70] sm:$0xff]  ;;  %vm295_vm2 = vcmask 1042432  }
  0x10   :  { %346 = vmatpush.msra.mxu0 %v316_v2  ;;  %369 = vmatpush.msra.mxu1 %v317_v3  ;;  %s2651_s8 = sld [smem:[#allocation5 + $0x3]]  ;;  %p94_p3 = scmp.gt.s32.totalorder %s3840_s1, 3  ;;  %v2728_v9 = vld [vmem:[#allocation9 + $0x78] sm:$0xff]  ;;  %v2733_v10 = vld [vmem:[#allocation9 + $0x60] sm:$0xff]  ;;  %v2735_v11 = vld [vmem:[#allocation9 + $0x68] sm:$0xff]  ;;  %vm297_vm3 = vcmask 1043456  }
  0x11   :  { %s2662_s5 = sld [smem:[#allocation5 + $0x4]]  ;;  %p106_p4 = scmp.gt.s32.totalorder %s3840_s1, 4  ;;  %465 = vmatpush.msra.mxu2 %v2726_v8  ;;  %485 = vmatpush.msra.mxu3 %v2728_v9  ;;  %v2740_v12 = vld [vmem:[#allocation9 + $0x50] sm:$0xff]  ;;  %v2742_v13 = vld [vmem:[#allocation9 + $0x58] sm:$0xff]  ;;  %v2763_v16 = vld [vmem:[#allocation9 + $0x40] sm:$0xff]  ;;  %vm299_vm4 = vcmask 1044480  }
  0x12   :  { %347 = vmatpush.msra.mxu0 %v314_v4  ;;  %370 = vmatpush.msra.mxu1 %v315_v5  ;;  %s2667_s17 = sld [smem:[#allocation5 + $0x5]]  ;;  %p118_p5 = scmp.gt.s32.totalorder %s3840_s1, 5  ;;  %v2765_v17 = vld [vmem:[#allocation9 + $0x48] sm:$0xff]  ;;  %vm301_vm5 = vcmask 1045504   ;;  %vm303_vm6 = vcmask 1046528   ;;  %vm326_vm7 = vcmask 261120  }
  0x13   :  { %p59_p6 = scmp.ne.s32.totalorder %s2627_s16, 4294967295  ;;  %s2673_s20 = sld [smem:[#allocation5 + $0x6]]  ;;  %466 = vmatpush.msra.mxu2 %v2733_v10  ;;  %486 = vmatpush.msra.mxu3 %v2735_v11  ;;  %v2947_v54 = vld [vmem:[#allocation9 + $0x30] sm:$0xff]  ;;  %v2949_v55 = vld [vmem:[#allocation9 + $0x38] sm:$0xff]  ;;  %v2956_v56 = vld [vmem:[#allocation9 + $0x20] sm:$0xff]  ;;  %vm453_vm8 = vcmask 523264  }
  0x14   :  { %348 = vmatpush.msra.mxu0 %v312_v6  ;;  %371 = vmatpush.msra.mxu1 %v313_v7  ;;  %p71_p7 = scmp.ne.s32.totalorder %s2635_s21, 4294967295  ;;  %p3849_p8 = scmp.gt.s32.totalorder %s3840_s1, 6  ;;  %v2958_v57 = vld [vmem:[#allocation9 + $0x28] sm:$0xff]  ;;  %v2962_v58 = vld [vmem:[#allocation9 + $0x10] sm:$0xff]  ;;  %v2964_v59 = vld [vmem:[#allocation9 + $0x18] sm:$0xff]  ;;  %v2567_v62 = vmov 0.0  }
  0x15   :  { %p60_p9 = pnand %p59_p6, %p58_p0  ;;  %p83_p10 = scmp.ne.s32.totalorder %s2646_s28, 4294967295  ;;  %467 = vmatpush.msra.mxu2 %v2740_v12  ;;  %487 = vmatpush.msra.mxu3 %v2742_v13  ;;  %2086 = vst.msk [vmem:[#allocation3 + $0x10] sm:$0xff] %vm453_vm8, %v2567_v62  ;;  %v2992_v63 = vld [vmem:[#allocation9] sm:$0xff]  ;;  %v2994_v0 = vld [vmem:[#allocation9 + $0x8] sm:$0xff] }
  0x16   :  { %p2688_p11 = pnand %p71_p7, %p70_p1  ;;  %p95_p12 = scmp.ne.s32.totalorder %s2651_s8, 4294967295  ;;  %561 = vmatpush.msrb.mxu0 %v2726_v8  ;;  %581 = vmatpush.msrb.mxu1 %v2728_v9  ;;  %2087 = vst.msk [vmem:[#allocation3 + $0x18] sm:$0xff] %vm453_vm8, %v2567_v62 }
  0x17   :  { %s3877_s16 = smov (%p60_p9, %s2627_s16), 0  ;;  %p2703_p13 = pnand %p83_p10, %p82_p2  ;;  %468 = vmatpush.msra.mxu2 %v2763_v16  ;;  %488 = vmatpush.msra.mxu3 %v2765_v17 }
  0x18   :  { %s2200_s29 = scalar_select %p60_p9, 0, 1  ;;  %562 = vmatpush.msrb.mxu0 %v2733_v10  ;;  %582 = vmatpush.msrb.mxu1 %v2735_v11 }
  0x19   :  { %s2697_s10 = scalar_lea.vmem %s3841_s2, %s3877_s16  ;;  %p2713_p6 = pnand %p95_p12, %p94_p3  ;;  %469 = vmatpush.msra.mxu2 %v2947_v54  ;;  %489 = vmatpush.msra.mxu3 %v2949_v55 }
  0x1a   :  { %s2707_s13 = scvt.s32.f32 %s2200_s29  ;;  %s3879_s21 = smov (%p2688_p11, %s2635_s21), 0  ;;  %563 = vmatpush.msrb.mxu0 %v2740_v12  ;;  %583 = vmatpush.msrb.mxu1 %v2742_v13  ;;  %v64_v20 = vld [vmem:[%s2697_s10] sm:$0x1] }
  0x1b   :  { %s2203_s16 = scalar_select %p2688_p11, 0, 1  ;;  %470 = vmatpush.msra.mxu2 %v2956_v56  ;;  %490 = vmatpush.msra.mxu3 %v2958_v57 }
  0x1c   :  { %s75_s22 = scalar_lea.vmem %s3841_s2, %s3879_s21  ;;  %p107_p7 = scmp.ne.s32.totalorder %s2662_s5, 4294967295  ;;  %v67_v21 = vstv %s2707_s13  ;;  %564 = vmatpush.msrb.mxu0 %v2763_v16  ;;  %584 = vmatpush.msrb.mxu1 %v2765_v17 }
  0x1d   :  { %s78_s23 = scvt.s32.f32 %s2203_s16  ;;  %p119_p9 = scmp.ne.s32.totalorder %s2667_s17, 4294967295  ;;  %v76_v14 = vld [vmem:[%s75_s22] sm:$0x1]  ;;  %v68_v25 = vmul.f32 %v67_v21, %v64_v20  ;;  %471 = vmatpush.msra.mxu2 %v2962_v58  ;;  %491 = vmatpush.msra.mxu3 %v2964_v59 }
  0x1e   :  { %s3881_s28 = smov (%p2703_p13, %s2646_s28), 0  ;;  %p2759_p10 = pnand %p107_p7, %p106_p4  ;;  %565 = vmatpush.msrb.mxu0 %v2947_v54  ;;  %585 = vmatpush.msrb.mxu1 %v2949_v55 }
  0x1f   :  { %v79_v15 = vstv %s78_s23  ;;  %s2206_s21 = scalar_select %p2703_p13, 0, 1  ;;  %472 = vmatpush.msra.mxu2 %v2992_v63  ;;  %492 = vmatpush.msra.mxu3 %v2994_v0 }
  0x20   :  { %s87_s26 = scalar_lea.vmem %s3841_s2, %s3881_s28  ;;  %p2775_p11 = pnand %p119_p9, %p118_p5  ;;  %v80_v18 = vmul.f32 %v79_v15, %v76_v14  ;;  %566 = vmatpush.msrb.mxu0 %v2956_v56  ;;  %586 = vmatpush.msrb.mxu1 %v2958_v57 }
  0x21   :  { %s90_s28 = scvt.s32.f32 %s2206_s21  ;;  %v88_v19 = vld [vmem:[%s87_s26] sm:$0x1]  ;;  %s3883_s8 = smov (%p2713_p6, %s2651_s8), 0  ;;  %473 = vmatmul.f32.vlgmr.msra.gmra.mxu2 %v2567_v62  ;;  %493 = vmatmul.f32.vlgmr.msra.gmra.mxu3 %v2567_v62 }
  0x22   :  { %s2209_s12 = scalar_select %p2713_p6, 0, 1  ;;  %v250_v26 = vrot.slane %v80_v18, 7  ;;  %567 = vmatpush.msrb.mxu0 %v2962_v58  ;;  %587 = vmatpush.msrb.mxu1 %v2964_v59 }
  0x23   :  { %v91_v22 = vstv %s90_s28  ;;  %s99_s16 = scalar_lea.vmem %s3841_s2, %s3883_s8  ;;  %p131_p12 = scmp.ne.s32.totalorder %s2673_s20, 4294967295  ;;  %658 = vmatpush.msrb.mxu2 %v2726_v8  ;;  %678 = vmatpush.msrb.mxu3 %v2728_v9 }
  0x24   :  { %v92_v23 = vmul.f32 %v91_v22, %v88_v19  ;;  %v100_v24 = vld [vmem:[%s99_s16] sm:$0x1]  ;;  %s102_s10 = scvt.s32.f32 %s2209_s12  ;;  %s2798_s13 = sld [smem:[#allocation5 + $0x7]]  ;;  %v292_v31 = vsel %vm291_vm0, %v68_v25, %v250_v26  ;;  %568 = vmatpush.msrb.mxu0 %v2992_v63  ;;  %588 = vmatpush.msrb.mxu1 %v2994_v0 }
  0x25   :  { %s3885_s5 = smov (%p2759_p10, %s2662_s5), 0  ;;  %p2814_p13 = pnand %p131_p12, %p3849_p8  ;;  %659 = vmatpush.msrb.mxu2 %v2733_v10  ;;  %679 = vmatpush.msrb.mxu3 %v2735_v11 }
  0x26   :  { %v103_v27 = vstv %s102_s10  ;;  %s2212_s8 = scalar_select %p2759_p10, 0, 1  ;;  %v253_v30 = vrot.slane %v92_v23, 6 }
  0x27   :  { %v104_v28 = vmul.f32 %v103_v27, %v100_v24  ;;  %s111_s3 = scalar_lea.vmem %s3841_s2, %s3885_s5  ;;  %p3848_p6 = scmp.gt.s32.totalorder %s3840_s1, 7  ;;  %660 = vmatpush.msrb.mxu2 %v2740_v12  ;;  %680 = vmatpush.msrb.mxu3 %v2742_v13 }
  0x28   :  { %v112_v29 = vld [vmem:[%s111_s3] sm:$0x1]  ;;  %s114_s24 = scvt.s32.f32 %s2212_s8  ;;  %s3887_s17 = smov (%p2775_p11, %s2667_s17), 0  ;;  %v294_v36 = vsel %vm293_vm1, %v292_v31, %v253_v30 }
  0x29   :  { %s2215_s5 = scalar_select %p2775_p11, 0, 1  ;;  %v256_v34 = vrot.slane %v104_v28, 5  ;;  %661 = vmatpush.msrb.mxu2 %v2763_v16  ;;  %681 = vmatpush.msrb.mxu3 %v2765_v17 }
  0x2a   :  { %v115_v32 = vstv %s114_s24  ;;  %s123_s30 = scalar_lea.vmem %s3841_s2, %s3887_s17  ;;  %p143_p7 = scmp.ne.s32.totalorder %s2798_s13, 4294967295 }
  0x2b   :  { %v116_v33 = vmul.f32 %v115_v32, %v112_v29  ;;  %v124_v35 = vld [vmem:[%s123_s30] sm:$0x1]  ;;  %s126_s28 = scvt.s32.f32 %s2215_s5  ;;  %s2832_s9 = sld [smem:[#allocation5 + $0x8]]  ;;  %v296_v40 = vsel %vm295_vm2, %v294_v36, %v256_v34  ;;  %662 = vmatpush.msrb.mxu2 %v2947_v54  ;;  %682 = vmatpush.msrb.mxu3 %v2949_v55 }
  0x2c   :  { %s3889_s20 = smov (%p2814_p13, %s2673_s20), 0  ;;  %p2848_p9 = pnand %p143_p7, %p3848_p6 }
  0x2d   :  { %v127_v37 = vstv %s126_s28  ;;  %s2218_s11 = scalar_select %p2814_p13, 0, 1  ;;  %v259_v38 = vrot.slane %v116_v33, 4  ;;  %663 = vmatpush.msrb.mxu2 %v2956_v56  ;;  %683 = vmatpush.msrb.mxu3 %v2958_v57 }
  0x2e   :  { %v128_v39 = vmul.f32 %v127_v37, %v124_v35  ;;  %s135_s17 = scalar_lea.vmem %s3841_s2, %s3889_s20  ;;  %p3847_p10 = scmp.gt.s32.totalorder %s3840_s1, 8 }
  0x2f   :  { %v136_v41 = vld [vmem:[%s135_s17] sm:$0x1]  ;;  %s138_s10 = scvt.s32.f32 %s2218_s11  ;;  %s3891_s13 = smov (%p2848_p9, %s2798_s13), 0  ;;  %v298_v44 = vsel %vm297_vm3, %v296_v40, %v259_v38  ;;  %664 = vmatpush.msrb.mxu2 %v2962_v58  ;;  %684 = vmatpush.msrb.mxu3 %v2964_v59 }
  0x30   :  { %v262_v42 = vrot.slane %v128_v39, 3  ;;  %s2221_s20 = scalar_select %p2848_p9, 0, 1 }
  0x31   :  { %v139_v43 = vstv %s138_s10  ;;  %s147_s22 = scalar_lea.vmem %s3841_s2, %s3891_s13  ;;  %p155_p11 = scmp.ne.s32.totalorder %s2832_s9, 4294967295  ;;  %665 = vmatpush.msrb.mxu2 %v2992_v63  ;;  %685 = vmatpush.msrb.mxu3 %v2994_v0 }
  0x32   :  { %v140_v45 = vmul.f32 %v139_v43, %v136_v41  ;;  %v148_v46 = vld [vmem:[%s147_s22] sm:$0x1]  ;;  %s150_s23 = scvt.s32.f32 %s2221_s20  ;;  %s2866_s21 = sld [smem:[#allocation5 + $0x9]]  ;;  %v300_v48 = vsel %vm299_vm4, %v298_v44, %v262_v42 }
  0x33   :  { %p2873_p12 = pnand %p155_p11, %p3847_p10  ;;  %p166_p13 = scmp.gt.s32.totalorder %s3840_s1, 9  ;;  %852 = vmatpush.msra.mxu2 %v2726_v8  ;;  %872 = vmatpush.msra.mxu3 %v2728_v9 }
  0x34   :  { %v265_v47 = vrot.slane %v140_v45, 2  ;;  %v151_v49 = vstv %s150_s23  ;;  %s2880_s27 = sld [smem:[#allocation5 + $0xa]]  ;;  %p178_p7 = scmp.gt.s32.totalorder %s3840_s1, 10  ;;  %v320_v45 = vld [vmem:[%s3843_s4] sm:$0x3] }
  0x35   :  { %v152_v50 = vmul.f32 %v151_v49, %v148_v46  ;;  %s3893_s9 = smov (%p2873_p12, %s2832_s9), 0  ;;  %s2896_s17 = sld [smem:[#allocation5 + $0xb]]  ;;  %853 = vmatpush.msra.mxu2 %v2733_v10  ;;  %873 = vmatpush.msra.mxu3 %v2735_v11  ;;  %v322_v46 = vperm.slane %v320_v45, 0 }
  0x36   :  { %v302_v51 = vsel %vm301_vm5, %v300_v48, %v265_v47  ;;  %s2224_s28 = scalar_select %p2873_p12, 0, 1  ;;  %v323_v47 = vperm.slane %v320_v45, 1 }
  0x37   :  { %v268_v52 = vrot.slane %v152_v50, 1  ;;  %s2894_s12 = scalar_lea.vmem %s3841_s2, %s3893_s9  ;;  %p190_p11 = scmp.gt.s32.totalorder %s3840_s1, 11  ;;  %854 = vmatpush.msra.mxu2 %v2740_v12  ;;  %874 = vmatpush.msra.mxu3 %v2742_v13 }
  0x38   :  { %s2898_s14 = scvt.s32.f32 %s2224_s28  ;;  %p167_p9 = scmp.ne.s32.totalorder %s2866_s21, 4294967295  ;;  %v160_v4 = vld [vmem:[%s2894_s12] sm:$0x1] }
  0x39   :  { %v304_v53 = vsel %vm303_vm6, %v302_v51, %v268_v52  ;;  %s2905_s10 = sld [smem:[#allocation5 + $0xc]]  ;;  %p3851_p6 = scmp.gt.s32.totalorder %s3840_s1, 12  ;;  %855 = vmatpush.msra.mxu2 %v2763_v16  ;;  %875 = vmatpush.msra.mxu3 %v2765_v17  ;;  %v383_v52 = vlaneseq }
  0x3a   :  { %2246 = vmatmul.msk.f32.vlgmr.msra.gmra.mxu0 %vm326_vm7, %v304_v53  ;;  %2248 = vmatmul.msk.f32.vlgmr.msra.gmra.mxu1 %vm326_vm7, %v304_v53  ;;  %p168_p12 = pnand %p167_p9, %p166_p13  ;;  %p179_p10 = scmp.ne.s32.totalorder %s2880_s27, 4294967295  ;;  %v163_v5 = vstv %s2898_s14 }
  0x3b   :  { %s2917_s19 = sld [smem:[#allocation5 + $0xd]]  ;;  %p191_p9 = scmp.ne.s32.totalorder %s2896_s17, 4294967295  ;;  %v164_v15 = vmul.f32 %v163_v5, %v160_v4  ;;  %755 = vmatpush.msra.mxu0 %v2726_v8  ;;  %775 = vmatpush.msra.mxu1 %v2728_v9 }
  0x3c   :  { %s3895_s21 = smov (%p168_p12, %s2866_s21), 0  ;;  %p180_p8 = pnand %p179_p10, %p178_p7  ;;  %856 = vmatpush.msra.mxu2 %v2947_v54  ;;  %876 = vmatpush.msra.mxu3 %v2949_v55 }
  0x3d   :  { %s2227_s3 = scalar_select %p168_p12, 0, 1  ;;  %756 = vmatpush.msra.mxu0 %v2733_v10  ;;  %776 = vmatpush.msra.mxu1 %v2735_v11 }
  0x3e   :  { %s171_s24 = scalar_lea.vmem %s3841_s2, %s3895_s21  ;;  %s3897_s27 = smov (%p180_p8, %s2880_s27), 0  ;;  %857 = vmatpush.msra.mxu2 %v2956_v56  ;;  %877 = vmatpush.msra.mxu3 %v2958_v57 }
  0x3f   :  { %s2927_s5 = scvt.s32.f32 %s2227_s3  ;;  %s2934_s28 = scalar_lea.vmem %s3841_s2, %s3897_s27  ;;  %v172_v60 = vld [vmem:[%s171_s24] sm:$0x1]  ;;  %757 = vmatpush.msra.mxu0 %v2740_v12  ;;  %777 = vmatpush.msra.mxu1 %v2742_v13 }
  0x40   :  { %s2230_s13 = scalar_select %p180_p8, 0, 1  ;;  %v184_v2 = vld [vmem:[%s2934_s28] sm:$0x1]  ;;  %858 = vmatpush.msra.mxu2 %v2962_v58  ;;  %878 = vmatpush.msra.mxu3 %v2964_v59 }
  0x41   :  { %p2940_p12 = pnand %p191_p9, %p190_p11  ;;  %p203_p10 = scmp.ne.s32.totalorder %s2905_s10, 4294967295  ;;  %v175_v61 = vstv %s2927_s5  ;;  %758 = vmatpush.msra.mxu0 %v2763_v16  ;;  %778 = vmatpush.msra.mxu1 %v2765_v17 }
  0x42   :  { %s2944_s15 = scvt.s32.f32 %s2230_s13  ;;  %p3850_p9 = scmp.gt.s32.totalorder %s3840_s1, 13  ;;  %v176_v1 = vmul.f32 %v175_v61, %v172_v60  ;;  %859 = vmatpush.msra.mxu2 %v2992_v63  ;;  %879 = vmatpush.msra.mxu3 %v2994_v0 }
  0x43   :  { %s3899_s17 = smov (%p2940_p12, %s2896_s17), 0  ;;  %p2980_p8 = pnand %p203_p10, %p3851_p6  ;;  %759 = vmatpush.msra.mxu0 %v2947_v54  ;;  %779 = vmatpush.msra.mxu1 %v2949_v55 }
  0x44   :  { %s2233_s27 = scalar_select %p2940_p12, 0, 1  ;;  %v187_v3 = vstv %s2944_s15  ;;  %v271_v18 = vrot.slane %v176_v1, 7  ;;  %v384_v1 = vand.u32 127, %v383_v52 }
  0x45   :  { %s2972_s8 = scalar_lea.vmem %s3841_s2, %s3899_s17  ;;  %s3901_s10 = smov (%p2980_p8, %s2905_s10), 0  ;;  %v188_v6 = vmul.f32 %v187_v3, %v184_v2  ;;  %760 = vmatpush.msra.mxu0 %v2956_v56  ;;  %780 = vmatpush.msra.mxu1 %v2958_v57 }
  0x46   :  { %s2987_s17 = scvt.s32.f32 %s2233_s27  ;;  %p215_p12 = scmp.ne.s32.totalorder %s2917_s19, 4294967295  ;;  %v196_v7 = vld [vmem:[%s2972_s8] sm:$0x1]  ;;  %v305_v23 = vsel %vm291_vm0, %v164_v15, %v271_v18  ;;  %v385_v2 = vadd.s32 128, %v384_v1  ;;  %v390_v3 = vand.u32 63, %v384_v1 }
  0x47   :  { %s2236_s24 = scalar_select %p2980_p8, 0, 1  ;;  %v274_v22 = vrot.slane %v188_v6, 6  ;;  %761 = vmatpush.msra.mxu0 %v2962_v58  ;;  %781 = vmatpush.msra.mxu1 %v2964_v59 }
  0x48   :  { %s3017_s26 = sld [smem:[#allocation5 + $0xe]]  ;;  %v199_v14 = vstv %s2987_s17  ;;  %s207_s12 = scalar_lea.vmem %s3841_s2, %s3901_s10  ;;  %v397_v5 = vand.u32 63, %v385_v2  ;;  %vm3150_vm9 = vcmp.lt.s32.totalorder %v390_v3, 32 }
  0x49   :  { %s3015_s25 = scvt.s32.f32 %s2236_s24  ;;  %p3028_p10 = pnand %p215_p12, %p3850_p9  ;;  %v200_v19 = vmul.f32 %v199_v14, %v196_v7  ;;  %v208_v20 = vld [vmem:[%s207_s12] sm:$0x1]  ;;  %v306_v28 = vsel %vm293_vm1, %v305_v23, %v274_v22  ;;  %762 = vmatpush.msra.mxu0 %v2992_v63  ;;  %782 = vmatpush.msra.mxu1 %v2994_v0 }
  0x4a   :  { %p226_p8 = scmp.gt.s32.totalorder %s3840_s1, 14  ;;  %s3037_s10 = sld [smem:[#allocation5 + $0xf]]  ;;  %vm3154_vm10 = vcmp.lt.s32.totalorder %v397_v5, 32 }
  0x4b   :  { %s3903_s19 = smov (%p3028_p10, %s2917_s19), 0  ;;  %v211_v21 = vstv %s3015_s25  ;;  %v277_v27 = vrot.slane %v200_v19, 5  ;;  %s2568_s9 = smov 64  }
  0x4c   :  { %s2239_s0 = scalar_select %p3028_p10, 0, 1  ;;  %v212_v24 = vmul.f32 %v211_v21, %v208_v20 }
  0x4d   :  { %s219_s27 = scalar_lea.vmem %s3841_s2, %s3903_s19  ;;  %p238_p10 = scmp.gt.s32.totalorder %s3840_s1, 15  ;;  %v307_v31 = vsel %vm295_vm2, %v306_v28, %v277_v27 }
  0x4e   :  { %s222_s16 = scvt.s32.f32 %s2239_s0  ;;  %p227_p12 = scmp.ne.s32.totalorder %s3017_s26, 4294967295  ;;  %v220_v25 = vld [vmem:[%s219_s27] sm:$0x1]  ;;  %v280_v30 = vrot.slane %v212_v24, 4 }
  0x4f   :  { %s2250_s0 = sadd.s32 4294967295, %s3840_s1  ;;  %s2253_s17 = sadd.s32 4294967294, %s3840_s1 }
  0x50   :  { %v223_v26 = vstv %s222_s16  ;;  %p3069_p9 = pnand %p227_p12, %p226_p8  ;;  %p239_p6 = scmp.ne.s32.totalorder %s3037_s10, 4294967295  ;;  %v308_v35 = vsel %vm297_vm3, %v307_v31, %v280_v30 }
  0x51   :  { %v224_v29 = vmul.f32 %v223_v26, %v220_v25  ;;  %s517_s18 = scalar_select %p58_p0, 1, 0 }
  0x52   :  { %s3905_s26 = smov (%p3069_p9, %s3017_s26), 0  ;;  %p3097_p12 = pnand %p239_p6, %p238_p10 }
  0x53   :  { %s2242_s3 = scalar_select %p3069_p9, 0, 1  ;;  %v283_v33 = vrot.slane %v224_v29, 3 }
  0x54   :  { %s231_s23 = scalar_lea.vmem %s3841_s2, %s3905_s26  ;;  %s3907_s10 = smov (%p3097_p12, %s3037_s10), 0 }
  0x55   :  { %v232_v32 = vld [vmem:[%s231_s23] sm:$0x1]  ;;  %s234_s13 = scvt.s32.f32 %s2242_s3  ;;  %s243_s29 = scalar_lea.vmem %s3841_s2, %s3907_s10  ;;  %v309_v39 = vsel %vm299_vm4, %v308_v35, %v283_v33 }
  0x56   :  { %s2245_s26 = scalar_select %p3097_p12, 0, 1  ;;  %v244_v37 = vld [vmem:[%s243_s29] sm:$0x1] }
  0x57   :  { %v235_v34 = vstv %s234_s13  ;;  %p430_p6 = scmp.gt.s32.totalorder %s2250_s0, 0  ;;  %p525_p0 = scmp.gt.s32.totalorder %s2253_s17, 0 }
  0x58   :  { %v236_v36 = vmul.f32 %v235_v34, %v232_v32  ;;  %s246_s30 = scvt.s32.f32 %s2245_s26  ;;  %v518_v34 = vstv %s517_s18  ;;  %s2263_s8 = sadd.s32 4294967292, %s3840_s1 }
  0x59   :  { %s3909_s0 = smov (!%p430_p6, %s2250_s0), 0  ;;  %vm519_vm11 = vcmp.eq.s32.totalorder %v518_v34, 1  ;;  %s3911_s17 = smov (!%p525_p0, %s2253_s17), 0 }
  0x5a   :  { %v286_v38 = vrot.slane %v236_v36, 2  ;;  %v247_v40 = vstv %s246_s30  ;;  %s432_s21 = sshra.s32 %s3909_s0, 3  ;;  %s435_s4 = sand.u32 7, %s3909_s0 }
  0x5b   :  { %v248_v41 = vmul.f32 %v247_v40, %v244_v37  ;;  %s2328_s15 = sshll.u32 %s432_s21, 4  ;;  %s527_s22 = sshra.s32 %s3911_s17, 3 }
  0x5c   :  { %v310_v42 = vsel %vm301_vm5, %v309_v39, %v286_v38  ;;  %s438_s27 = sadd.s32 %s2328_s15, %s435_s4  ;;  %s530_s23 = sand.u32 7, %s3911_s17 }
  0x5d   :  { %v289_v43 = vrot.slane %v248_v41, 1  ;;  %s439_s16 = scalar_lea.vmem [#allocation2], %s438_s27  ;;  %s2329_s24 = sshll.u32 %s527_s22, 4 }
  0x5e   :  { %s533_s25 = sadd.s32 %s2329_s24, %s530_s23  ;;  %s2258_s30 = sadd.s32 4294967293, %s3840_s1 }
  0x5f   :  { %v311_v44 = vsel %vm303_vm6, %v310_v42, %v289_v43  ;;  %s534_s5 = scalar_lea.vmem [#allocation2], %s533_s25  ;;  %s2268_s13 = sadd.s32 4294967291, %s3840_s1 }
  0x60   :  { %2247 = vmatmul.msk.f32.gmra.mxu0 %vm326_vm7, %v311_v44  ;;  %2249 = vmatmul.msk.f32.gmra.mxu1 %vm326_vm7, %v311_v44  ;;  %s613_s12 = scalar_select %p70_p1, 1, 0 }
  0x61   :  { %p622_p1 = scmp.gt.s32.totalorder %s2258_s30, 0  ;;  %s2273_s21 = sadd.s32 4294967290, %s3840_s1 }
  0x62   :  { %s710_s15 = scalar_select %p82_p2, 1, 0 }
  0x63   :  { %s3913_s30 = smov (!%p622_p1, %s2258_s30), 0  ;;  %p719_p2 = scmp.gt.s32.totalorder %s2263_s8, 0 }
  0x64   :  { %s624_s2 = sshra.s32 %s3913_s30, 3  ;;  %s627_s28 = sand.u32 7, %s3913_s30 }
  0x65   :  { %s2330_s11 = sshll.u32 %s624_s2, 4  ;;  %s3915_s8 = smov (!%p719_p2, %s2263_s8), 0 }
  0x66   :  { %s630_s10 = sadd.s32 %s2330_s11, %s627_s28  ;;  %s721_s19 = sshra.s32 %s3915_s8, 3 }
  0x67   :  { %s631_s0 = scalar_lea.vmem [#allocation2], %s630_s10  ;;  %s724_s18 = sand.u32 7, %s3915_s8 }
  0x68   :  { %s2331_s20 = sshll.u32 %s721_s19, 4  ;;  %s2278_s22 = sadd.s32 4294967289, %s3840_s1 }
  0x69   :  { %s727_s3 = sadd.s32 %s2331_s20, %s724_s18  ;;  %p3869_p9 = scmp.gt.s32.totalorder %s3840_s1, 6 }
  0x6a   :  { %s728_s17 = scalar_lea.vmem [#allocation2], %s727_s3  ;;  %s2283_s2 = sadd.s32 4294967288, %s3840_s1 }
  0x6b   :  { %s807_s24 = scalar_select %p94_p3, 1, 0 }
  0x6c   :  { %p816_p3 = scmp.gt.s32.totalorder %s2268_s13, 0  ;;  %p1107_p12 = scmp.gt.s32.totalorder %s2283_s2, 0 }
  0x6d   :  { %s904_s11 = scalar_select %p106_p4, 1, 0 }
  0x6e   :  { %s3917_s13 = smov (!%p816_p3, %s2268_s13), 0  ;;  %p913_p4 = scmp.gt.s32.totalorder %s2273_s21, 0 }
  0x6f   :  { %s818_s26 = sshra.s32 %s3917_s13, 3  ;;  %s3923_s2 = smov (!%p1107_p12, %s2283_s2), 0 }
  0x70   :  { %s2332_s14 = sshll.u32 %s818_s26, 4  ;;  %s3919_s21 = smov (!%p913_p4, %s2273_s21), 0 }
  0x71   :  { %s915_s4 = sshra.s32 %s3919_s21, 3  ;;  %s1109_s28 = sshra.s32 %s3923_s2, 3 }
  0x72   :  { %s2333_s27 = sshll.u32 %s915_s4, 4  ;;  %s2335_s10 = sshll.u32 %s1109_s28, 4 }
  0x73   :  { %s1001_s20 = scalar_select %p118_p5, 1, 0 }
  0x74   :  { %p1010_p5 = scmp.gt.s32.totalorder %s2278_s22, 0  ;;  %p3870_p6 = scmp.gt.s32.totalorder %s3840_s1, 7 }
  0x75   :  { %s2288_s19 = sadd.s32 4294967287, %s3840_s1  ;;  %p3871_p1 = scmp.gt.s32.totalorder %s3840_s1, 8 }
  0x76   :  { %s3921_s22 = smov (!%p1010_p5, %s2278_s22), 0  ;;  %p1204_p0 = scmp.gt.s32.totalorder %s2288_s19, 0 }
  0x77   :  { %s1012_s23 = sshra.s32 %s3921_s22, 3  ;;  %s2293_s26 = sadd.s32 4294967286, %s3840_s1 }
  0x78   :  { %s2334_s25 = sshll.u32 %s1012_s23, 4  ;;  %s3925_s19 = smov (!%p1204_p0, %s2288_s19), 0 }
  0x79   :  { %s1206_s18 = sshra.s32 %s3925_s19, 3  ;;  %p1301_p2 = scmp.gt.s32.totalorder %s2293_s26, 0 }
  0x7a   :  { %s2336_s3 = sshll.u32 %s1206_s18, 4  ;;  %s2298_s4 = sadd.s32 4294967285, %s3840_s1 }
  0x7b   :  { %s3927_s26 = smov (!%p1301_p2, %s2293_s26), 0  ;;  %s2303_s23 = sadd.s32 4294967284, %s3840_s1 }
  0x7c   :  { %s2308_s28 = sadd.s32 4294967283, %s3840_s1  ;;  %p3872_p3 = scmp.gt.s32.totalorder %s3840_s1, 12 }
  0x7d   :  { %s2313_s18 = sadd.s32 4294967282, %s3840_s1  ;;  %p3873_p5 = scmp.gt.s32.totalorder %s3840_s1, 13 }
  0x7e   :  { %p1689_p4 = scmp.gt.s32.totalorder %s2313_s18, 0 }
  0x80   :  { %s3935_s18 = smov (!%p1689_p4, %s2313_s18), 0 }
  0xa4   :  { %v474_v18 = vpop.f32.mrf.mxu2  ;;  %v494_v25 = vpop.f32.mrf.mxu3 }
  0xb7   :  { %v350_v48 = vpop.f32.mrf.mxu0  ;;  %v373_v49 = vpop.f32.mrf.mxu1 }
  0xb8   :  { %v351_v50 = vadd.f32 %v350_v48, %v322_v46  ;;  %v374_v51 = vadd.f32 %v373_v49, %v323_v47 }
  0xba   :  { %379 = vst [vmem:[#allocation2] sm:$0xff] %v351_v50 }
  0xbb   :  { %380 = vst [vmem:[#allocation2 + $0x8] sm:$0xff] %v374_v51 }
  0xc2   :  { %v428_v4 = vld [vmem:[#allocation2] ss:$8 sm:$0x3] }
  0xc3   :  { %v442_v14 = vperm.slane %v428_v4, 0  ;;  %v443_v22 = vperm.slane %v428_v4, 1 }
  0xdd   :  { %v353_v53 = vpop.f32.mrf.mxu0  ;;  %v376_v60 = vpop.f32.mrf.mxu1 }
  0xde   :  { %v354_v61 = vadd.f32 %v353_v53, %v322_v46  ;;  %v377_v62 = vadd.f32 %v376_v60, %v323_v47  ;;  %v523_v47 = vld [vmem:[#allocation2 + $0x1] ss:$8 sm:$0x3] }
  0xdf   :  { %v537_v49 = vperm.slane %v523_v47, 0  ;;  %v538_v60 = vperm.slane %v523_v47, 1 }
  0xe0   :  { %381 = vst [vmem:[#allocation2 + $0x10] sm:$0xff] %v354_v61 }
  0xe1   :  { %382 = vst [vmem:[#allocation2 + $0x18] sm:$0xff] %v377_v62 }
  0xe8   :  { %v440_v7 = vld [vmem:[%s439_s16] ss:$8 sm:$0x3] }
  0xe9   :  { %v447_v15 = vperm.slane %v440_v7, 0  ;;  %v448_v19 = vperm.slane %v440_v7, 1  ;;  %v535_v46 = vld [vmem:[%s534_s5] ss:$8 sm:$0x3] }
  0xea   :  { %v542_v48 = vperm.slane %v535_v46, 0  ;;  %v543_v52 = vperm.slane %v535_v46, 1 }
  0xeb   :  { %v451_v21 = vsel %vm3150_vm9, %v442_v14, %v447_v15  ;;  %v452_v24 = vsel %vm3154_vm10, %v443_v22, %v448_v19 }
  0xec   :  { %v497_v23 = vadd.f32 %v474_v18, %v451_v21  ;;  %v498_v27 = vadd.f32 %v494_v25, %v452_v24  ;;  %v546_v50 = vsel %vm3150_vm9, %v537_v49, %v542_v48  ;;  %v547_v1 = vsel %vm3154_vm10, %v538_v60, %v543_v52 }
  0xed   :  { %v614_v18 = vstv %s613_s12  ;;  %v711_v52 = vstv %s710_s15  ;;  %s821_s12 = sand.u32 7, %s3917_s13  ;;  %s918_s15 = sand.u32 7, %s3919_s21 }
  0xee   :  { %v499_v26 = vmul.f32 0.5, %v497_v23  ;;  %v504_v33 = vmul.f32 0.5, %v498_v27  ;;  %vm615_vm12 = vcmp.eq.s32.totalorder %v614_v18, 1  ;;  %vm712_vm13 = vcmp.eq.s32.totalorder %v711_v52, 1  ;;  %v3313_v52 = vld [vmem:[#allocation9 + $0x78] sm:$0xff]  ;;  %s824_s29 = sadd.s32 %s2332_s14, %s821_s12  ;;  %s921_s16 = sadd.s32 %s2333_s27, %s918_s15 }
  0xef   :  { %s825_s30 = scalar_lea.vmem [#allocation2], %s824_s29  ;;  %s922_s8 = scalar_lea.vmem [#allocation2], %s921_s16 }
  0xf0   :  { %2353 = vtanh.f32 %v499_v26  ;;  %s1098_s14 = scalar_select %p3869_p9, 1, 0 }
  0xf1   :  { %2355 = vtanh.f32 %v498_v27  ;;  %s1195_s27 = scalar_select %p3870_p6, 1, 0 }
  0xf2   :  { %2357 = vtanh.f32 %v504_v33  ;;  %v620_v33 = vld [vmem:[#allocation2 + $0x2] ss:$8 sm:$0x3]  ;;  %s1303_s12 = sshra.s32 %s3927_s26, 3 }
  0xf3   :  { %s2337_s29 = sshll.u32 %s1303_s12, 4  ;;  %s2318_s12 = sadd.s32 4294967281, %s3840_s1 }
  0xf4   :  { %p1786_p9 = scmp.gt.s32.totalorder %s2318_s12, 0 }
  0xf6   :  { %v2354_v28 = vpop.eup %2353  ;;  %s3937_s12 = smov (!%p1786_p9, %s2318_s12), 0 }
  0xf7   :  { %v501_v29 = vmul.f32 0.5, %v2354_v28  ;;  %v2356_v31 = vpop.eup %2355 }
  0xf8   :  { %v2358_v37 = vpop.eup %2357 }
  0xf9   :  { %v502_v30 = vadd.f32 0.5, %v501_v29  ;;  %v506_v40 = vmul.f32 0.5, %v2358_v37 }
  0xfb   :  { %v509_v32 = vmul.f32 %v2356_v31, %v502_v30  ;;  %v508_v35 = vmul.f32 0.0, %v502_v30  ;;  %v507_v41 = vadd.f32 0.5, %v506_v40  ;;  %v635_v40 = vperm.slane %v620_v33, 1 }
  0xfd   :  { %511 = vrot.lane.b32.xlu0 %v509_v32, %s2568_s9  ;;  %v632_v32 = vld [vmem:[%s631_s0] ss:$8 sm:$0x3] }
  0xfe   :  { %v639_v34 = vperm.slane %v632_v32, 0 }
 0x16f   :  { %v512_v36 = vpop.permute.xlu0 %511 }
 0x170   :  { %v514_v38 = vadd.f32 %v512_v36, %v508_v35  ;;  %v634_v35 = vperm.slane %v620_v33, 0 }
 0x172   :  { %2359 = vtanh.f32 %v514_v38  ;;  %v3167_v39 = vsel %vm519_vm11, %v514_v38, 0.0  ;;  %v643_v36 = vsel %vm3150_vm9, %v634_v35, %v639_v34  ;;  %v640_v38 = vperm.slane %v632_v32, 1 }
 0x173   :  { %v808_v35 = vstv %s807_s24  ;;  %s1015_s24 = sand.u32 7, %s3921_s22 }
 0x174   :  { %vm809_vm14 = vcmp.eq.s32.totalorder %v808_v35, 1  ;;  %s1018_s5 = sadd.s32 %s2334_s25, %s1015_s24 }
 0x175   :  { %s1019_s13 = scalar_lea.vmem [#allocation2], %s1018_s5 }
 0x176   :  { %s1292_s25 = scalar_select %p3871_p1, 1, 0 }
 0x178   :  { %v2360_v42 = vpop.eup %2359 }
 0x179   :  { %v516_v43 = vmul.f32 %v2360_v42, %v507_v41 }
 0x17b   :  { %v3169_v44 = vsel %vm519_vm11, %v516_v43, 0.0  ;;  %v644_v43 = vsel %vm3154_vm10, %v635_v40, %v640_v38 }
 0x17c   :  { %549 = vrot.lane.b32.xlu0 %v3169_v44, %s2568_s9 }
 0x1ee   :  { %v550_v45 = vpop.permute.xlu0 %549 }
 0x1ef   :  { %2256 = vmatmul.msk.f32.vlgmr.msrb.gmra.mxu0 %vm453_vm8, %v550_v45  ;;  %2257 = vmatmul.msk.f32.vlgmr.msrb.gmra.mxu1 %vm453_vm8, %v550_v45 }
 0x1f0   :  { %949 = vmatpush.msrb.mxu0 %v2726_v8  ;;  %969 = vmatpush.msrb.mxu1 %v2728_v9 }
 0x1f2   :  { %950 = vmatpush.msrb.mxu0 %v2733_v10  ;;  %970 = vmatpush.msrb.mxu1 %v2735_v11 }
 0x1f4   :  { %951 = vmatpush.msrb.mxu0 %v2740_v12  ;;  %971 = vmatpush.msrb.mxu1 %v2742_v13 }
 0x1f6   :  { %952 = vmatpush.msrb.mxu0 %v2763_v16  ;;  %972 = vmatpush.msrb.mxu1 %v2765_v17 }
 0x1f8   :  { %953 = vmatpush.msrb.mxu0 %v2947_v54  ;;  %973 = vmatpush.msrb.mxu1 %v2949_v55 }
 0x1fa   :  { %954 = vmatpush.msrb.mxu0 %v2956_v56  ;;  %974 = vmatpush.msrb.mxu1 %v2958_v57 }
 0x1fc   :  { %955 = vmatpush.msrb.mxu0 %v2962_v58  ;;  %975 = vmatpush.msrb.mxu1 %v2964_v59 }
 0x1fe   :  { %956 = vmatpush.msrb.mxu0 %v2992_v63  ;;  %976 = vmatpush.msrb.mxu1 %v2994_v0 }
 0x26c   :  { %v570_v51 = vpop.f32.mrf.mxu0  ;;  %v590_v61 = vpop.f32.mrf.mxu1 }
 0x26d   :  { %v593_v53 = vadd.f32 %v570_v51, %v546_v50  ;;  %v594_v2 = vadd.f32 %v590_v61, %v547_v1 }
 0x26f   :  { %v595_v62 = vmul.f32 0.5, %v593_v53  ;;  %v600_v15 = vmul.f32 0.5, %v594_v2 }
 0x271   :  { %2361 = vtanh.f32 %v595_v62 }
 0x272   :  { %2363 = vtanh.f32 %v594_v2 }
 0x273   :  { %2365 = vtanh.f32 %v600_v15 }
 0x277   :  { %v2362_v3 = vpop.eup %2361 }
 0x278   :  { %v597_v4 = vmul.f32 0.5, %v2362_v3  ;;  %v2364_v7 = vpop.eup %2363 }
 0x279   :  { %v2366_v22 = vpop.eup %2365 }
 0x27a   :  { %v598_v5 = vadd.f32 0.5, %v597_v4  ;;  %v602_v25 = vmul.f32 0.5, %v2366_v22 }
 0x27c   :  { %v605_v14 = vmul.f32 %v2364_v7, %v598_v5  ;;  %v604_v19 = vmul.f32 %v598_v5, %v3167_v39  ;;  %v603_v26 = vadd.f32 0.5, %v602_v25 }
 0x27e   :  { %607 = vrot.lane.b32.xlu1 %v605_v14, %s2568_s9 }
 0x2f0   :  { %v608_v21 = vpop.permute.xlu1 %607 }
 0x2f1   :  { %v610_v23 = vadd.f32 %v608_v21, %v604_v19 }
 0x2f3   :  { %2367 = vtanh.f32 %v610_v23  ;;  %v3205_v24 = vsel %vm615_vm12, %v610_v23, %v3167_v39 }
 0x2f9   :  { %v2368_v27 = vpop.eup %2367 }
 0x2fa   :  { %v612_v28 = vmul.f32 %v2368_v27, %v603_v26 }
 0x2fc   :  { %v3208_v29 = vsel %vm615_vm12, %v612_v28, %v3169_v44  ;;  %v3210_v30 = vsel %vm615_vm12, %v612_v28, 0.0 }
 0x2fd   :  { %646 = vrot.lane.b32.xlu1 %v3208_v29, %s2568_s9  ;;  %v1978_v5 = vrot.slane %v3210_v30, 7 }
 0x2ff   :  { %v2019_v19 = vsel %vm291_vm0, %v3169_v44, %v1978_v5 }
 0x36f   :  { %v647_v31 = vpop.permute.xlu1 %646 }
 0x370   :  { %2261 = vmatmul.msk.f32.vlgmr.msrb.gmra.mxu2 %vm453_vm8, %v647_v31  ;;  %2262 = vmatmul.msk.f32.vlgmr.msrb.gmra.mxu3 %vm453_vm8, %v647_v31 }
 0x371   :  { %1046 = vmatpush.msrb.mxu2 %v2726_v8  ;;  %1066 = vmatpush.msrb.mxu3 %v2728_v9 }
 0x373   :  { %1047 = vmatpush.msrb.mxu2 %v2733_v10  ;;  %1067 = vmatpush.msrb.mxu3 %v2735_v11 }
 0x375   :  { %1048 = vmatpush.msrb.mxu2 %v2740_v12  ;;  %1068 = vmatpush.msrb.mxu3 %v2742_v13 }
 0x377   :  { %1049 = vmatpush.msrb.mxu2 %v2763_v16  ;;  %1069 = vmatpush.msrb.mxu3 %v2765_v17 }
 0x379   :  { %1050 = vmatpush.msrb.mxu2 %v2947_v54  ;;  %1070 = vmatpush.msrb.mxu3 %v2949_v55 }
 0x37b   :  { %1051 = vmatpush.msrb.mxu2 %v2956_v56  ;;  %1071 = vmatpush.msrb.mxu3 %v2958_v57 }
 0x37d   :  { %1052 = vmatpush.msrb.mxu2 %v2962_v58  ;;  %1072 = vmatpush.msrb.mxu3 %v2964_v59 }
 0x37f   :  { %1053 = vmatpush.msrb.mxu2 %v2992_v63  ;;  %1073 = vmatpush.msrb.mxu3 %v2994_v0 }
 0x3f3   :  { %v667_v37 = vpop.f32.mrf.mxu2  ;;  %v687_v41 = vpop.f32.mrf.mxu3 }
 0x3f4   :  { %v690_v39 = vadd.f32 %v667_v37, %v643_v36  ;;  %v691_v45 = vadd.f32 %v687_v41, %v644_v43 }
 0x3f6   :  { %v692_v42 = vmul.f32 0.5, %v690_v39  ;;  %v697_v51 = vmul.f32 0.5, %v691_v45 }
 0x3f8   :  { %2369 = vtanh.f32 %v692_v42 }
 0x3f9   :  { %2371 = vtanh.f32 %v691_v45 }
 0x3fa   :  { %2373 = vtanh.f32 %v697_v51  ;;  %v3310_v51 = vld [vmem:[#allocation9 + $0x70] sm:$0xff] }
 0x3fe   :  { %v2370_v46 = vpop.eup %2369 }
 0x3ff   :  { %v694_v47 = vmul.f32 0.5, %v2370_v46  ;;  %v2372_v49 = vpop.eup %2371 }
 0x400   :  { %v2374_v61 = vpop.eup %2373 }
 0x401   :  { %v695_v48 = vadd.f32 0.5, %v694_v47  ;;  %v699_v2 = vmul.f32 0.5, %v2374_v61  ;;  %v3322_v61 = vld [vmem:[#allocation9 + $0x50] sm:$0xff] }
 0x403   :  { %v702_v50 = vmul.f32 %v2372_v49, %v695_v48  ;;  %v701_v53 = vmul.f32 %v695_v48, %v3205_v24  ;;  %v700_v3 = vadd.f32 0.5, %v699_v2  ;;  %v3331_v2 = vld [vmem:[#allocation9 + $0x48] sm:$0xff] }
 0x405   :  { %704 = vrot.lane.b32.xlu2 %v702_v50, %s2568_s9 }
 0x45f   :  { %v705_v60 = vpop.permute.xlu2 %704 }
 0x460   :  { %v707_v62 = vadd.f32 %v705_v60, %v701_v53  ;;  %v3316_v53 = vld [vmem:[#allocation9 + $0x60] sm:$0xff]  ;;  %v3319_v60 = vld [vmem:[#allocation9 + $0x68] sm:$0xff] }
 0x462   :  { %2375 = vtanh.f32 %v707_v62  ;;  %v3246_v1 = vsel %vm712_vm13, %v707_v62, %v3205_v24  ;;  %v3325_v62 = vld [vmem:[#allocation9 + $0x58] sm:$0xff] }
 0x468   :  { %v2376_v4 = vpop.eup %2375 }
 0x469   :  { %v709_v7 = vmul.f32 %v2376_v4, %v700_v3  ;;  %v826_v3 = vld [vmem:[%s825_s30] ss:$8 sm:$0x3]  ;;  %v814_v4 = vld [vmem:[#allocation2 + $0x4] ss:$8 sm:$0x3] }
 0x46a   :  { %v833_v5 = vperm.slane %v826_v3, 0 }
 0x46b   :  { %v3250_v14 = vsel %vm712_vm13, %v709_v7, %v3208_v29  ;;  %v3252_v15 = vsel %vm712_vm13, %v709_v7, 0.0  ;;  %v828_v7 = vperm.slane %v814_v4, 0 }
 0x46c   :  { %v1981_v18 = vrot.slane %v3252_v15, 6  ;;  %743 = vrot.lane.b32.xlu2 %v3250_v14, %s2568_s9 }
 0x46e   :  { %v3260_v21 = vsel %vm293_vm1, %v2019_v19, %v1981_v18  ;;  %v834_v19 = vperm.slane %v826_v3, 1 }
 0x4c6   :  { %v744_v22 = vpop.permute.xlu2 %743 }
 0x4c7   :  { %2266 = vmatmul.msk.f32.vlgmr.msra.gmra.mxu0 %vm453_vm8, %v744_v22  ;;  %2267 = vmatmul.msk.f32.vlgmr.msra.gmra.mxu1 %vm453_vm8, %v744_v22  ;;  %v829_v22 = vperm.slane %v814_v4, 1 }
 0x4c8   :  { %1143 = vmatpush.msra.mxu0 %v2726_v8  ;;  %1163 = vmatpush.msra.mxu1 %v2728_v9  ;;  %v729_v8 = vld [vmem:[%s728_s17] ss:$8 sm:$0x3]  ;;  %v717_v9 = vld [vmem:[#allocation2 + $0x3] ss:$8 sm:$0x3] }
 0x4c9   :  { %v732_v23 = vperm.slane %v717_v9, 1 }
 0x4ca   :  { %1144 = vmatpush.msra.mxu0 %v2733_v10  ;;  %1164 = vmatpush.msra.mxu1 %v2735_v11  ;;  %v736_v10 = vperm.slane %v729_v8, 0  ;;  %v731_v11 = vperm.slane %v717_v9, 0 }
 0x4cc   :  { %1145 = vmatpush.msra.mxu0 %v2740_v12  ;;  %1165 = vmatpush.msra.mxu1 %v2742_v13  ;;  %v740_v12 = vsel %vm3150_vm9, %v731_v11, %v736_v10  ;;  %v838_v10 = vsel %vm3154_vm10, %v829_v22, %v834_v19 }
 0x4ce   :  { %1146 = vmatpush.msra.mxu0 %v2763_v16  ;;  %1166 = vmatpush.msra.mxu1 %v2765_v17  ;;  %v737_v16 = vperm.slane %v729_v8, 1 }
 0x4d0   :  { %1147 = vmatpush.msra.mxu0 %v2947_v54  ;;  %1167 = vmatpush.msra.mxu1 %v2949_v55  ;;  %v741_v26 = vsel %vm3154_vm10, %v732_v23, %v737_v16 }
 0x4d2   :  { %1148 = vmatpush.msra.mxu0 %v2956_v56  ;;  %1168 = vmatpush.msra.mxu1 %v2958_v57 }
 0x4d4   :  { %1149 = vmatpush.msra.mxu0 %v2962_v58  ;;  %1169 = vmatpush.msra.mxu1 %v2964_v59 }
 0x4d6   :  { %1150 = vmatpush.msra.mxu0 %v2992_v63  ;;  %1170 = vmatpush.msra.mxu1 %v2994_v0 }
 0x544   :  { %v764_v13 = vpop.f32.mrf.mxu0  ;;  %v784_v24 = vpop.f32.mrf.mxu1 }
 0x545   :  { %v787_v17 = vadd.f32 %v764_v13, %v740_v12  ;;  %v788_v27 = vadd.f32 %v784_v24, %v741_v26 }
 0x547   :  { %v789_v25 = vmul.f32 0.5, %v787_v17  ;;  %v794_v34 = vmul.f32 0.5, %v788_v27 }
 0x549   :  { %2377 = vtanh.f32 %v789_v25  ;;  %v905_v25 = vstv %s904_s11  ;;  %s1112_s11 = sand.u32 7, %s3923_s2 }
 0x54a   :  { %2379 = vtanh.f32 %v788_v27  ;;  %vm906_vm15 = vcmp.eq.s32.totalorder %v905_v25, 1  ;;  %v3429_v25 = vld [vmem:[#allocation9 + $0x38] sm:$0xff]  ;;  %s1115_s0 = sadd.s32 %s2335_s10, %s1112_s11 }
 0x54b   :  { %2381 = vtanh.f32 %v794_v34  ;;  %s1116_s21 = scalar_lea.vmem [#allocation2], %s1115_s0 }
 0x54c   :  { %s1389_s10 = scalar_select %p166_p13, 1, 0 }
 0x54d   :  { %p1398_p13 = scmp.gt.s32.totalorder %s2298_s4, 0 }
 0x54f   :  { %v2378_v28 = vpop.eup %2377  ;;  %s3929_s4 = smov (!%p1398_p13, %s2298_s4), 0 }
 0x550   :  { %v791_v29 = vmul.f32 0.5, %v2378_v28  ;;  %v2380_v32 = vpop.eup %2379  ;;  %s1400_s15 = sshra.s32 %s3929_s4, 3 }
 0x551   :  { %v2382_v38 = vpop.eup %2381  ;;  %s2338_s16 = sshll.u32 %s1400_s15, 4  ;;  %s2323_s15 = sadd.s32 4294967280, %s3840_s1 }
 0x552   :  { %v792_v31 = vadd.f32 0.5, %v791_v29  ;;  %v796_v41 = vmul.f32 0.5, %v2382_v38 }
 0x554   :  { %v799_v33 = vmul.f32 %v2380_v32, %v792_v31  ;;  %v798_v36 = vmul.f32 %v792_v31, %v3246_v1  ;;  %v797_v42 = vadd.f32 0.5, %v796_v41 }
 0x556   :  { %801 = vrot.lane.b32.xlu0 %v799_v33, %s2568_s9 }
 0x5c8   :  { %v802_v37 = vpop.permute.xlu0 %801 }
 0x5c9   :  { %v804_v39 = vadd.f32 %v802_v37, %v798_v36 }
 0x5cb   :  { %2383 = vtanh.f32 %v804_v39  ;;  %v3294_v40 = vsel %vm809_vm14, %v804_v39, %v3246_v1  ;;  %v3328_v1 = vld [vmem:[#allocation9 + $0x40] sm:$0xff] }
 0x5d1   :  { %v2384_v43 = vpop.eup %2383 }
 0x5d2   :  { %v806_v45 = vmul.f32 %v2384_v43, %v797_v42 }
 0x5d4   :  { %v3297_v46 = vsel %vm809_vm14, %v806_v45, %v3250_v14  ;;  %v3299_v47 = vsel %vm809_vm14, %v806_v45, 0.0  ;;  %v837_v14 = vsel %vm3150_vm9, %v828_v7, %v833_v5  ;;  %v1002_v7 = vstv %s1001_s20  ;;  %s1209_s20 = sand.u32 7, %s3925_s19 }
 0x5d5   :  { %v1984_v48 = vrot.slane %v3299_v47, 5  ;;  %840 = vrot.lane.b32.xlu1 %v3297_v46, %s2568_s9  ;;  %vm1003_vm11 = vcmp.eq.s32.totalorder %v1002_v7, 1  ;;  %s1212_s17 = sadd.s32 %s2336_s3, %s1209_s20  ;;  %s1691_s20 = sshra.s32 %s3935_s18, 3 }
 0x5d6   :  { %s1213_s22 = scalar_lea.vmem [#allocation2], %s1212_s17  ;;  %s2341_s17 = sshll.u32 %s1691_s20, 4 }
 0x5d7   :  { %v3306_v49 = vsel %vm295_vm2, %v3260_v21, %v1984_v48  ;;  %s1486_s3 = scalar_select %p178_p7, 1, 0 }
 0x5d8   :  { %p1495_p7 = scmp.gt.s32.totalorder %s2303_s23, 0 }
 0x5da   :  { %s3931_s23 = smov (!%p1495_p7, %s2303_s23), 0 }
 0x5db   :  { %s1497_s24 = sshra.s32 %s3931_s23, 3 }
 0x5dc   :  { %s2339_s5 = sshll.u32 %s1497_s24, 4 }
 0x647   :  { %v841_v50 = vpop.permute.xlu1 %840 }
 0x648   :  { %2271 = vmatmul.msk.f32.vlgmr.msra.gmra.mxu2 %vm453_vm8, %v841_v50  ;;  %2272 = vmatmul.msk.f32.vlgmr.msra.gmra.mxu3 %vm453_vm8, %v841_v50 }
 0x649   :  { %1240 = vmatpush.msra.mxu2 %v3310_v51  ;;  %1260 = vmatpush.msra.mxu3 %v3313_v52 }
 0x64b   :  { %1241 = vmatpush.msra.mxu2 %v3316_v53  ;;  %1261 = vmatpush.msra.mxu3 %v3319_v60 }
 0x64d   :  { %1242 = vmatpush.msra.mxu2 %v3322_v61  ;;  %1262 = vmatpush.msra.mxu3 %v3325_v62 }
 0x64f   :  { %1243 = vmatpush.msra.mxu2 %v3328_v1  ;;  %1263 = vmatpush.msra.mxu3 %v3331_v2 }
 0x651   :  { %1244 = vmatpush.msra.mxu2 %v2947_v54  ;;  %1264 = vmatpush.msra.mxu3 %v2949_v55 }
 0x653   :  { %1245 = vmatpush.msra.mxu2 %v2956_v56  ;;  %1265 = vmatpush.msra.mxu3 %v2958_v57 }
 0x655   :  { %1246 = vmatpush.msra.mxu2 %v2962_v58  ;;  %1266 = vmatpush.msra.mxu3 %v2964_v59 }
 0x657   :  { %1247 = vmatpush.msra.mxu2 %v2992_v63  ;;  %1267 = vmatpush.msra.mxu3 %v2994_v0 }
 0x6cb   :  { %v861_v18 = vpop.f32.mrf.mxu2  ;;  %v881_v8 = vpop.f32.mrf.mxu3 }
 0x6cc   :  { %v884_v21 = vadd.f32 %v861_v18, %v837_v14  ;;  %v885_v11 = vadd.f32 %v881_v8, %v838_v10 }
 0x6ce   :  { %v886_v9 = vmul.f32 0.5, %v884_v21  ;;  %v891_v24 = vmul.f32 0.5, %v885_v11 }
 0x6d0   :  { %2385 = vtanh.f32 %v886_v9 }
 0x6d1   :  { %2387 = vtanh.f32 %v885_v11 }
 0x6d2   :  { %2389 = vtanh.f32 %v891_v24  ;;  %v3426_v24 = vld [vmem:[#allocation9 + $0x30] sm:$0xff] }
 0x6d6   :  { %v2386_v12 = vpop.eup %2385 }
 0x6d7   :  { %v888_v13 = vmul.f32 0.5, %v2386_v12  ;;  %v2388_v17 = vpop.eup %2387 }
 0x6d8   :  { %v2390_v28 = vpop.eup %2389 }
 0x6d9   :  { %v889_v16 = vadd.f32 0.5, %v888_v13  ;;  %v893_v32 = vmul.f32 0.5, %v2390_v28  ;;  %v3438_v28 = vld [vmem:[#allocation9 + $0x10] sm:$0xff] }
 0x6db   :  { %v896_v23 = vmul.f32 %v2388_v17, %v889_v16  ;;  %v895_v26 = vmul.f32 %v889_v16, %v3294_v40  ;;  %v894_v33 = vadd.f32 0.5, %v893_v32  ;;  %v3447_v32 = vld [vmem:[#allocation9 + $0x8] sm:$0xff] }
 0x6dd   :  { %898 = vrot.lane.b32.xlu2 %v896_v23, %s2568_s9 }
 0x737   :  { %v899_v27 = vpop.permute.xlu2 %898 }
 0x738   :  { %v901_v29 = vadd.f32 %v899_v27, %v895_v26  ;;  %v3432_v26 = vld [vmem:[#allocation9 + $0x20] sm:$0xff]  ;;  %v3435_v27 = vld [vmem:[#allocation9 + $0x28] sm:$0xff] }
 0x73a   :  { %2391 = vtanh.f32 %v901_v29  ;;  %v3356_v31 = vsel %vm906_vm15, %v901_v29, %v3294_v40  ;;  %v3441_v29 = vld [vmem:[#allocation9 + $0x18] sm:$0xff] }
 0x740   :  { %v2392_v34 = vpop.eup %2391 }
 0x741   :  { %v903_v35 = vmul.f32 %v2392_v34, %v894_v33  ;;  %v1020_v33 = vld [vmem:[%s1019_s13] ss:$8 sm:$0x3]  ;;  %v1008_v34 = vld [vmem:[#allocation2 + $0x6] ss:$8 sm:$0x3] }
 0x743   :  { %v3359_v36 = vsel %vm906_vm15, %v903_v35, %v3297_v46  ;;  %v3361_v37 = vsel %vm906_vm15, %v903_v35, 0.0  ;;  %v1027_v35 = vperm.slane %v1020_v33, 0 }
 0x744   :  { %v1987_v38 = vrot.slane %v3361_v37, 4  ;;  %937 = vrot.lane.b32.xlu0 %v3359_v36, %s2568_s9 }
 0x746   :  { %v3368_v39 = vsel %vm297_vm3, %v3306_v49, %v1987_v38 }
 0x7b6   :  { %v938_v40 = vpop.permute.xlu0 %937 }
 0x7b7   :  { %2276 = vmatmul.msk.f32.vlgmr.msrb.gmra.mxu0 %vm453_vm8, %v938_v40  ;;  %2277 = vmatmul.msk.f32.vlgmr.msrb.gmra.mxu1 %vm453_vm8, %v938_v40  ;;  %v1028_v40 = vperm.slane %v1020_v33, 1 }
 0x7b8   :  { %1337 = vmatpush.msrb.mxu0 %v3310_v51  ;;  %1357 = vmatpush.msrb.mxu1 %v3313_v52 }
 0x7ba   :  { %1338 = vmatpush.msrb.mxu0 %v3316_v53  ;;  %1358 = vmatpush.msrb.mxu1 %v3319_v60 }
 0x7bc   :  { %1339 = vmatpush.msrb.mxu0 %v3322_v61  ;;  %1359 = vmatpush.msrb.mxu1 %v3325_v62 }
 0x7be   :  { %1340 = vmatpush.msrb.mxu0 %v3328_v1  ;;  %1360 = vmatpush.msrb.mxu1 %v3331_v2 }
 0x7c0   :  { %1341 = vmatpush.msrb.mxu0 %v2947_v54  ;;  %1361 = vmatpush.msrb.mxu1 %v2949_v55  ;;  %v923_v54 = vld [vmem:[%s922_s8] ss:$8 sm:$0x3]  ;;  %v911_v55 = vld [vmem:[#allocation2 + $0x5] ss:$8 sm:$0x3] }
 0x7c1   :  { %v926_v41 = vperm.slane %v911_v55, 1 }
 0x7c2   :  { %1342 = vmatpush.msrb.mxu0 %v2956_v56  ;;  %1362 = vmatpush.msrb.mxu1 %v2958_v57  ;;  %v930_v56 = vperm.slane %v923_v54, 0  ;;  %v925_v57 = vperm.slane %v911_v55, 0  ;;  %v1023_v55 = vperm.slane %v1008_v34, 1 }
 0x7c4   :  { %1343 = vmatpush.msrb.mxu0 %v2962_v58  ;;  %1363 = vmatpush.msrb.mxu1 %v2964_v59  ;;  %v934_v58 = vsel %vm3150_vm9, %v925_v57, %v930_v56 }
 0x7c6   :  { %1344 = vmatpush.msrb.mxu0 %v2992_v63  ;;  %1364 = vmatpush.msrb.mxu1 %v2994_v0  ;;  %v931_v63 = vperm.slane %v923_v54, 1 }
 0x7c8   :  { %v935_v45 = vsel %vm3154_vm10, %v926_v41, %v931_v63 }
 0x834   :  { %v958_v59 = vpop.f32.mrf.mxu0  ;;  %v978_v42 = vpop.f32.mrf.mxu1 }
 0x835   :  { %v981_v0 = vadd.f32 %v958_v59, %v934_v58  ;;  %v982_v46 = vadd.f32 %v978_v42, %v935_v45  ;;  %v1032_v58 = vsel %vm3154_vm10, %v1023_v55, %v1028_v40 }
 0x837   :  { %v983_v43 = vmul.f32 0.5, %v981_v0  ;;  %v988_v5 = vmul.f32 0.5, %v982_v46 }
 0x839   :  { %2393 = vtanh.f32 %v983_v43 }
 0x83a   :  { %2395 = vtanh.f32 %v982_v46  ;;  %v1099_v46 = vstv %s1098_s14  ;;  %s1306_s14 = sand.u32 7, %s3927_s26 }
 0x83b   :  { %2397 = vtanh.f32 %v988_v5  ;;  %vm1100_vm12 = vcmp.eq.s32.totalorder %v1099_v46, 1  ;;  %s1309_s30 = sadd.s32 %s2337_s29, %s1306_s14  ;;  %s1788_s14 = sshra.s32 %s3937_s12, 3 }
 0x83c   :  { %s1310_s2 = scalar_lea.vmem [#allocation2], %s1309_s30  ;;  %s2342_s30 = sshll.u32 %s1788_s14, 4 }
 0x83d   :  { %s1583_s29 = scalar_select %p190_p11, 1, 0 }
 0x83e   :  { %p1592_p11 = scmp.gt.s32.totalorder %s2308_s28, 0 }
 0x83f   :  { %v2394_v48 = vpop.eup %2393 }
 0x840   :  { %v985_v49 = vmul.f32 0.5, %v2394_v48  ;;  %v2396_v3 = vpop.eup %2395  ;;  %s3933_s28 = smov (!%p1592_p11, %s2308_s28), 0 }
 0x841   :  { %v2398_v19 = vpop.eup %2397  ;;  %s1594_s11 = sshra.s32 %s3933_s28, 3 }
 0x842   :  { %v986_v50 = vadd.f32 0.5, %v985_v49  ;;  %v990_v8 = vmul.f32 0.5, %v2398_v19  ;;  %s2340_s0 = sshll.u32 %s1594_s11, 4 }
 0x844   :  { %v993_v4 = vmul.f32 %v2396_v3, %v986_v50  ;;  %v992_v14 = vmul.f32 %v986_v50, %v3356_v31  ;;  %v991_v9 = vadd.f32 0.5, %v990_v8 }
 0x846   :  { %995 = vrot.lane.b32.xlu1 %v993_v4, %s2568_s9 }
 0x8b8   :  { %v996_v18 = vpop.permute.xlu1 %995 }
 0x8b9   :  { %v998_v21 = vadd.f32 %v996_v18, %v992_v14 }
 0x8bb   :  { %2399 = vtanh.f32 %v998_v21  ;;  %v3402_v22 = vsel %vm1003_vm11, %v998_v21, %v3356_v31  ;;  %v3444_v31 = vld [vmem:[#allocation9] sm:$0xff] }
 0x8c1   :  { %v2400_v10 = vpop.eup %2399 }
 0x8c2   :  { %v1000_v11 = vmul.f32 %v2400_v10, %v991_v9  ;;  %v1117_v10 = vld [vmem:[%s1116_s21] ss:$8 sm:$0x3] }
 0x8c3   :  { %v1125_v33 = vperm.slane %v1117_v10, 1 }
 0x8c4   :  { %v3405_v12 = vsel %vm1003_vm11, %v1000_v11, %v3359_v36  ;;  %v3407_v13 = vsel %vm1003_vm11, %v1000_v11, 0.0  ;;  %v1022_v36 = vperm.slane %v1008_v34, 0  ;;  %v1105_v11 = vld [vmem:[#allocation2 + $0x7] ss:$8 sm:$0x3] }
 0x8c5   :  { %v1990_v16 = vrot.slane %v3407_v13, 3  ;;  %1034 = vrot.lane.b32.xlu2 %v3405_v12, %s2568_s9 }
 0x8c6   :  { %v1031_v38 = vsel %vm3150_vm9, %v1022_v36, %v1027_v35  ;;  %v1120_v35 = vperm.slane %v1105_v11, 1 }
 0x8c7   :  { %v3414_v17 = vsel %vm299_vm4, %v3368_v39, %v1990_v16  ;;  %v1119_v16 = vperm.slane %v1105_v11, 0 }
 0x91f   :  { %v1035_v23 = vpop.permute.xlu2 %1034 }
 0x920   :  { %2281 = vmatmul.msk.f32.vlgmr.msrb.gmra.mxu2 %vm453_vm8, %v1035_v23  ;;  %2282 = vmatmul.msk.f32.vlgmr.msrb.gmra.mxu3 %vm453_vm8, %v1035_v23 }
 0x921   :  { %1434 = vmatpush.msrb.mxu2 %v3310_v51  ;;  %1454 = vmatpush.msrb.mxu3 %v3313_v52 }
 0x923   :  { %1435 = vmatpush.msrb.mxu2 %v3316_v53  ;;  %1455 = vmatpush.msrb.mxu3 %v3319_v60 }
 0x925   :  { %1436 = vmatpush.msrb.mxu2 %v3322_v61  ;;  %1456 = vmatpush.msrb.mxu3 %v3325_v62 }
 0x927   :  { %1437 = vmatpush.msrb.mxu2 %v3328_v1  ;;  %1457 = vmatpush.msrb.mxu3 %v3331_v2 }
 0x929   :  { %1438 = vmatpush.msrb.mxu2 %v3426_v24  ;;  %1458 = vmatpush.msrb.mxu3 %v3429_v25 }
 0x92b   :  { %1439 = vmatpush.msrb.mxu2 %v3432_v26  ;;  %1459 = vmatpush.msrb.mxu3 %v3435_v27 }
 0x92d   :  { %1440 = vmatpush.msrb.mxu2 %v3438_v28  ;;  %1460 = vmatpush.msrb.mxu3 %v3441_v29 }
 0x92f   :  { %1441 = vmatpush.msrb.mxu2 %v3444_v31  ;;  %1461 = vmatpush.msrb.mxu3 %v3447_v32 }
 0x9a3   :  { %v1055_v39 = vpop.f32.mrf.mxu2  ;;  %v1075_v56 = vpop.f32.mrf.mxu3 }
 0x9a4   :  { %v1078_v54 = vadd.f32 %v1055_v39, %v1031_v38  ;;  %v1079_v59 = vadd.f32 %v1075_v56, %v1032_v58  ;;  %v1129_v39 = vsel %vm3154_vm10, %v1120_v35, %v1125_v33 }
 0x9a6   :  { %v1080_v57 = vmul.f32 0.5, %v1078_v54  ;;  %v1085_v45 = vmul.f32 0.5, %v1079_v59 }
 0x9a8   :  { %2401 = vtanh.f32 %v1080_v57 }
 0x9a9   :  { %2403 = vtanh.f32 %v1079_v59 }
 0x9aa   :  { %2405 = vtanh.f32 %v1085_v45 }
 0x9ae   :  { %v2402_v63 = vpop.eup %2401 }
 0x9af   :  { %v1082_v0 = vmul.f32 0.5, %v2402_v63  ;;  %v2404_v42 = vpop.eup %2403  ;;  %v1196_v63 = vstv %s1195_s27  ;;  %s1403_s27 = sand.u32 7, %s3929_s4 }
 0x9b0   :  { %v2406_v50 = vpop.eup %2405  ;;  %vm1197_vm13 = vcmp.eq.s32.totalorder %v1196_v63, 1  ;;  %s1406_s8 = sadd.s32 %s2338_s16, %s1403_s27 }
 0x9b1   :  { %v1083_v41 = vadd.f32 0.5, %v1082_v0  ;;  %v1087_v5 = vmul.f32 0.5, %v2406_v50  ;;  %s1407_s19 = scalar_lea.vmem [#allocation2], %s1406_s8 }
 0x9b2   :  { %s1680_s16 = scalar_select %p3872_p3, 1, 0 }
 0x9b3   :  { %v1090_v43 = vmul.f32 %v2404_v42, %v1083_v41  ;;  %v1089_v48 = vmul.f32 %v1083_v41, %v3402_v22  ;;  %v1088_v7 = vadd.f32 0.5, %v1087_v5  ;;  %v2050_v5 = vrot.slane %v3407_v13, 6 }
 0x9b5   :  { %1092 = vrot.lane.b32.xlu0 %v1090_v43, %s2568_s9 }
 0xa27   :  { %v1093_v49 = vpop.permute.xlu0 %1092 }
 0xa28   :  { %v1095_v3 = vadd.f32 %v1093_v49, %v1089_v48 }
 0xa2a   :  { %2407 = vtanh.f32 %v1095_v3  ;;  %v3464_v4 = vsel %vm1100_vm12, %v1095_v3, %v3402_v22 }
 0xa30   :  { %v2408_v14 = vpop.eup %2407 }
 0xa31   :  { %v1097_v18 = vmul.f32 %v2408_v14, %v1088_v7 }
 0xa33   :  { %v3467_v19 = vsel %vm1100_vm12, %v1097_v18, %v3405_v12  ;;  %v3469_v21 = vsel %vm1100_vm12, %v1097_v18, 0.0  ;;  %v1124_v12 = vperm.slane %v1117_v10, 0  ;;  %v2052_v18 = vrot.slane %v3361_v37, 5 }
 0xa34   :  { %v1993_v8 = vrot.slane %v3469_v21, 2  ;;  %1131 = vrot.lane.b32.xlu1 %v3467_v19, %s2568_s9  ;;  %v2048_v3 = vrot.slane %v3469_v21, 7  ;;  %v2056_v21 = vrot.slane %v3252_v15, 3  ;;  %v2058_v37 = vrot.slane %v3210_v30, 2 }
 0xa35   :  { %v1202_v30 = vld [vmem:[#allocation2 + $0x10] ss:$8 sm:$0x3]  ;;  %v1214_v15 = vld [vmem:[%s1213_s22] ss:$8 sm:$0x3] }
 0xa36   :  { %v3476_v9 = vsel %vm301_vm5, %v3414_v17, %v1993_v8  ;;  %v1128_v17 = vsel %vm3150_vm9, %v1119_v16, %v1124_v12  ;;  %v1222_v35 = vperm.slane %v1214_v15, 1 }
 0xaa6   :  { %v1132_v22 = vpop.permute.xlu1 %1131 }
 0xaa7   :  { %2286 = vmatmul.msk.f32.vlgmr.msra.gmra.mxu0 %vm453_vm8, %v1132_v22  ;;  %2287 = vmatmul.msk.f32.vlgmr.msra.gmra.mxu1 %vm453_vm8, %v1132_v22  ;;  %v2054_v22 = vrot.slane %v3299_v47, 4 }
 0xaa8   :  { %1531 = vmatpush.msra.mxu0 %v3310_v51  ;;  %1551 = vmatpush.msra.mxu1 %v3313_v52 }
 0xaaa   :  { %1532 = vmatpush.msra.mxu0 %v3316_v53  ;;  %1552 = vmatpush.msra.mxu1 %v3319_v60 }
 0xaac   :  { %1533 = vmatpush.msra.mxu0 %v3322_v61  ;;  %1553 = vmatpush.msra.mxu1 %v3325_v62 }
 0xaae   :  { %1534 = vmatpush.msra.mxu0 %v3328_v1  ;;  %1554 = vmatpush.msra.mxu1 %v3331_v2 }
 0xab0   :  { %1535 = vmatpush.msra.mxu0 %v3426_v24  ;;  %1555 = vmatpush.msra.mxu1 %v3429_v25 }
 0xab2   :  { %1536 = vmatpush.msra.mxu0 %v3432_v26  ;;  %1556 = vmatpush.msra.mxu1 %v3435_v27 }
 0xab4   :  { %1537 = vmatpush.msra.mxu0 %v3438_v28  ;;  %1557 = vmatpush.msra.mxu1 %v3441_v29 }
 0xab6   :  { %1538 = vmatpush.msra.mxu0 %v3444_v31  ;;  %1558 = vmatpush.msra.mxu1 %v3447_v32 }
 0xb24   :  { %v1152_v23 = vpop.f32.mrf.mxu0  ;;  %v1172_v36 = vpop.f32.mrf.mxu1 }
 0xb25   :  { %v1175_v34 = vadd.f32 %v1152_v23, %v1128_v17  ;;  %v1176_v40 = vadd.f32 %v1172_v36, %v1129_v39  ;;  %v1221_v17 = vperm.slane %v1214_v15, 0 }
 0xb27   :  { %v1177_v38 = vmul.f32 0.5, %v1175_v34  ;;  %v1182_v59 = vmul.f32 0.5, %v1176_v40  ;;  %v1217_v34 = vperm.slane %v1202_v30, 1 }
 0xb29   :  { %2409 = vtanh.f32 %v1177_v38 }
 0xb2a   :  { %2411 = vtanh.f32 %v1176_v40  ;;  %v1226_v40 = vsel %vm3154_vm10, %v1217_v34, %v1222_v35 }
 0xb2b   :  { %2413 = vtanh.f32 %v1182_v59 }
 0xb2f   :  { %v2410_v54 = vpop.eup %2409 }
 0xb30   :  { %v1179_v55 = vmul.f32 0.5, %v2410_v54  ;;  %v2412_v57 = vpop.eup %2411 }
 0xb31   :  { %v2414_v42 = vpop.eup %2413 }
 0xb32   :  { %v1180_v56 = vadd.f32 0.5, %v1179_v55  ;;  %v1184_v46 = vmul.f32 0.5, %v2414_v42 }
 0xb34   :  { %v1187_v58 = vmul.f32 %v2412_v57, %v1180_v56  ;;  %v1186_v0 = vmul.f32 %v1180_v56, %v3464_v4  ;;  %v1185_v48 = vadd.f32 0.5, %v1184_v46 }
 0xb36   :  { %1189 = vrot.lane.b32.xlu2 %v1187_v58, %s2568_s9 }
 0xb90   :  { %v1190_v41 = vpop.permute.xlu2 %1189 }
 0xb91   :  { %v1192_v43 = vadd.f32 %v1190_v41, %v1186_v0  ;;  %v1293_v0 = vstv %s1292_s25  ;;  %s1500_s25 = sand.u32 7, %s3931_s23 }
 0xb92   :  { %vm1294_vm14 = vcmp.eq.s32.totalorder %v1293_v0, 1  ;;  %s1503_s13 = sadd.s32 %s2339_s5, %s1500_s25 }
 0xb93   :  { %2415 = vtanh.f32 %v1192_v43  ;;  %v3510_v45 = vsel %vm1197_vm13, %v1192_v43, %v3464_v4  ;;  %s1504_s26 = scalar_lea.vmem [#allocation2], %s1503_s13  ;;  %s2569_s13 = smov [#allocation10]  }
 0xb94   :  { %s1777_s5 = scalar_select %p3873_p5, 1, 0 }
 0xb99   :  { %v2416_v49 = vpop.eup %2415 }
 0xb9a   :  { %v1194_v50 = vmul.f32 %v2416_v49, %v1185_v48 }
 0xb9c   :  { %v3515_v7 = vsel %vm1197_vm13, %v1194_v50, %v3467_v19  ;;  %v1200_v14 = vsel %vm1197_vm13, %v1194_v50, 0.0 }
 0xb9d   :  { %v2069_v8 = vsel %vm291_vm0, %v1200_v14, %v2048_v3  ;;  %1228 = vrot.lane.b32.xlu0 %v3515_v7, %s2568_s9  ;;  %v1996_v4 = vrot.slane %v1200_v14, 1 }
 0xb9e   :  { %v2070_v10 = vsel %vm293_vm1, %v2069_v8, %v2050_v5 }
 0xb9f   :  { %v2071_v13 = vsel %vm295_vm2, %v2070_v10, %v2052_v18  ;;  %v3527_v19 = vsel %vm303_vm6, %v3476_v9, %v1996_v4  ;;  %v1216_v9 = vperm.slane %v1202_v30, 0 }
 0xba0   :  { %v2072_v11 = vsel %vm297_vm3, %v2071_v13, %v2054_v22 }
 0xba1   :  { %v2073_v12 = vsel %vm299_vm4, %v2072_v11, %v2056_v21  ;;  %v1225_v23 = vsel %vm3150_vm9, %v1216_v9, %v1221_v17 }
 0xba2   :  { %v3533_v16 = vsel %vm301_vm5, %v2073_v12, %v2058_v37 }
 0xc0f   :  { %v1229_v47 = vpop.permute.xlu0 %1228 }
 0xc10   :  { %2291 = vmatmul.msk.f32.vlgmr.msra.gmra.mxu2 %vm453_vm8, %v1229_v47  ;;  %2292 = vmatmul.msk.f32.vlgmr.msra.gmra.mxu3 %vm453_vm8, %v1229_v47 }
 0xc11   :  { %1628 = vmatpush.msra.mxu2 %v3310_v51  ;;  %1648 = vmatpush.msra.mxu3 %v3313_v52 }
 0xc13   :  { %1629 = vmatpush.msra.mxu2 %v3316_v53  ;;  %1649 = vmatpush.msra.mxu3 %v3319_v60 }
 0xc15   :  { %1630 = vmatpush.msra.mxu2 %v3322_v61  ;;  %1650 = vmatpush.msra.mxu3 %v3325_v62 }
 0xc17   :  { %1631 = vmatpush.msra.mxu2 %v3328_v1  ;;  %1651 = vmatpush.msra.mxu3 %v3331_v2 }
 0xc19   :  { %1632 = vmatpush.msra.mxu2 %v3426_v24  ;;  %1652 = vmatpush.msra.mxu3 %v3429_v25 }
 0xc1b   :  { %1633 = vmatpush.msra.mxu2 %v3432_v26  ;;  %1653 = vmatpush.msra.mxu3 %v3435_v27 }
 0xc1d   :  { %1634 = vmatpush.msra.mxu2 %v3438_v28  ;;  %1654 = vmatpush.msra.mxu3 %v3441_v29 }
 0xc1f   :  { %1635 = vmatpush.msra.mxu2 %v3444_v31  ;;  %1655 = vmatpush.msra.mxu3 %v3447_v32 }
 0xc93   :  { %v1249_v33 = vpop.f32.mrf.mxu2  ;;  %v1269_v38 = vpop.f32.mrf.mxu3 }
 0xc94   :  { %v1272_v36 = vadd.f32 %v1249_v33, %v1225_v23  ;;  %v1273_v54 = vadd.f32 %v1269_v38, %v1226_v40 }
 0xc96   :  { %v1274_v39 = vmul.f32 0.5, %v1272_v36  ;;  %v1279_v63 = vmul.f32 0.5, %v1273_v54  ;;  %v1390_v36 = vstv %s1389_s10  ;;  %s1597_s10 = sand.u32 7, %s3933_s28 }
 0xc97   :  { %vm1391_vm15 = vcmp.eq.s32.totalorder %v1390_v36, 1  ;;  %s1600_s21 = sadd.s32 %s2340_s0, %s1597_s10 }
 0xc98   :  { %2417 = vtanh.f32 %v1274_v39  ;;  %s1601_s4 = scalar_lea.vmem [#allocation2], %s1600_s21 }
 0xc99   :  { %2419 = vtanh.f32 %v1273_v54  ;;  %s1874_s0 = scalar_select %p226_p8, 1, 0 }
 0xc9a   :  { %2421 = vtanh.f32 %v1279_v63  ;;  %p1883_p8 = scmp.gt.s32.totalorder %s2323_s15, 0 }
 0xc9c   :  { %s3939_s15 = smov (!%p1883_p8, %s2323_s15), 0 }
 0xc9d   :  { %s1885_s27 = sshra.s32 %s3939_s15, 3 }
 0xc9e   :  { %v2418_v55 = vpop.eup %2417  ;;  %s2343_s8 = sshll.u32 %s1885_s27, 4 }
 0xc9f   :  { %v1276_v56 = vmul.f32 0.5, %v2418_v55  ;;  %v2420_v58 = vpop.eup %2419 }
 0xca0   :  { %v2422_v43 = vpop.eup %2421 }
 0xca1   :  { %v1277_v57 = vadd.f32 0.5, %v1276_v56  ;;  %v1281_v49 = vmul.f32 0.5, %v2422_v43 }
 0xca3   :  { %v1284_v59 = vmul.f32 %v2420_v58, %v1277_v57  ;;  %v1283_v41 = vmul.f32 %v1277_v57, %v3510_v45  ;;  %v1282_v50 = vadd.f32 0.5, %v1281_v49 }
 0xca5   :  { %1286 = vrot.lane.b32.xlu1 %v1284_v59, %s2568_s9 }
 0xd17   :  { %v1287_v42 = vpop.permute.xlu1 %1286 }
 0xd18   :  { %v1289_v46 = vadd.f32 %v1287_v42, %v1283_v41 }
 0xd1a   :  { %2423 = vtanh.f32 %v1289_v46  ;;  %v3567_v48 = vsel %vm1294_vm14, %v1289_v46, %v3510_v45  ;;  %v1299_v45 = vld [vmem:[#allocation2 + $0x11] ss:$8 sm:$0x3]  ;;  %v1396_v46 = vld [vmem:[#allocation2 + $0x12] ss:$8 sm:$0x3] }
 0xd1b   :  { %v1313_v4 = vperm.slane %v1299_v45, 0  ;;  %v1314_v13 = vperm.slane %v1299_v45, 1  ;;  %v1410_v49 = vperm.slane %v1396_v46, 0 }
 0xd20   :  { %v2424_v3 = vpop.eup %2423 }
 0xd21   :  { %v1291_v5 = vmul.f32 %v2424_v3, %v1282_v50 }
 0xd23   :  { %v3570_v14 = vsel %vm1294_vm14, %v1291_v5, %v3515_v7  ;;  %v3572_v18 = vsel %vm1294_vm14, %v1291_v5, 0.0  ;;  %v1311_v7 = vld [vmem:[%s1310_s2] ss:$8 sm:$0x3] }
 0xd24   :  { %1325 = vrot.lane.b32.xlu2 %v3570_v14, %s2568_s9  ;;  %v1318_v22 = vperm.slane %v1311_v7, 0  ;;  %v1319_v37 = vperm.slane %v1311_v7, 1 }
 0xd26   :  { %v1322_v10 = vsel %vm3150_vm9, %v1313_v4, %v1318_v22  ;;  %v1323_v30 = vsel %vm3154_vm10, %v1314_v13, %v1319_v37 }
 0xd7e   :  { %v1326_v8 = vpop.permute.xlu2 %1325 }
 0xd7f   :  { %2296 = vmatmul.msk.f32.vlgmr.msrb.gmra.mxu0 %vm453_vm8, %v1326_v8  ;;  %2297 = vmatmul.msk.f32.vlgmr.msrb.gmra.mxu1 %vm453_vm8, %v1326_v8 }
 0xd80   :  { %1725 = vmatpush.msrb.mxu0 %v3310_v51  ;;  %1745 = vmatpush.msrb.mxu1 %v3313_v52 }
 0xd82   :  { %1726 = vmatpush.msrb.mxu0 %v3316_v53  ;;  %1746 = vmatpush.msrb.mxu1 %v3319_v60 }
 0xd84   :  { %1727 = vmatpush.msrb.mxu0 %v3322_v61  ;;  %1747 = vmatpush.msrb.mxu1 %v3325_v62 }
 0xd86   :  { %1728 = vmatpush.msrb.mxu0 %v3328_v1  ;;  %1748 = vmatpush.msrb.mxu1 %v3331_v2 }
 0xd88   :  { %1729 = vmatpush.msrb.mxu0 %v3426_v24  ;;  %1749 = vmatpush.msrb.mxu1 %v3429_v25 }
 0xd8a   :  { %1730 = vmatpush.msrb.mxu0 %v3432_v26  ;;  %1750 = vmatpush.msrb.mxu1 %v3435_v27 }
 0xd8c   :  { %1731 = vmatpush.msrb.mxu0 %v3438_v28  ;;  %1751 = vmatpush.msrb.mxu1 %v3441_v29 }
 0xd8e   :  { %1732 = vmatpush.msrb.mxu0 %v3444_v31  ;;  %1752 = vmatpush.msrb.mxu1 %v3447_v32 }
 0xdfc   :  { %v1346_v21 = vpop.f32.mrf.mxu0  ;;  %v1366_v12 = vpop.f32.mrf.mxu1 }
 0xdfd   :  { %v1369_v11 = vadd.f32 %v1346_v21, %v1322_v10  ;;  %v1370_v15 = vadd.f32 %v1366_v12, %v1323_v30  ;;  %v1487_v30 = vstv %s1486_s3  ;;  %s1694_s3 = sand.u32 7, %s3935_s18 }
 0xdfe   :  { %vm1488_vm11 = vcmp.eq.s32.totalorder %v1487_v30, 1  ;;  %s1697_s22 = sadd.s32 %s2341_s17, %s1694_s3 }
 0xdff   :  { %v1371_v47 = vmul.f32 0.5, %v1369_v11  ;;  %v1376_v35 = vmul.f32 0.5, %v1370_v15  ;;  %s1698_s23 = scalar_lea.vmem [#allocation2], %s1697_s22 }
 0xe00   :  { %s1971_s17 = scalar_select %p238_p10, 1, 0 }
 0xe01   :  { %2425 = vtanh.f32 %v1371_v47 }
 0xe02   :  { %2427 = vtanh.f32 %v1370_v15  ;;  %v1972_v20 = vstv %s1971_s17 }
 0xe03   :  { %2429 = vtanh.f32 %v1376_v35 }
 0xe07   :  { %v2426_v9 = vpop.eup %2425 }
 0xe08   :  { %v1373_v17 = vmul.f32 0.5, %v2426_v9  ;;  %v2428_v33 = vpop.eup %2427 }
 0xe09   :  { %v2430_v40 = vpop.eup %2429 }
 0xe0a   :  { %v1374_v23 = vadd.f32 0.5, %v1373_v17  ;;  %v1378_v56 = vmul.f32 0.5, %v2430_v40 }
 0xe0c   :  { %v1381_v34 = vmul.f32 %v2428_v33, %v1374_v23  ;;  %v1380_v38 = vmul.f32 %v1374_v23, %v3567_v48  ;;  %v1379_v57 = vadd.f32 0.5, %v1378_v56 }
 0xe0e   :  { %1383 = vrot.lane.b32.xlu0 %v1381_v34, %s2568_s9 }
 0xe80   :  { %v1384_v39 = vpop.permute.xlu0 %1383 }
 0xe81   :  { %v1386_v54 = vadd.f32 %v1384_v39, %v1380_v38 }
 0xe83   :  { %2431 = vtanh.f32 %v1386_v54  ;;  %v3608_v55 = vsel %vm1391_vm15, %v1386_v54, %v3567_v48  ;;  %v1408_v48 = vld [vmem:[%s1407_s19] ss:$8 sm:$0x3] }
 0xe84   :  { %v1415_v50 = vperm.slane %v1408_v48, 0  ;;  %v1416_v8 = vperm.slane %v1408_v48, 1 }
 0xe86   :  { %v1419_v3 = vsel %vm3150_vm9, %v1410_v49, %v1415_v50 }
 0xe89   :  { %v2432_v58 = vpop.eup %2431 }
 0xe8a   :  { %v1388_v59 = vmul.f32 %v2432_v58, %v1379_v57 }
 0xe8c   :  { %v3611_v63 = vsel %vm1391_vm15, %v1388_v59, %v3570_v14  ;;  %v3613_v0 = vsel %vm1391_vm15, %v1388_v59, 0.0  ;;  %v1411_v14 = vperm.slane %v1396_v46, 1 }
 0xe8d   :  { %v1999_v41 = vrot.slane %v3613_v0, 7  ;;  %1422 = vrot.lane.b32.xlu1 %v3611_v63, %s2568_s9 }
 0xe8e   :  { %v1420_v22 = vsel %vm3154_vm10, %v1411_v14, %v1416_v8 }
 0xe8f   :  { %v3620_v42 = vsel %vm291_vm0, %v3572_v18, %v1999_v41 }
 0xeff   :  { %v1423_v43 = vpop.permute.xlu1 %1422 }
 0xf00   :  { %2301 = vmatmul.msk.f32.vlgmr.msrb.gmra.mxu2 %vm453_vm8, %v1423_v43  ;;  %2302 = vmatmul.msk.f32.vlgmr.msrb.gmra.mxu3 %vm453_vm8, %v1423_v43 }
 0xf01   :  { %1822 = vmatpush.msrb.mxu2 %v3310_v51  ;;  %1842 = vmatpush.msrb.mxu3 %v3313_v52 }
 0xf03   :  { %1823 = vmatpush.msrb.mxu2 %v3316_v53  ;;  %1843 = vmatpush.msrb.mxu3 %v3319_v60 }
 0xf05   :  { %1824 = vmatpush.msrb.mxu2 %v3322_v61  ;;  %1844 = vmatpush.msrb.mxu3 %v3325_v62 }
 0xf07   :  { %1825 = vmatpush.msrb.mxu2 %v3328_v1  ;;  %1845 = vmatpush.msrb.mxu3 %v3331_v2 }
 0xf09   :  { %1826 = vmatpush.msrb.mxu2 %v3426_v24  ;;  %1846 = vmatpush.msrb.mxu3 %v3429_v25 }
 0xf0b   :  { %1827 = vmatpush.msrb.mxu2 %v3432_v26  ;;  %1847 = vmatpush.msrb.mxu3 %v3435_v27 }
 0xf0d   :  { %1828 = vmatpush.msrb.mxu2 %v3438_v28  ;;  %1848 = vmatpush.msrb.mxu3 %v3441_v29 }
 0xf0f   :  { %1829 = vmatpush.msrb.mxu2 %v3444_v31  ;;  %1849 = vmatpush.msrb.mxu3 %v3447_v32 }
 0xf83   :  { %v1443_v5 = vpop.f32.mrf.mxu2  ;;  %v1463_v7 = vpop.f32.mrf.mxu3 }
 0xf84   :  { %v1466_v45 = vadd.f32 %v1443_v5, %v1419_v3  ;;  %v1467_v10 = vadd.f32 %v1463_v7, %v1420_v22  ;;  %v1590_v22 = vld [vmem:[#allocation2 + $0x14] ss:$8 sm:$0x3] }
 0xf86   :  { %v1468_v4 = vmul.f32 0.5, %v1466_v45  ;;  %v1473_v47 = vmul.f32 0.5, %v1467_v10 }
 0xf88   :  { %2433 = vtanh.f32 %v1468_v4 }
 0xf89   :  { %2435 = vtanh.f32 %v1467_v10  ;;  %v1602_v10 = vld [vmem:[%s1601_s4] ss:$8 sm:$0x3] }
 0xf8a   :  { %2437 = vtanh.f32 %v1473_v47  ;;  %v1610_v47 = vperm.slane %v1602_v10, 1 }
 0xf8e   :  { %v2434_v21 = vpop.eup %2433 }
 0xf8f   :  { %v1470_v13 = vmul.f32 0.5, %v2434_v21  ;;  %v2436_v11 = vpop.eup %2435  ;;  %v1604_v21 = vperm.slane %v1590_v22, 0 }
 0xf90   :  { %v2438_v17 = vpop.eup %2437 }
 0xf91   :  { %v1471_v37 = vadd.f32 0.5, %v1470_v13  ;;  %v1475_v34 = vmul.f32 0.5, %v2438_v17  ;;  %v1609_v13 = vperm.slane %v1602_v10, 0 }
 0xf93   :  { %v1478_v12 = vmul.f32 %v2436_v11, %v1471_v37  ;;  %v1477_v15 = vmul.f32 %v1471_v37, %v3608_v55  ;;  %v1476_v35 = vadd.f32 0.5, %v1475_v34  ;;  %v1613_v37 = vsel %vm3150_vm9, %v1604_v21, %v1609_v13 }
 0xf95   :  { %1480 = vrot.lane.b32.xlu2 %v1478_v12, %s2568_s9  ;;  %v1605_v12 = vperm.slane %v1590_v22, 1 }
 0xf97   :  { %v1614_v17 = vsel %vm3154_vm10, %v1605_v12, %v1610_v47 }
 0xfef   :  { %v1481_v9 = vpop.permute.xlu2 %1480 }
 0xff0   :  { %v1483_v23 = vadd.f32 %v1481_v9, %v1477_v15 }
 0xff2   :  { %2439 = vtanh.f32 %v1483_v23  ;;  %v3654_v33 = vsel %vm1488_vm11, %v1483_v23, %v3608_v55 }
 0xff8   :  { %v2440_v36 = vpop.eup %2439 }
 0xff9   :  { %v1485_v38 = vmul.f32 %v2440_v36, %v1476_v35 }
 0xffb   :  { %v3657_v39 = vsel %vm1488_vm11, %v1485_v38, %v3611_v63  ;;  %v3659_v40 = vsel %vm1488_vm11, %v1485_v38, 0.0  ;;  %v1584_v63 = vstv %s1583_s29  ;;  %s1791_s29 = sand.u32 7, %s3937_s12 }
 0xffc   :  { %v2002_v54 = vrot.slane %v3659_v40, 6  ;;  %1519 = vrot.lane.b32.xlu0 %v3657_v39, %s2568_s9  ;;  %vm1585_vm12 = vcmp.eq.s32.totalorder %v1584_v63, 1  ;;  %s1794_s2 = sadd.s32 %s2342_s30, %s1791_s29 }
 0xffd   :  { %s1795_s28 = scalar_lea.vmem [#allocation2], %s1794_s2 }
 0xffe   :  { %v3666_v56 = vsel %vm293_vm1, %v3620_v42, %v2002_v54  ;;  %v1681_v54 = vstv %s1680_s16  ;;  %s1888_s16 = sand.u32 7, %s3939_s15 }
 0xfff   :  { %vm1682_vm13 = vcmp.eq.s32.totalorder %v1681_v54, 1  ;;  %s1891_s19 = sadd.s32 %s2343_s8, %s1888_s16 }
0x1000   :  { %s1892_s18 = scalar_lea.vmem [#allocation2], %s1891_s19 }
0x106e   :  { %v1520_v55 = vpop.permute.xlu0 %1519 }
0x106f   :  { %2306 = vmatmul.msk.f32.vlgmr.msra.gmra.mxu0 %vm453_vm8, %v1520_v55  ;;  %2307 = vmatmul.msk.f32.vlgmr.msra.gmra.mxu1 %vm453_vm8, %v1520_v55 }
0x1070   :  { %1919 = vmatpush.msra.mxu0 %v3310_v51  ;;  %1939 = vmatpush.msra.mxu1 %v3313_v52  ;;  %v1493_v51 = vld [vmem:[#allocation2 + $0x13] ss:$8 sm:$0x3]  ;;  %v1505_v52 = vld [vmem:[%s1504_s26] ss:$8 sm:$0x3] }
0x1071   :  { %s2114_s26 = sshll.u32 %s2569_s13, 4  ;;  %s2115_s26 = int_to_ptr.vmem [resolvable:$true] %s2114_s26 }
0x1072   :  { %1920 = vmatpush.msra.mxu0 %v3316_v53  ;;  %1940 = vmatpush.msra.mxu1 %v3319_v60  ;;  %v1507_v53 = vperm.slane %v1493_v51, 0  ;;  %v1512_v60 = vperm.slane %v1505_v52, 0 }
0x1074   :  { %1921 = vmatpush.msra.mxu0 %v3322_v61  ;;  %1941 = vmatpush.msra.mxu1 %v3325_v62  ;;  %v1516_v61 = vsel %vm3150_vm9, %v1507_v53, %v1512_v60 }
0x1076   :  { %1922 = vmatpush.msra.mxu0 %v3328_v1  ;;  %1942 = vmatpush.msra.mxu1 %v3331_v2  ;;  %v1508_v1 = vperm.slane %v1493_v51, 1  ;;  %v1513_v2 = vperm.slane %v1505_v52, 1 }
0x1078   :  { %1923 = vmatpush.msra.mxu0 %v3426_v24  ;;  %1943 = vmatpush.msra.mxu1 %v3429_v25 }
0x107a   :  { %1924 = vmatpush.msra.mxu0 %v3432_v26  ;;  %1944 = vmatpush.msra.mxu1 %v3435_v27  ;;  %v1517_v27 = vsel %vm3154_vm10, %v1508_v1, %v1513_v2 }
0x107c   :  { %1925 = vmatpush.msra.mxu0 %v3438_v28  ;;  %1945 = vmatpush.msra.mxu1 %v3441_v29 }
0x107e   :  { %1926 = vmatpush.msra.mxu0 %v3444_v31  ;;  %1946 = vmatpush.msra.mxu1 %v3447_v32 }
0x10ec   :  { %v1540_v62 = vpop.f32.mrf.mxu0  ;;  %v1560_v25 = vpop.f32.mrf.mxu1 }
0x10ed   :  { %v1563_v24 = vadd.f32 %v1540_v62, %v1516_v61  ;;  %v1564_v28 = vadd.f32 %v1560_v25, %v1517_v27 }
0x10ef   :  { %v1565_v26 = vmul.f32 0.5, %v1563_v24  ;;  %v1570_v59 = vmul.f32 0.5, %v1564_v28 }
0x10f1   :  { %2441 = vtanh.f32 %v1565_v26 }
0x10f2   :  { %2443 = vtanh.f32 %v1564_v28  ;;  %v1687_v28 = vld [vmem:[#allocation2 + $0x15] ss:$8 sm:$0x3] }
0x10f3   :  { %2445 = vtanh.f32 %v1570_v59  ;;  %v1702_v59 = vperm.slane %v1687_v28, 1 }
0x10f7   :  { %v2442_v29 = vpop.eup %2441 }
0x10f8   :  { %v1567_v31 = vmul.f32 0.5, %v2442_v29  ;;  %v2444_v57 = vpop.eup %2443  ;;  %v1699_v29 = vld [vmem:[%s1698_s23] ss:$8 sm:$0x3] }
0x10f9   :  { %v2446_v43 = vpop.eup %2445  ;;  %v1707_v63 = vperm.slane %v1699_v29, 1 }
0x10fa   :  { %v1568_v32 = vadd.f32 0.5, %v1567_v31  ;;  %v1572_v49 = vmul.f32 0.5, %v2446_v43  ;;  %v1701_v31 = vperm.slane %v1687_v28, 0 }
0x10fc   :  { %v1575_v58 = vmul.f32 %v2444_v57, %v1568_v32  ;;  %v1574_v41 = vmul.f32 %v1568_v32, %v3654_v33  ;;  %v1573_v50 = vadd.f32 0.5, %v1572_v49  ;;  %v1706_v32 = vperm.slane %v1699_v29, 0 }
0x10fe   :  { %1577 = vrot.lane.b32.xlu1 %v1575_v58, %s2568_s9  ;;  %v1710_v57 = vsel %vm3150_vm9, %v1701_v31, %v1706_v32 }
0x1170   :  { %v1578_v42 = vpop.permute.xlu1 %1577 }
0x1171   :  { %v1580_v46 = vadd.f32 %v1578_v42, %v1574_v41 }
0x1173   :  { %2447 = vtanh.f32 %v1580_v46  ;;  %v1587_v48 = vsel %vm1585_vm12, %v1580_v46, %v3654_v33  ;;  %v1711_v46 = vsel %vm3154_vm10, %v1702_v59, %v1707_v63 }
0x1179   :  { %v2448_v3 = vpop.eup %2447 }
0x117a   :  { %v1582_v5 = vmul.f32 %v2448_v3, %v1573_v50 }
0x117c   :  { %v1586_v14 = vsel %vm1585_vm12, %v1582_v5, %v3657_v39  ;;  %v3701_v8 = vsel %vm1585_vm12, %v1582_v5, 0.0 }
0x117d   :  { %v2005_v45 = vrot.slane %v3701_v8, 5  ;;  %1616 = vrot.lane.b32.xlu2 %v1586_v14, %s2568_s9 }
0x117f   :  { %v2028_v7 = vsel %vm295_vm2, %v3666_v56, %v2005_v45 }
0x11d7   :  { %v1617_v4 = vpop.permute.xlu2 %1616 }
0x11d8   :  { %2311 = vmatmul.msk.f32.vlgmr.msra.gmra.mxu2 %vm453_vm8, %v1617_v4  ;;  %2312 = vmatmul.msk.f32.vlgmr.msra.gmra.mxu3 %vm453_vm8, %v1617_v4 }
0x125b   :  { %v1637_v11 = vpop.f32.mrf.mxu2  ;;  %v1657_v15 = vpop.f32.mrf.mxu3 }
0x125c   :  { %v1660_v30 = vadd.f32 %v1637_v11, %v1613_v37  ;;  %v1661_v23 = vadd.f32 %v1657_v15, %v1614_v17 }
0x125e   :  { %v1662_v9 = vmul.f32 0.5, %v1660_v30  ;;  %v1667_v39 = vmul.f32 0.5, %v1661_v23 }
0x1260   :  { %2449 = vtanh.f32 %v1662_v9 }
0x1261   :  { %2451 = vtanh.f32 %v1661_v23 }
0x1262   :  { %2453 = vtanh.f32 %v1667_v39 }
0x1266   :  { %v2450_v33 = vpop.eup %2449 }
0x1267   :  { %v1664_v34 = vmul.f32 0.5, %v2450_v33  ;;  %v2452_v36 = vpop.eup %2451  ;;  %v1784_v33 = vld [vmem:[#allocation2 + $0x16] ss:$8 sm:$0x3] }
0x1268   :  { %v2454_v51 = vpop.eup %2453  ;;  %v1799_v54 = vperm.slane %v1784_v33, 1 }
0x1269   :  { %v1665_v35 = vadd.f32 0.5, %v1664_v34  ;;  %v1669_v60 = vmul.f32 0.5, %v2454_v51  ;;  %v1796_v34 = vld [vmem:[%s1795_s28] ss:$8 sm:$0x3] }
0x126b   :  { %v1672_v38 = vmul.f32 %v2452_v36, %v1665_v35  ;;  %v1671_v56 = vmul.f32 %v1665_v35, %v1587_v48  ;;  %v1670_v61 = vadd.f32 0.5, %v1669_v60  ;;  %v1798_v35 = vperm.slane %v1784_v33, 0 }
0x126c   :  { %v1803_v36 = vperm.slane %v1796_v34, 0 }
0x126d   :  { %1674 = vrot.lane.b32.xlu0 %v1672_v38, %s2568_s9 }
0x126e   :  { %v1807_v38 = vsel %vm3150_vm9, %v1798_v35, %v1803_v36 }
0x12df   :  { %v1675_v55 = vpop.permute.xlu0 %1674 }
0x12e0   :  { %v1677_v52 = vadd.f32 %v1675_v55, %v1671_v56  ;;  %v1804_v56 = vperm.slane %v1796_v34, 1 }
0x12e2   :  { %2455 = vtanh.f32 %v1677_v52  ;;  %v1684_v53 = vsel %vm1682_vm13, %v1677_v52, %v1587_v48 }
0x12e8   :  { %v2456_v62 = vpop.eup %2455 }
0x12e9   :  { %v1679_v1 = vmul.f32 %v2456_v62, %v1670_v61 }
0x12eb   :  { %v1683_v2 = vsel %vm1682_vm13, %v1679_v1, %v1586_v14  ;;  %v3721_v24 = vsel %vm1682_vm13, %v1679_v1, 0.0 }
0x12ec   :  { %v2008_v25 = vrot.slane %v3721_v24, 4  ;;  %1713 = vrot.lane.b32.xlu1 %v1683_v2, %s2568_s9 }
0x12ee   :  { %v2029_v26 = vsel %vm297_vm3, %v2028_v7, %v2008_v25  ;;  %v1778_v7 = vstv %s1777_s5  ;;  %s2088_s5 = ssub.s32 16, %s3840_s1  ;;  %s2570_s1 = smov 128  }
0x12ef   :  { %vm1779_vm14 = vcmp.eq.s32.totalorder %v1778_v7, 1  ;;  %s2089_s29 = scalar_lea.vmem [#allocation3], %s2088_s5 }
0x135e   :  { %v1714_v27 = vpop.permute.xlu1 %1713 }
0x135f   :  { %2316 = vmatmul.msk.f32.vlgmr.msrb.gmra.mxu0 %vm453_vm8, %v1714_v27  ;;  %2317 = vmatmul.msk.f32.vlgmr.msrb.gmra.mxu1 %vm453_vm8, %v1714_v27  ;;  %v1875_v27 = vstv %s1874_s0 }
0x1360   :  { %vm1876_vm15 = vcmp.eq.s32.totalorder %v1875_v27, 1 }
0x13dc   :  { %v1734_v58 = vpop.f32.mrf.mxu0  ;;  %v1754_v42 = vpop.f32.mrf.mxu1 }
0x13dd   :  { %v1757_v41 = vadd.f32 %v1734_v58, %v1710_v57  ;;  %v1758_v48 = vadd.f32 %v1754_v42, %v1711_v46 }
0x13df   :  { %v1759_v43 = vmul.f32 0.5, %v1757_v41  ;;  %v1764_v45 = vmul.f32 0.5, %v1758_v48 }
0x13e1   :  { %2457 = vtanh.f32 %v1759_v43 }
0x13e2   :  { %2459 = vtanh.f32 %v1758_v48 }
0x13e3   :  { %2461 = vtanh.f32 %v1764_v45 }
0x13e7   :  { %v2458_v49 = vpop.eup %2457 }
0x13e8   :  { %v1761_v50 = vmul.f32 0.5, %v2458_v49  ;;  %v2460_v5 = vpop.eup %2459  ;;  %v2060_v49 = vrot.slane %v3169_v44, 1  ;;  %v1881_v44 = vld [vmem:[#allocation2 + $0x17] ss:$8 sm:$0x3] }
0x13e9   :  { %v2462_v10 = vpop.eup %2461 }
0x13ea   :  { %v1762_v3 = vadd.f32 0.5, %v1761_v50  ;;  %v1766_v37 = vmul.f32 0.5, %v2462_v10  ;;  %v2075_v50 = vsel %vm303_vm6, %v3533_v16, %v2060_v49  ;;  %v1893_v16 = vld [vmem:[%s1892_s18] ss:$8 sm:$0x3] }
0x13eb   :  { %v1900_v45 = vperm.slane %v1893_v16, 0  ;;  %v1901_v10 = vperm.slane %v1893_v16, 1 }
0x13ec   :  { %v1769_v14 = vmul.f32 %v2460_v5, %v1762_v3  ;;  %v1768_v4 = vmul.f32 %v1762_v3, %v1684_v53  ;;  %v1767_v11 = vadd.f32 0.5, %v1766_v37 }
0x13ee   :  { %1771 = vrot.lane.b32.xlu2 %v1769_v14, %s2568_s9  ;;  %v1895_v14 = vperm.slane %v1881_v44, 0 }
0x13f0   :  { %v1904_v7 = vsel %vm3150_vm9, %v1895_v14, %v1900_v45  ;;  %vm3793_vm9 = vcmp.eq.s32.totalorder %v1972_v20, 1 }
0x1448   :  { %v1772_v22 = vpop.permute.xlu2 %1771 }
0x1449   :  { %v1774_v21 = vadd.f32 %v1772_v22, %v1768_v4  ;;  %v1896_v22 = vperm.slane %v1881_v44, 1 }
0x144b   :  { %2463 = vtanh.f32 %v1774_v21  ;;  %v1781_v13 = vsel %vm1779_vm14, %v1774_v21, %v1684_v53  ;;  %v1808_v53 = vsel %vm3154_vm10, %v1799_v54, %v1804_v56 }
0x1451   :  { %v2464_v12 = vpop.eup %2463 }
0x1452   :  { %v1776_v47 = vmul.f32 %v2464_v12, %v1767_v11  ;;  %v1905_v11 = vsel %vm3154_vm10, %v1896_v22, %v1901_v10 }
0x1454   :  { %v1780_v30 = vsel %vm1779_vm14, %v1776_v47, %v1683_v2  ;;  %v3740_v15 = vsel %vm1779_vm14, %v1776_v47, 0.0 }
0x1455   :  { %v2011_v9 = vrot.slane %v3740_v15, 3  ;;  %1810 = vrot.lane.b32.xlu0 %v1780_v30, %s2568_s9 }
0x1457   :  { %v2030_v17 = vsel %vm299_vm4, %v2029_v26, %v2011_v9 }
0x14c7   :  { %v1811_v23 = vpop.permute.xlu0 %1810 }
0x14c8   :  { %2321 = vmatmul.msk.f32.vlgmr.msrb.gmra.mxu2 %vm453_vm8, %v1811_v23  ;;  %2322 = vmatmul.msk.f32.vlgmr.msrb.gmra.mxu3 %vm453_vm8, %v1811_v23 }
0x154b   :  { %v1831_v39 = vpop.f32.mrf.mxu2  ;;  %v1851_v51 = vpop.f32.mrf.mxu3 }
0x154c   :  { %v1854_v55 = vadd.f32 %v1831_v39, %v1807_v38  ;;  %v1855_v60 = vadd.f32 %v1851_v51, %v1808_v53 }
0x154e   :  { %v1856_v52 = vmul.f32 0.5, %v1854_v55  ;;  %v1861_v26 = vmul.f32 0.5, %v1855_v60 }
0x1550   :  { %2465 = vtanh.f32 %v1856_v52  ;;  %v2035_v52 = vrot.slane %v3740_v15, 6  ;;  %v2041_v15 = vrot.slane %v3659_v40, 3 }
0x1551   :  { %2467 = vtanh.f32 %v1855_v60 }
0x1552   :  { %2469 = vtanh.f32 %v1861_v26 }
0x1556   :  { %v2466_v61 = vpop.eup %2465 }
0x1557   :  { %v1858_v62 = vmul.f32 0.5, %v2466_v61  ;;  %v2468_v2 = vpop.eup %2467  ;;  %v2037_v61 = vrot.slane %v3721_v24, 5 }
0x1558   :  { %v2470_v31 = vpop.eup %2469 }
0x1559   :  { %v1859_v1 = vadd.f32 0.5, %v1858_v62  ;;  %v1863_v58 = vmul.f32 0.5, %v2470_v31 }
0x155b   :  { %v1866_v25 = vmul.f32 %v2468_v2, %v1859_v1  ;;  %v1865_v28 = vmul.f32 %v1859_v1, %v1781_v13  ;;  %v1864_v59 = vadd.f32 0.5, %v1863_v58  ;;  %v2039_v2 = vrot.slane %v3701_v8, 4 }
0x155d   :  { %1868 = vrot.lane.b32.xlu1 %v1866_v25, %s2568_s9 }
0x15cf   :  { %v1869_v29 = vpop.permute.xlu1 %1868 }
0x15d0   :  { %v1871_v32 = vadd.f32 %v1869_v29, %v1865_v28  ;;  %v2043_v28 = vrot.slane %v3613_v0, 2  ;;  %v2046_v29 = vrot.slane %v3572_v18, 1 }
0x15d2   :  { %2471 = vtanh.f32 %v1871_v32  ;;  %v3759_v57 = vsel %vm1876_vm15, %v1871_v32, %v1781_v13 }
0x15d8   :  { %v2472_v63 = vpop.eup %2471 }
0x15d9   :  { %v1873_v41 = vmul.f32 %v2472_v63, %v1864_v59 }
0x15db   :  { %v3761_v42 = vsel %vm1876_vm15, %v1873_v41, %v1780_v30  ;;  %v3763_v43 = vsel %vm1876_vm15, %v1873_v41, 0.0 }
0x15dc   :  { %v2014_v46 = vrot.slane %v3763_v43, 2  ;;  %1907 = vrot.lane.b32.xlu2 %v3761_v42, %s2568_s9  ;;  %v2033_v51 = vrot.slane %v3763_v43, 7 }
0x15de   :  { %v3769_v48 = vsel %vm301_vm5, %v2030_v17, %v2014_v46 }
0x15e4   :  { %2080 = vrot.lane.b32.xlu2 %v2075_v50, %s2568_s9 }
0x1636   :  { %v1908_v3 = vpop.permute.xlu2 %1907 }
0x1637   :  { %2326 = vmatmul.msk.f32.vlgmr.msra.gmra.mxu0 %vm453_vm8, %v1908_v3  ;;  %2327 = vmatmul.msk.f32.vlgmr.msra.gmra.mxu1 %vm453_vm8, %v1908_v3 }
0x163e   :  { %v2081_v5 = vpop.permute.xlu2 %2080 }
0x163f   :  { %2085 = vst.msk [vmem:[#allocation3 + $0x8] sm:$0xff] %vm453_vm8, %v2081_v5 }
0x16b4   :  { %v1928_v4 = vpop.f32.mrf.mxu0  ;;  %v1948_v13 = vpop.f32.mrf.mxu1 }
0x16b5   :  { %v1951_v21 = vadd.f32 %v1928_v4, %v1904_v7  ;;  %v1952_v12 = vadd.f32 %v1948_v13, %v1905_v11 }
0x16b7   :  { %v1953_v37 = vmul.f32 0.5, %v1951_v21  ;;  %v1958_v6 = vmul.f32 0.5, %v1952_v12 }
0x16b9   :  { %2473 = vtanh.f32 %v1953_v37 }
0x16ba   :  { %2475 = vtanh.f32 %v1952_v12 }
0x16bb   :  { %2477 = vtanh.f32 %v1958_v6 }
0x16bf   :  { %v2474_v47 = vpop.eup %2473 }
0x16c0   :  { %v1955_v30 = vmul.f32 0.5, %v2474_v47  ;;  %v2476_v17 = vpop.eup %2475 }
0x16c1   :  { %v2478_v36 = vpop.eup %2477 }
0x16c2   :  { %v1956_v9 = vadd.f32 0.5, %v1955_v30  ;;  %v1960_v39 = vmul.f32 0.5, %v2478_v36 }
0x16c4   :  { %v1963_v23 = vmul.f32 %v2476_v17, %v1956_v9  ;;  %v1962_v33 = vmul.f32 %v1956_v9, %v3759_v57  ;;  %v1961_v54 = vadd.f32 0.5, %v1960_v39 }
0x16c6   :  { %1965 = vrot.lane.b32.xlu0 %v1963_v23, %s2568_s9 }
0x16ce   :  { %2094 = vrot.lane.b32.xlu0 %v3527_v19, %s2568_s9 }
0x1738   :  { %v1966_v34 = vpop.permute.xlu0 %1965 }
0x1739   :  { %v1968_v38 = vadd.f32 %v1966_v34, %v1962_v33 }
0x173b   :  { %2479 = vtanh.f32 %v1968_v38  ;;  %v1975_v19 = vsel %vm3793_vm9, %v1968_v38, %v3759_v57 }
0x1740   :  { %v2095_v18 = vpop.permute.xlu0 %2094 }
0x1741   :  { %v2480_v56 = vpop.eup %2479 }
0x1742   :  { %v1970_v55 = vmul.f32 %v2480_v56, %v1961_v54 }
0x1744   :  { %v1974_v53 = vsel %vm3793_vm9, %v1970_v55, %v3761_v42  ;;  %v1976_v60 = vsel %vm3793_vm9, %v1970_v55, 0.0 }
0x1745   :  { %v2062_v62 = vsel %vm291_vm0, %v1976_v60, %v2033_v51  ;;  %2105 = vrot.lane.b32.xlu2 %v1974_v53, %s2568_s9  ;;  %v2017_v1 = vrot.slane %v1976_v60, 1 }
0x1746   :  { %v2063_v25 = vsel %vm293_vm1, %v2062_v62, %v2035_v52 }
0x1747   :  { %v2064_v26 = vsel %vm295_vm2, %v2063_v25, %v2037_v61  ;;  %v2032_v27 = vsel %vm303_vm6, %v3769_v48, %v2017_v1 }
0x1748   :  { %v2065_v24 = vsel %vm297_vm3, %v2064_v26, %v2039_v2 }
0x1749   :  { %v2066_v31 = vsel %vm299_vm4, %v2065_v24, %v2041_v15 }
0x174a   :  { %v2067_v32 = vsel %vm301_vm5, %v2066_v31, %v2043_v28 }
0x174b   :  { %v2068_v8 = vsel %vm303_vm6, %v2067_v32, %v2046_v29 }
0x174c   :  { %2078 = vrot.lane.b32.xlu1 %v2068_v8, %s2568_s9 }
0x1754   :  { %2096 = vrot.lane.b32.xlu1 %v2032_v27, %s2568_s9  ;;  %s2116_s9 = sshll.u32 %s3845_s6, 4  ;;  %s2117_s9 = int_to_ptr.hbm [resolvable:$true] %s2116_s9 }
0x179f   :  { %v2106_v40 = vpop.permute.xlu2 %2105 }
0x17a0   :  { %v2108_v57 = vsel %vm453_vm8, %v2106_v40, %v1975_v19 }
0x17a1   :  { %2109 = vst [vmem:[%s3846_s7] sm:$0x1] %v2108_v57  ;;  %s2571_s7 = smov 8  }
0x17be   :  { %v2079_v0 = vpop.permute.xlu1 %2078 }
0x17bf   :  { %2084 = vst.msk [vmem:[#allocation3] sm:$0xff] %vm453_vm8, %v2079_v0 }
0x17c6   :  { %v2097_v58 = vpop.permute.xlu1 %2096  ;;  %v2091_v59 = vld [vmem:[%s2089_s29 + $0x8] sm:$0xff]  ;;  %v2090_v63 = vld [vmem:[%s2089_s29] sm:$0xff] }
0x17c7   :  { %v2101_v41 = vsel %vm326_vm7, %v2097_v58, %v2091_v59  ;;  %v2100_v42 = vsel %vm326_vm7, %v2095_v18, %v2090_v63 }
0x17c8   :  { %2103 = vst.msk [vmem:[#allocation10 + $0x8] sm:$0xff] %vm453_vm8, %v2101_v41 }
0x17c9   :  { %2102 = vst.msk [vmem:[#allocation10] sm:$0xff] %vm453_vm8, %v2100_v42 }
0x17ca   :  { %2122 = dma.vmem_to_hbm [thread:$0]  %s2115_s26, 256, %s2117_s9, [#allocation7], %s2570_s1, %s2570_s1, %s2571_s7  }
0x17cb   :  { %2561 = dma.done.wait [#allocation7], 256  }
0x17cc   :  { %2562 = vsyncadd [#allocation7], 4294967040 }
0x17cd   :  { %2131 = vsyncpa [#allocation6], 1 }
0x17ce   :  { %2132 = vsyncpa [#allocation7], 1 }
0x17cf   :  { %2133 = vsyncpa [#allocation8], 1 }

</bundles_post_ra>
